<compile_context>
chip_gen: v7x
topology: tpu7x:2x2x1
jax: 0.10.0
libtpu: 0.0.40
codegen_flags: <defaults>
</compile_context>

<pallas_src>
import functools

import jax
import jax.numpy as jnp
from jax.experimental import pallas as pl
from jax.experimental.pallas import tpu as pltpu


# ----------------------------------------------------------------------------
# Fused conv + batchnorm kernel (two-phase grid)
# ----------------------------------------------------------------------------
def _conv_bn_fused_kernel(x_ref, w_ref, g_ref, b_ref, o_ref,
                          sum_ref, ssq_ref, *,
                          kh, kw, stride, dilation, oh, ow, eps, m_total):
    phase = pl.program_id(0)   # 0 = statistics pass, 1 = normalize/write pass
    batch = pl.program_id(1)
    cout = w_ref.shape[-1]

    # Zero the per-channel statistics once, at the very first grid step.
    @pl.when(jnp.logical_and(phase == 0, batch == 0))
    def _():
        sum_ref[...] = jnp.zeros_like(sum_ref)
        ssq_ref[...] = jnp.zeros_like(ssq_ref)

    # Direct convolution for this image: accumulate KH*KW shifted 1x1 matmuls.
    # bf16 operands, f32 accumulation on the MXU.  This replaces the old
    # XLA-materialized 9x im2col slab.
    acc = jnp.zeros((oh * ow, cout), jnp.float32)
    for i in range(kh):
        for j in range(kw):
            xs = x_ref[0,
                       i * dilation: i * dilation + (oh - 1) * stride + 1,
                       j * dilation: j * dilation + (ow - 1) * stride + 1,
                       :]
            if stride > 1:  # the PSP bottleneck layers all use stride == 1
                xs = xs[::stride, ::stride, :]
            acc = acc + jnp.dot(xs.reshape(oh * ow, -1), w_ref[i * kw + j],
                                preferred_element_type=jnp.float32)

    # Phase 0: only accumulate BatchNorm statistics (per output channel).
    @pl.when(phase == 0)
    def _():
        sum_ref[...] += jnp.sum(acc, axis=0, keepdims=True)
        ssq_ref[...] += jnp.sum(acc * acc, axis=0, keepdims=True)

    # Phase 1: statistics over the full batch are complete -> normalize and
    # write the final output (single HBM write, no intermediate slab).
    @pl.when(phase == 1)
    def _():
        inv_m = 1.0 / m_total
        mean = sum_ref[...] * inv_m                       # (1, Cout) f32
        var = ssq_ref[...] * inv_m - mean * mean          # biased var (PyTorch)
        inv_std = jax.lax.rsqrt(var + eps)
        scale = g_ref[...] * inv_std
        shift = b_ref[...] - mean * scale
        out = acc * scale + shift                         # (OH*OW, Cout) f32
        o_ref[...] = out.reshape(1, oh, ow, cout).astype(o_ref.dtype)


# ----------------------------------------------------------------------------
# Wrapper: layout glue + fused Pallas call
# ----------------------------------------------------------------------------
def conv2d_batchnorm(x_nchw, weight_oihw, gamma, beta, *, stride, padding,
                     dilation, eps=1e-5):
    """Forward of Conv2DBacthNorm (conv bias=False, BN with batch statistics)."""
    n, cin, h, w = x_nchw.shape
    cout, _, kh, kw = weight_oihw.shape
    oh = (h + 2 * padding - dilation * (kh - 1) - 1) // stride + 1
    ow = (w + 2 * padding - dilation * (kw - 1) - 1) // stride + 1
    h_pad, w_pad = h + 2 * padding, w + 2 * padding
    m_total = n * oh * ow

    # --- glue: NCHW -> NHWC, spatial zero-pad, bf16 matmul operands ----------
    x_nhwc = jnp.transpose(x_nchw, (0, 2, 3, 1)).astype(jnp.bfloat16)
    x_pad = jnp.pad(x_nhwc, ((0, 0), (padding, padding), (padding, padding), (0, 0)))
    # PyTorch weight (O, I, KH, KW) -> (KH*KW, I, O): one (Cin, Cout) matrix per tap.
    w_taps = jnp.transpose(weight_oihw, (2, 3, 1, 0)).reshape(kh * kw, cin, cout)
    w_taps = w_taps.astype(jnp.bfloat16)
    g2 = gamma.reshape(1, cout).astype(jnp.float32)
    b2 = beta.reshape(1, cout).astype(jnp.float32)

    kernel = functools.partial(
        _conv_bn_fused_kernel,
        kh=kh, kw=kw, stride=stride, dilation=dilation,
        oh=oh, ow=ow, eps=eps, m_total=m_total)

    # Scheduler hint: conv is computed in both phases; BN adds a few elementwise
    # flops; input is read twice (bf16), output written once (f32).
    conv_flops = 2 * m_total * (kh * kw * cin) * cout
    cost = pl.CostEstimate(
        flops=2 * conv_flops + 6 * m_total * cout,
        transcendentals=cout,
        bytes_accessed=(2 * n * h_pad * w_pad * cin * 2
                        + kh * kw * cin * cout * 2
                        + 2 * cout * 4
                        + m_total * cout * 4))

    # Output block 0 is mapped (but not written) throughout phase 0, so only the
    # final phase-1 values are ever written back to HBM:  p * b == 0 for p == 0.
    out_nhwc = pl.pallas_call(
        kernel,
        out_shape=jax.ShapeDtypeStruct((n, oh, ow, cout), jnp.float32),
        grid_spec=pltpu.PrefetchScalarGridSpec(
            num_scalar_prefetch=0,
            grid=(2, n),                              # (phase, batch)
            in_specs=[
                pl.BlockSpec((1, h_pad, w_pad, cin), lambda p, b: (b, 0, 0, 0)),
                pl.BlockSpec((kh * kw, cin, cout), lambda p, b: (0, 0, 0)),
                pl.BlockSpec((1, cout), lambda p, b: (0, 0)),
                pl.BlockSpec((1, cout), lambda p, b: (0, 0)),
            ],
            out_specs=pl.BlockSpec((1, oh, ow, cout), lambda p, b: (p * b, 0, 0, 0)),
            scratch_shapes=[pltpu.VMEM((1, cout), jnp.float32),   # sum
                            pltpu.VMEM((1, cout), jnp.float32)],  # sum of squares
        ),
        compiler_params=pltpu.CompilerParams(
            # Cross-batch stats reduction + phase dependence => both arbitrary.
            dimension_semantics=("arbitrary", "arbitrary"),
            vmem_limit_bytes=48 * 1024 * 1024,   # headroom below v7x's 64 MiB
        ),
        cost_estimate=cost,
    )(x_pad, w_taps, g2, b2)

    # --- glue: back to NCHW ---------------------------------------------------
    return jnp.transpose(out_nhwc, (0, 3, 1, 2))


# ----------------------------------------------------------------------------
# Pure-JAX reference (same bf16-operand / f32-accumulation precision policy)
# ----------------------------------------------------------------------------
def _reference(x_nchw, weight_oihw, gamma, beta, *, stride, padding, dilation,
               eps=1e-5):
    xb = x_nchw.astype(jnp.bfloat16)
    wb = weight_oihw.astype(jnp.bfloat16)
    y = jax.lax.conv_general_dilated(
        xb, wb,
        window_strides=(stride, stride),
        padding=[(padding, padding), (padding, padding)],
        rhs_dilation=(dilation, dilation),
        dimension_numbers=("NCHW", "OIHW", "NCHW"),
        preferred_element_type=jnp.float32,
    )
    mean = jnp.mean(y, axis=(0, 2, 3), keepdims=True)
    var = jnp.mean((y - mean) ** 2, axis=(0, 2, 3), keepdims=True)
    g = gamma.reshape(1, -1, 1, 1)
    b = beta.reshape(1, -1, 1, 1)
    return (y - mean) * jax.lax.rsqrt(var + eps) * g + b


# ----------------------------------------------------------------------------
# Main
# ----------------------------------------------------------------------------
if __name__ == "__main__":
    # Config matching Conv2DBacthNorm(in=4, out=8, k=3, stride=1, pad=1,
    # dilation=1, bias=False), BN in training mode (batch statistics).
    in_channels, out_channels = 4, 8
    kernel_size, stride, padding, dilation = 3, 1, 1, 1

    key = jax.random.PRNGKey(0)
    kx, kwt, kg, kb = jax.random.split(key, 4)

    x = jax.random.normal(kx, (2, in_channels, 16, 16), dtype=jnp.float32)
    weight = jax.random.normal(
        kwt, (out_channels, in_channels, kernel_size, kernel_size),
        dtype=jnp.float32) * 0.1
    gamma = 1.0 + 0.1 * jax.random.normal(kg, (out_channels,), dtype=jnp.float32)
    beta = 0.1 * jax.random.normal(kb, (out_channels,), dtype=jnp.float32)

    out = conv2d_batchnorm(
        x, weight, gamma, beta,
        stride=stride, padding=padding, dilation=dilation)
    out = jax.block_until_ready(out)

    ref = _reference(
        x, weight, gamma, beta,
        stride=stride, padding=padding, dilation=dilation)
    ref = jax.block_until_ready(ref)

    assert out.shape == (2, out_channels, 16, 16), out.shape
    # Tolerance covers f32 accumulation-order differences of bf16 products
    # between the 9-tap kernel and XLA's convolution.
    max_err = float(jnp.max(jnp.abs(out - ref)))
    assert jnp.allclose(out, ref, atol=1e-3, rtol=1e-3), max_err

    print("KERNEL_OK")
</pallas_src>

<mosaic_0001>
module attributes {stable_mosaic.version = 11 : i64} {
  func.func @_conv_bn_fused_kernel(%arg0: i32, %arg1: i32, %arg2: memref<1x18x18x4xbf16, #tpu.memory_space<vmem>>, %arg3: memref<9x4x8xbf16, #tpu.memory_space<vmem>>, %arg4: memref<1x8xf32, #tpu.memory_space<vmem>>, %arg5: memref<1x8xf32, #tpu.memory_space<vmem>>, %arg6: memref<1x16x16x8xf32, #tpu.memory_space<vmem>>, %arg7: memref<1x8xf32, #tpu.memory_space<vmem>>, %arg8: memref<1x8xf32, #tpu.memory_space<vmem>>) attributes {dimension_semantics = [#tpu.dimension_semantics<arbitrary>, #tpu.dimension_semantics<arbitrary>], iteration_bounds = array<i64: 2, 2>, scalar_prefetch = 0 : i64, scratch_operands = 2 : i64, tpu.core_type = #tpu.core_type<tc>, window_params = [{transform_indices = @transform_0, window_bounds = array<i64: 1, 18, 18, 4>}, {pipeline_mode = #tpu.pipeline_mode<synchronous>, transform_indices = @transform_1, window_bounds = array<i64: 9, 4, 8>}, {pipeline_mode = #tpu.pipeline_mode<synchronous>, transform_indices = @transform_2, window_bounds = array<i64: 1, 8>}, {pipeline_mode = #tpu.pipeline_mode<synchronous>, transform_indices = @transform_3, window_bounds = array<i64: 1, 8>}, {transform_indices = @transform_4, window_bounds = array<i64: 1, 16, 16, 8>}]} {
    %c0_i32 = arith.constant 0 : i32
    %0 = arith.cmpi eq, %arg0, %c0_i32 : i32
    %c0_i32_0 = arith.constant 0 : i32
    %1 = arith.cmpi eq, %arg1, %c0_i32_0 : i32
    %2 = arith.andi %0, %1 : i1
    %3 = arith.extui %2 : i1 to i32
    %c0_i32_1 = arith.constant 0 : i32
    %4 = arith.cmpi ne, %3, %c0_i32_1 : i32
    scf.if %4 {
      %cst_68 = arith.constant 0.000000e+00 : f32
      %75 = vector.broadcast %cst_68 : f32 to vector<1x8xf32>
      %c0_69 = arith.constant 0 : index
      %c0_70 = arith.constant 0 : index
      %76 = vector.load %arg7[%c0_69, %c0_70] : memref<1x8xf32, #tpu.memory_space<vmem>>, vector<1x8xf32>
      tpu.vector_store %arg7[%c0_69, %c0_70], %75 {strides = array<i32>} : memref<1x8xf32, #tpu.memory_space<vmem>>, vector<1x8xf32>,
      %cst_71 = arith.constant 0.000000e+00 : f32
      %77 = vector.broadcast %cst_71 : f32 to vector<1x8xf32>
      %c0_72 = arith.constant 0 : index
      %c0_73 = arith.constant 0 : index
      %78 = vector.load %arg8[%c0_72, %c0_73] : memref<1x8xf32, #tpu.memory_space<vmem>>, vector<1x8xf32>
      tpu.vector_store %arg8[%c0_72, %c0_73], %77 {strides = array<i32>} : memref<1x8xf32, #tpu.memory_space<vmem>>, vector<1x8xf32>,
    } else {
    }
    %cst = arith.constant 0.000000e+00 : f32
    %5 = vector.broadcast %cst : f32 to vector<256x8xf32>
    %c0 = arith.constant 0 : index
    %c0_2 = arith.constant 0 : index
    %c0_3 = arith.constant 0 : index
    %c0_4 = arith.constant 0 : index
    %6 = vector.load %arg2[%c0, %c0_2, %c0_3, %c0_4] : memref<1x18x18x4xbf16, #tpu.memory_space<vmem>>, vector<1x16x16x4xbf16>
    %7 = vector.shape_cast %6 : vector<1x16x16x4xbf16> to vector<16x16x4xbf16>
    %8 = vector.shape_cast %7 : vector<16x16x4xbf16> to vector<256x4xbf16>
    %c0_5 = arith.constant 0 : index
    %c0_6 = arith.constant 0 : index
    %c0_7 = arith.constant 0 : index
    %9 = vector.load %arg3[%c0_5, %c0_6, %c0_7] : memref<9x4x8xbf16, #tpu.memory_space<vmem>>, vector<1x4x8xbf16>
    %10 = vector.shape_cast %9 : vector<1x4x8xbf16> to vector<4x8xbf16>
    %cst_8 = arith.constant dense<0.000000e+00> : vector<256x8xf32>
    %11 = tpu.matmul %8, %10, %cst_8 {dimension_numbers = #tpu.dot_dimension_numbers<[1], [0], [0], [1], [0, 0, 1, 1], [], []>} : vector<256x4xbf16>, vector<4x8xbf16>, vector<256x8xf32> -> vector<256x8xf32>
    %12 = arith.addf %5, %11 : vector<256x8xf32>
    %c0_9 = arith.constant 0 : index
    %c0_10 = arith.constant 0 : index
    %c1 = arith.constant 1 : index
    %c0_11 = arith.constant 0 : index
    %13 = vector.load %arg2[%c0_9, %c0_10, %c1, %c0_11] : memref<1x18x18x4xbf16, #tpu.memory_space<vmem>>, vector<1x16x16x4xbf16>
    %14 = vector.shape_cast %13 : vector<1x16x16x4xbf16> to vector<16x16x4xbf16>
    %15 = vector.shape_cast %14 : vector<16x16x4xbf16> to vector<256x4xbf16>
    %c1_12 = arith.constant 1 : index
    %c0_13 = arith.constant 0 : index
    %c0_14 = arith.constant 0 : index
    %16 = vector.load %arg3[%c1_12, %c0_13, %c0_14] : memref<9x4x8xbf16, #tpu.memory_space<vmem>>, vector<1x4x8xbf16>
    %17 = vector.shape_cast %16 : vector<1x4x8xbf16> to vector<4x8xbf16>
    %cst_15 = arith.constant dense<0.000000e+00> : vector<256x8xf32>
    %18 = tpu.matmul %15, %17, %cst_15 {dimension_numbers = #tpu.dot_dimension_numbers<[1], [0], [0], [1], [0, 0, 1, 1], [], []>} : vector<256x4xbf16>, vector<4x8xbf16>, vector<256x8xf32> -> vector<256x8xf32>
    %19 = arith.addf %12, %18 : vector<256x8xf32>
    %c0_16 = arith.constant 0 : index
    %c0_17 = arith.constant 0 : index
    %c2 = arith.constant 2 : index
    %c0_18 = arith.constant 0 : index
    %20 = vector.load %arg2[%c0_16, %c0_17, %c2, %c0_18] : memref<1x18x18x4xbf16, #tpu.memory_space<vmem>>, vector<1x16x16x4xbf16>
    %21 = vector.shape_cast %20 : vector<1x16x16x4xbf16> to vector<16x16x4xbf16>
    %22 = vector.shape_cast %21 : vector<16x16x4xbf16> to vector<256x4xbf16>
    %c2_19 = arith.constant 2 : index
    %c0_20 = arith.constant 0 : index
    %c0_21 = arith.constant 0 : index
    %23 = vector.load %arg3[%c2_19, %c0_20, %c0_21] : memref<9x4x8xbf16, #tpu.memory_space<vmem>>, vector<1x4x8xbf16>
    %24 = vector.shape_cast %23 : vector<1x4x8xbf16> to vector<4x8xbf16>
    %cst_22 = arith.constant dense<0.000000e+00> : vector<256x8xf32>
    %25 = tpu.matmul %22, %24, %cst_22 {dimension_numbers = #tpu.dot_dimension_numbers<[1], [0], [0], [1], [0, 0, 1, 1], [], []>} : vector<256x4xbf16>, vector<4x8xbf16>, vector<256x8xf32> -> vector<256x8xf32>
    %26 = arith.addf %19, %25 : vector<256x8xf32>
    %c0_23 = arith.constant 0 : index
    %c1_24 = arith.constant 1 : index
    %c0_25 = arith.constant 0 : index
    %c0_26 = arith.constant 0 : index
    %27 = vector.load %arg2[%c0_23, %c1_24, %c0_25, %c0_26] : memref<1x18x18x4xbf16, #tpu.memory_space<vmem>>, vector<1x16x16x4xbf16>
    %28 = vector.shape_cast %27 : vector<1x16x16x4xbf16> to vector<16x16x4xbf16>
    %29 = vector.shape_cast %28 : vector<16x16x4xbf16> to vector<256x4xbf16>
    %c3 = arith.constant 3 : index
    %c0_27 = arith.constant 0 : index
    %c0_28 = arith.constant 0 : index
    %30 = vector.load %arg3[%c3, %c0_27, %c0_28] : memref<9x4x8xbf16, #tpu.memory_space<vmem>>, vector<1x4x8xbf16>
    %31 = vector.shape_cast %30 : vector<1x4x8xbf16> to vector<4x8xbf16>
    %cst_29 = arith.constant dense<0.000000e+00> : vector<256x8xf32>
    %32 = tpu.matmul %29, %31, %cst_29 {dimension_numbers = #tpu.dot_dimension_numbers<[1], [0], [0], [1], [0, 0, 1, 1], [], []>} : vector<256x4xbf16>, vector<4x8xbf16>, vector<256x8xf32> -> vector<256x8xf32>
    %33 = arith.addf %26, %32 : vector<256x8xf32>
    %c0_30 = arith.constant 0 : index
    %c1_31 = arith.constant 1 : index
    %c1_32 = arith.constant 1 : index
    %c0_33 = arith.constant 0 : index
    %34 = vector.load %arg2[%c0_30, %c1_31, %c1_32, %c0_33] : memref<1x18x18x4xbf16, #tpu.memory_space<vmem>>, vector<1x16x16x4xbf16>
    %35 = vector.shape_cast %34 : vector<1x16x16x4xbf16> to vector<16x16x4xbf16>
    %36 = vector.shape_cast %35 : vector<16x16x4xbf16> to vector<256x4xbf16>
    %c4 = arith.constant 4 : index
    %c0_34 = arith.constant 0 : index
    %c0_35 = arith.constant 0 : index
    %37 = vector.load %arg3[%c4, %c0_34, %c0_35] : memref<9x4x8xbf16, #tpu.memory_space<vmem>>, vector<1x4x8xbf16>
    %38 = vector.shape_cast %37 : vector<1x4x8xbf16> to vector<4x8xbf16>
    %cst_36 = arith.constant dense<0.000000e+00> : vector<256x8xf32>
    %39 = tpu.matmul %36, %38, %cst_36 {dimension_numbers = #tpu.dot_dimension_numbers<[1], [0], [0], [1], [0, 0, 1, 1], [], []>} : vector<256x4xbf16>, vector<4x8xbf16>, vector<256x8xf32> -> vector<256x8xf32>
    %40 = arith.addf %33, %39 : vector<256x8xf32>
    %c0_37 = arith.constant 0 : index
    %c1_38 = arith.constant 1 : index
    %c2_39 = arith.constant 2 : index
    %c0_40 = arith.constant 0 : index
    %41 = vector.load %arg2[%c0_37, %c1_38, %c2_39, %c0_40] : memref<1x18x18x4xbf16, #tpu.memory_space<vmem>>, vector<1x16x16x4xbf16>
    %42 = vector.shape_cast %41 : vector<1x16x16x4xbf16> to vector<16x16x4xbf16>
    %43 = vector.shape_cast %42 : vector<16x16x4xbf16> to vector<256x4xbf16>
    %c5 = arith.constant 5 : index
    %c0_41 = arith.constant 0 : index
    %c0_42 = arith.constant 0 : index
    %44 = vector.load %arg3[%c5, %c0_41, %c0_42] : memref<9x4x8xbf16, #tpu.memory_space<vmem>>, vector<1x4x8xbf16>
    %45 = vector.shape_cast %44 : vector<1x4x8xbf16> to vector<4x8xbf16>
    %cst_43 = arith.constant dense<0.000000e+00> : vector<256x8xf32>
    %46 = tpu.matmul %43, %45, %cst_43 {dimension_numbers = #tpu.dot_dimension_numbers<[1], [0], [0], [1], [0, 0, 1, 1], [], []>} : vector<256x4xbf16>, vector<4x8xbf16>, vector<256x8xf32> -> vector<256x8xf32>
    %47 = arith.addf %40, %46 : vector<256x8xf32>
    %c0_44 = arith.constant 0 : index
    %c2_45 = arith.constant 2 : index
    %c0_46 = arith.constant 0 : index
    %c0_47 = arith.constant 0 : index
    %48 = vector.load %arg2[%c0_44, %c2_45, %c0_46, %c0_47] : memref<1x18x18x4xbf16, #tpu.memory_space<vmem>>, vector<1x16x16x4xbf16>
    %49 = vector.shape_cast %48 : vector<1x16x16x4xbf16> to vector<16x16x4xbf16>
    %50 = vector.shape_cast %49 : vector<16x16x4xbf16> to vector<256x4xbf16>
    %c6 = arith.constant 6 : index
    %c0_48 = arith.constant 0 : index
    %c0_49 = arith.constant 0 : index
    %51 = vector.load %arg3[%c6, %c0_48, %c0_49] : memref<9x4x8xbf16, #tpu.memory_space<vmem>>, vector<1x4x8xbf16>
    %52 = vector.shape_cast %51 : vector<1x4x8xbf16> to vector<4x8xbf16>
    %cst_50 = arith.constant dense<0.000000e+00> : vector<256x8xf32>
    %53 = tpu.matmul %50, %52, %cst_50 {dimension_numbers = #tpu.dot_dimension_numbers<[1], [0], [0], [1], [0, 0, 1, 1], [], []>} : vector<256x4xbf16>, vector<4x8xbf16>, vector<256x8xf32> -> vector<256x8xf32>
    %54 = arith.addf %47, %53 : vector<256x8xf32>
    %c0_51 = arith.constant 0 : index
    %c2_52 = arith.constant 2 : index
    %c1_53 = arith.constant 1 : index
    %c0_54 = arith.constant 0 : index
    %55 = vector.load %arg2[%c0_51, %c2_52, %c1_53, %c0_54] : memref<1x18x18x4xbf16, #tpu.memory_space<vmem>>, vector<1x16x16x4xbf16>
    %56 = vector.shape_cast %55 : vector<1x16x16x4xbf16> to vector<16x16x4xbf16>
    %57 = vector.shape_cast %56 : vector<16x16x4xbf16> to vector<256x4xbf16>
    %c7 = arith.constant 7 : index
    %c0_55 = arith.constant 0 : index
    %c0_56 = arith.constant 0 : index
    %58 = vector.load %arg3[%c7, %c0_55, %c0_56] : memref<9x4x8xbf16, #tpu.memory_space<vmem>>, vector<1x4x8xbf16>
    %59 = vector.shape_cast %58 : vector<1x4x8xbf16> to vector<4x8xbf16>
    %cst_57 = arith.constant dense<0.000000e+00> : vector<256x8xf32>
    %60 = tpu.matmul %57, %59, %cst_57 {dimension_numbers = #tpu.dot_dimension_numbers<[1], [0], [0], [1], [0, 0, 1, 1], [], []>} : vector<256x4xbf16>, vector<4x8xbf16>, vector<256x8xf32> -> vector<256x8xf32>
    %61 = arith.addf %54, %60 : vector<256x8xf32>
    %c0_58 = arith.constant 0 : index
    %c2_59 = arith.constant 2 : index
    %c2_60 = arith.constant 2 : index
    %c0_61 = arith.constant 0 : index
    %62 = vector.load %arg2[%c0_58, %c2_59, %c2_60, %c0_61] : memref<1x18x18x4xbf16, #tpu.memory_space<vmem>>, vector<1x16x16x4xbf16>
    %63 = vector.shape_cast %62 : vector<1x16x16x4xbf16> to vector<16x16x4xbf16>
    %64 = vector.shape_cast %63 : vector<16x16x4xbf16> to vector<256x4xbf16>
    %c8 = arith.constant 8 : index
    %c0_62 = arith.constant 0 : index
    %c0_63 = arith.constant 0 : index
    %65 = vector.load %arg3[%c8, %c0_62, %c0_63] : memref<9x4x8xbf16, #tpu.memory_space<vmem>>, vector<1x4x8xbf16>
    %66 = vector.shape_cast %65 : vector<1x4x8xbf16> to vector<4x8xbf16>
    %cst_64 = arith.constant dense<0.000000e+00> : vector<256x8xf32>
    %67 = tpu.matmul %64, %66, %cst_64 {dimension_numbers = #tpu.dot_dimension_numbers<[1], [0], [0], [1], [0, 0, 1, 1], [], []>} : vector<256x4xbf16>, vector<4x8xbf16>, vector<256x8xf32> -> vector<256x8xf32>
    %68 = arith.addf %61, %67 : vector<256x8xf32>
    %c0_i32_65 = arith.constant 0 : i32
    %69 = arith.cmpi eq, %arg0, %c0_i32_65 : i32
    %70 = arith.extui %69 : i1 to i32
    %c0_i32_66 = arith.constant 0 : i32
    %71 = arith.cmpi ne, %70, %c0_i32_66 : i32
    scf.if %71 {
      %c0_68 = arith.constant 0 : index
      %c0_69 = arith.constant 0 : index
      %75 = vector.load %arg7[%c0_68, %c0_69] : memref<1x8xf32, #tpu.memory_space<vmem>>, vector<1x8xf32>
      %cst_70 = arith.constant dense<0.000000e+00> : vector<8xf32>
      %76 = vector.multi_reduction <add>, %68, %cst_70 [0] : vector<256x8xf32> to vector<8xf32>
      %77 = vector.shape_cast %76 : vector<8xf32> to vector<1x8xf32>
      %78 = arith.addf %75, %77 : vector<1x8xf32>
      %c0_71 = arith.constant 0 : index
      %c0_72 = arith.constant 0 : index
      %79 = vector.load %arg7[%c0_71, %c0_72] : memref<1x8xf32, #tpu.memory_space<vmem>>, vector<1x8xf32>
      tpu.vector_store %arg7[%c0_71, %c0_72], %78 {strides = array<i32>} : memref<1x8xf32, #tpu.memory_space<vmem>>, vector<1x8xf32>,
      %c0_73 = arith.constant 0 : index
      %c0_74 = arith.constant 0 : index
      %80 = vector.load %arg8[%c0_73, %c0_74] : memref<1x8xf32, #tpu.memory_space<vmem>>, vector<1x8xf32>
      %81 = arith.mulf %68, %68 : vector<256x8xf32>
      %cst_75 = arith.constant dense<0.000000e+00> : vector<8xf32>
      %82 = vector.multi_reduction <add>, %81, %cst_75 [0] : vector<256x8xf32> to vector<8xf32>
      %83 = vector.shape_cast %82 : vector<8xf32> to vector<1x8xf32>
      %84 = arith.addf %80, %83 : vector<1x8xf32>
      %c0_76 = arith.constant 0 : index
      %c0_77 = arith.constant 0 : index
      %85 = vector.load %arg8[%c0_76, %c0_77] : memref<1x8xf32, #tpu.memory_space<vmem>>, vector<1x8xf32>
      tpu.vector_store %arg8[%c0_76, %c0_77], %84 {strides = array<i32>} : memref<1x8xf32, #tpu.memory_space<vmem>>, vector<1x8xf32>,
    } else {
    }
    %c1_i32 = arith.constant 1 : i32
    %72 = arith.cmpi eq, %arg0, %c1_i32 : i32
    %73 = arith.extui %72 : i1 to i32
    %c0_i32_67 = arith.constant 0 : i32
    %74 = arith.cmpi ne, %73, %c0_i32_67 : i32
    scf.if %74 {
      %c0_68 = arith.constant 0 : index
      %c0_69 = arith.constant 0 : index
      %75 = vector.load %arg7[%c0_68, %c0_69] : memref<1x8xf32, #tpu.memory_space<vmem>>, vector<1x8xf32>
      %cst_70 = arith.constant 0.001953125 : f32
      %76 = vector.broadcast %cst_70 : f32 to vector<1x8xf32>
      %77 = arith.mulf %75, %76 : vector<1x8xf32>
      %c0_71 = arith.constant 0 : index
      %c0_72 = arith.constant 0 : index
      %78 = vector.load %arg8[%c0_71, %c0_72] : memref<1x8xf32, #tpu.memory_space<vmem>>, vector<1x8xf32>
      %cst_73 = arith.constant 0.001953125 : f32
      %79 = vector.broadcast %cst_73 : f32 to vector<1x8xf32>
      %80 = arith.mulf %78, %79 : vector<1x8xf32>
      %81 = arith.mulf %77, %77 : vector<1x8xf32>
      %82 = arith.subf %80, %81 : vector<1x8xf32>
      %cst_74 = arith.constant 9.99999974E-6 : f32
      %83 = vector.broadcast %cst_74 : f32 to vector<1x8xf32>
      %84 = arith.addf %82, %83 : vector<1x8xf32>
      %85 = math.rsqrt %84 : vector<1x8xf32>
      %c0_75 = arith.constant 0 : index
      %c0_76 = arith.constant 0 : index
      %86 = vector.load %arg4[%c0_75, %c0_76] : memref<1x8xf32, #tpu.memory_space<vmem>>, vector<1x8xf32>
      %87 = arith.mulf %86, %85 : vector<1x8xf32>
      %c0_77 = arith.constant 0 : index
      %c0_78 = arith.constant 0 : index
      %88 = vector.load %arg5[%c0_77, %c0_78] : memref<1x8xf32, #tpu.memory_space<vmem>>, vector<1x8xf32>
      %89 = arith.mulf %77, %87 : vector<1x8xf32>
      %90 = arith.subf %88, %89 : vector<1x8xf32>
      %91 = vector.broadcast %87 : vector<1x8xf32> to vector<256x8xf32>
      %92 = arith.mulf %68, %91 : vector<256x8xf32>
      %93 = vector.broadcast %90 : vector<1x8xf32> to vector<256x8xf32>
      %94 = arith.addf %92, %93 : vector<256x8xf32>
      %95 = vector.shape_cast %94 : vector<256x8xf32> to vector<1x16x16x8xf32>
      %c0_79 = arith.constant 0 : index
      %c0_80 = arith.constant 0 : index
      %c0_81 = arith.constant 0 : index
      %c0_82 = arith.constant 0 : index
      %96 = vector.load %arg6[%c0_79, %c0_80, %c0_81, %c0_82] : memref<1x16x16x8xf32, #tpu.memory_space<vmem>>, vector<1x16x16x8xf32>
      tpu.vector_store %arg6[%c0_79, %c0_80, %c0_81, %c0_82], %95 {strides = array<i32>} : memref<1x16x16x8xf32, #tpu.memory_space<vmem>>, vector<1x16x16x8xf32>,
    } else {
    }
    return
  }
  func.func @transform_0(%arg0: i32, %arg1: i32) -> (i32, i32, i32, i32) {
    %c0_i32 = arith.constant 0 : i32
    %c0_i32_0 = arith.constant 0 : i32
    %c0_i32_1 = arith.constant 0 : i32
    %c0_i32_2 = arith.constant 0 : i32
    return %arg1, %c0_i32, %c0_i32_0, %c0_i32_1 : i32, i32, i32, i32
  }
  func.func @transform_1(%arg0: i32, %arg1: i32) -> (i32, i32, i32) {
    %c0_i32 = arith.constant 0 : i32
    %c0_i32_0 = arith.constant 0 : i32
    %c0_i32_1 = arith.constant 0 : i32
    %c0_i32_2 = arith.constant 0 : i32
    return %c0_i32, %c0_i32_0, %c0_i32_1 : i32, i32, i32
  }
  func.func @transform_2(%arg0: i32, %arg1: i32) -> (i32, i32) {
    %c0_i32 = arith.constant 0 : i32
    %c0_i32_0 = arith.constant 0 : i32
    %c0_i32_1 = arith.constant 0 : i32
    return %c0_i32, %c0_i32_0 : i32, i32
  }
  func.func @transform_3(%arg0: i32, %arg1: i32) -> (i32, i32) {
    %c0_i32 = arith.constant 0 : i32
    %c0_i32_0 = arith.constant 0 : i32
    %c0_i32_1 = arith.constant 0 : i32
    return %c0_i32, %c0_i32_0 : i32, i32
  }
  func.func @transform_4(%arg0: i32, %arg1: i32) -> (i32, i32, i32, i32) {
    %0 = arith.muli %arg0, %arg1 : i32
    %c0_i32 = arith.constant 0 : i32
    %c0_i32_0 = arith.constant 0 : i32
    %c0_i32_1 = arith.constant 0 : i32
    %c0_i32_2 = arith.constant 0 : i32
    return %0, %c0_i32, %c0_i32_0, %c0_i32_1 : i32, i32, i32, i32
  }
}

</mosaic_0001>

<bundles_post_ra>
// kernel: tpu_custom_call.1
= control target key start
LH: loop header
LB: loop body
LE: loop exit
PB: predicated region body
PF: predicated region fallthrough
CT: control target
= control target key end

     0   :  { %s6651_s15 = smov 0   ;;  %s6653_s16 = smov 0   ;;  %s8804_s0 = inlined_call_operand.vmem [shape: bf16[2,18,18,4], index: 0, kind: input, shape index: {}]   ;;  %s8805_s1 = inlined_call_operand.vmem [shape: bf16[9,4,8], index: 1, kind: input, shape index: {}]   ;;  %s8806_s2 = inlined_call_operand.vmem [shape: f32[1,8], index: 2, kind: input, shape index: {}]   ;;  %s8807_s3 = inlined_call_operand.vmem [shape: f32[1,8], index: 3, kind: input, shape index: {}]   ;;  %s8808_s4 = inlined_call_operand.vmem [shape: f32[2,16,16,8], index: 4, kind: output, shape index: {}]  }
   0x1   :  { %s6655_s17 = smov 0   ;;  %s6657_s18 = smov 0  }
   0x2   :  { %s6659_s19 = smov 0  }
   0x3 LB: > { %s23_s20 = sadd.s32 1, %s6615_s17  ;;  %s26_s21 = sadd.s32 1, %s6619_s18  ;;  %s6623_s19 = sphi %s6659_s19, %s14_s19   ;;  %s6619_s18 = sphi %s6657_s18, %s8875_s18   ;;  %s6615_s17 = sphi %s6655_s17, %s8874_s17   ;;  %s6611_s16 = sphi %s6653_s16, %s8873_s16   ;;  %s6607_s15 = sphi %s6651_s15, %s8872_s15  }
   0x4   : > { %p24_p0 = scmp.ge.s32.totalorder %s23_s20, 2  ;;  %p5165_p1 = scmp.ge.s32.totalorder %s6623_s19, 1 }
   0x5   : > { %p176_p2 = scmp.lt.s32.totalorder %s6623_s19, 5 }
   0x6   : > { %s8877_s20 = smov (%p24_p0, %s23_s20), 0  ;;  %s8879_s21 = smov (!%p24_p0, %s26_s21), %s6619_s18 }
   0x7   : > { %p177_p3 = pnand %p5165_p1, %p176_p2  ;;  %p28_p4 = scmp.ge.s32.totalorder %s8879_s21, 2 }
   0x9   : > { %s8881_s21 = smov (%p28_p4, %s8879_s21), 0  ;;  %180 = sbr.rel (%p177_p3) target bundleno = 721 (0x2d1), region = 36 }
  0x10   : > { %p203_p5 = scmp.lt.s32.totalorder %s6607_s15, 1  ;;  %s208_s22 = smul.u32 %s6607_s15, %s6611_s16 }
  0x11   : > { %p216_p6 = scmp.eq.s32.totalorder %s6611_s16, 0  ;;  %p217_p7 = scmp.eq.s32.totalorder %s6607_s15, 0 }
  0x12   : > { %s8883_s15 = smov (!%p203_p5, %s6607_s15), 1  ;;  %p209_p8 = scmp.lt.s32.totalorder %s208_s22, 1 }
  0x13   : > { %p218_p9 = pnand %p217_p7, %p216_p6  ;;  %s6437_s23 = smul.u32 216, %s8883_s15 }
  0x14   : > { %s8885_s22 = smov (!%p209_p8, %s208_s22), 1  ;;  %vm222_vm0 = vcmask (!%p218_p9), 57344   ;;  %v6625_v0 = vmov (!%p218_p9), 0.0  }
  0x15   : > { %s6688_s26 = scalar_lea.vmem %s8804_s0, %s6437_s23  ;;  %s5709_s27 = sshll.u32 %s8885_s22, 8  ;;  %223 = vst.msk [vmem:[#allocation2] sm:$0x1] (!%p218_p9), %vm222_vm0, %v6625_v0  ;;  %224 = vst.msk [vmem:[#allocation3] sm:$0x1] (!%p218_p9), %vm222_vm0, %v6625_v0 }
  0x16   : > { %s6693_s30 = scalar_lea.vmem %s8808_s4, %s5709_s27  ;;  %221 = sbr.rel (%p218_p9) target bundleno = 29 (0x1d), region = 40 }
  0x1d PF: > { %v5169_v1 = vld [vmem:[%s8805_s1 + $0x2] sm:$0x3]  ;;  %vm760_vm1 = vcmask 1041408   ;;  %v5396_v2 = vld [vmem:[%s8805_s1 + $0x8] sm:$0x3]  ;;  %vm711_vm5 = vcmask 31744  }
  0x1e   : > { %6427 = vmatprep.subr.msk.bf16.mxu1 %vm760_vm1, %v5169_v1  ;;  %6431 = vmatprep.subr.msk.bf16.mxu0 %vm760_vm1, %v5396_v2  ;;  %v762_v3 = vsel %vm760_vm1, %v5169_v1, 0  ;;  %v6705_v4 = vsel %vm760_vm1, %v5396_v2, 0  ;;  %v225_v5 = vld [vmem:[%s6688_s26] sm:$0xf]  ;;  %v226_v6 = vld [vmem:[%s6688_s26 + $0x4] sm:$0xf] }
  0x1f   : > { %8822 = vst [vmem:[#allocation4_spill] sm:$0xff] %v6705_v4  ;;  %5864 = vmatpush3.bf16.msra.mxu1 %v762_v3  ;;  %6000 = vmatpush3.bf16.msra.mxu0 %v6705_v4  ;;  %v258_v7 = vld [vmem:[%s6688_s26 + $0x8] sm:$0x1]  ;;  %vm274_vm2 = vsmask.f32 3328  ;;  %v278_v8 = vshrl.u32 %v225_v5, 16 }
  0x20   : > { %vm275_vm3 = vsmask.f32 7440  ;;  %v281_v9 = vshll.u32 %v225_v5, 16  ;;  %v287_v10 = vshll.u32 %v226_v6, 16  ;;  %v291_v11 = vshrl.u32 %v226_v6, 16  ;;  %p5705_p10 = scmp.ne.s32.totalorder %s6611_s16, 0 }
  0x21   : > { %v257_v12 = vld [vmem:[%s8805_s1] sm:$0x3]  ;;  %v297_v13 = vshll.u32 %v258_v7, 16  ;;  %v5348_v14 = vld [vmem:[%s6688_s26 + $0xc] sm:$0xf]  ;;  %v280_v16 = vrot.slane %v278_v8, 4  ;;  %vm6735_vm4 = vmor %vm274_vm2, %vm275_vm3 }
  0x22   : > { %6428 = vmatprep.subr.msk.bf16.mxu1 %vm760_vm1, %v257_v12  ;;  %v6717_v15 = vld [vmem:[%s6688_s26 + $0x10] sm:$0xf]  ;;  %v283_v17 = vrot.slane %v281_v9, 5  ;;  %v289_v18 = vrot.slane %v287_v10, 5  ;;  %v293_v19 = vrot.slane %v291_v11, 4  ;;  %v2082_v22 = vshrl.u32 %v5348_v14, 16 }
  0x23   : > { %v6720_v20 = vld [vmem:[%s6688_s26 + $0x14] sm:$0x1]  ;;  %v299_v21 = vrot.slane %v297_v13, 5  ;;  %v2085_v23 = vshll.u32 %v5348_v14, 16  ;;  %v2091_v24 = vshll.u32 %v6717_v15, 16  ;;  %v2095_v28 = vshrl.u32 %v6717_v15, 16 }
  0x24   : > { %v6726_v25 = vld [vmem:[%s8805_s1 + $0xa] sm:$0x3]  ;;  %v284_v26 = vor.u32 %v283_v17, %v280_v16  ;;  %v294_v27 = vor.u32 %v293_v19, %v289_v18  ;;  %v2101_v29 = vshll.u32 %v6720_v20, 16  ;;  %v227_v30 = vld [vmem:[%s6688_s26 + $0xc] sm:$0xf]  ;;  %v2084_v32 = vrot.slane %v2082_v22, 4 }
  0x25   : > { %6433 = vmatprep.subr.msk.bf16.mxu0 %vm760_vm1, %v6726_v25  ;;  %v2087_v33 = vrot.slane %v2085_v23, 5  ;;  %v2093_v34 = vrot.slane %v2091_v24, 5  ;;  %v228_v35 = vld [vmem:[%s6688_s26 + $0x10] sm:$0xf]  ;;  %v2097_v38 = vrot.slane %v2095_v28, 4  ;;  %v302_v42 = vshrl.u32 %v227_v30, 16 }
  0x26   : > { %v285_v36 = vrot.slane %v284_v26, 4  ;;  %v295_v37 = vrot.slane %v294_v27, 4  ;;  %v2103_v40 = vrot.slane %v2101_v29, 5  ;;  %v259_v41 = vld [vmem:[%s6688_s26 + $0x14] sm:$0x1]  ;;  %v305_v43 = vshll.u32 %v227_v30, 16 }
  0x27   : > { %v2088_v39 = vor.u32 %v2087_v33, %v2084_v32  ;;  %v2098_v46 = vor.u32 %v2097_v38, %v2093_v34  ;;  %v311_v47 = vshll.u32 %v228_v35, 16  ;;  %v304_v50 = vrot.slane %v302_v42, 4  ;;  %v5351_v56 = vld [vmem:[%s6688_s26 + $0x18] sm:$0xf]  ;;  %v6752_v61 = vld [vmem:[%s6688_s26 + $0x1c] sm:$0xf] }
  0x28   : > { %v290_v44 = vsel %vm6735_vm4, %v285_v36, %v289_v18  ;;  %v300_v45 = vsel %vm6735_vm4, %v295_v37, %v299_v21  ;;  %v307_v51 = vrot.slane %v305_v43, 5  ;;  %v315_v54 = vshrl.u32 %v228_v35, 16  ;;  %v6755_v62 = vld [vmem:[%s6688_s26 + $0x20] sm:$0x1]  ;;  %v229_v17 = vld [vmem:[%s6688_s26 + $0x18] sm:$0xf] }
  0x29   : > { %v5170_v48 = vcombine.low %v290_v44, %v300_v45  ;;  %v2089_v49 = vrot.slane %v2088_v39, 4  ;;  %v2099_v52 = vrot.slane %v2098_v46, 4  ;;  %v313_v53 = vrot.slane %v311_v47, 5  ;;  %v230_v23 = vld [vmem:[%s6688_s26 + $0x1c] sm:$0xf] }
  0x2a   : > { %v321_v55 = vshll.u32 %v259_v41, 16  ;;  %v2825_v58 = vrot.slane %v6717_v15, 5  ;;  %v2828_v59 = vrot.slane %v6720_v20, 5  ;;  %v308_v60 = vor.u32 %v307_v51, %v304_v50  ;;  %v260_v29 = vld [vmem:[%s6688_s26 + $0x20] sm:$0x1] }
  0x2b   : > { %5865 = vmatprep.mubr.msk.bf16.mxu1 %vm711_vm5, %v5170_v48  ;;  %v2094_v57 = vsel %vm6735_vm4, %v2089_v49, %v2093_v34  ;;  %v2104_v63 = vsel %vm6735_vm4, %v2099_v52, %v2103_v40  ;;  %v317_v0 = vrot.slane %v315_v54, 4  ;;  %v1054_v2 = vsel %vm760_vm1, %v257_v12, 0  ;;  %v5354_v35 = vld [vmem:[%s6688_s26 + $0x24] sm:$0xf]  ;;  %v6781_v44 = vld [vmem:[%s6688_s26 + $0x28] sm:$0xf] }
  0x2c   : > { %v323_v1 = vrot.slane %v321_v55, 5  ;;  %v5397_v3 = vcombine.low %v2094_v57, %v2104_v63  ;;  %v309_v5 = vrot.slane %v308_v60, 4  ;;  %v2106_v6 = vshrl.u32 %v5351_v56, 16  ;;  %v6787_v47 = vld [vmem:[%s6688_s26 + $0x2c] sm:$0x1] }
  0x2d   : > { %v2109_v7 = vshll.u32 %v5351_v56, 16  ;;  %v318_v8 = vor.u32 %v317_v0, %v313_v53  ;;  %v2115_v9 = vshll.u32 %v6752_v61, 16  ;;  %v2119_v10 = vshrl.u32 %v6752_v61, 16 }
  0x2e   : > { %v2125_v11 = vshll.u32 %v6755_v62, 16  ;;  %6001 = vmatprep.mubr.msk.bf16.mxu0 %vm711_vm5, %v5397_v3  ;;  %v314_v13 = vsel %vm6735_vm4, %v309_v5, %v313_v53  ;;  %v2108_v14 = vrot.slane %v2106_v6, 4  ;;  %v2832_v16 = vrot.slane %v6752_v61, 5  ;;  %v231_v53 = vld [vmem:[%s6688_s26 + $0x24] sm:$0xf] }
  0x2f   : > { %v2111_v12 = vrot.slane %v2109_v7, 5  ;;  %v319_v18 = vrot.slane %v318_v8, 4  ;;  %v2117_v19 = vrot.slane %v2115_v9, 5  ;;  %v2121_v21 = vrot.slane %v2119_v10, 4 }
  0x30   : > { %v2127_v22 = vrot.slane %v2125_v11, 5  ;;  %v6771_v26 = vrot.slane %v2832_v16, 4  ;;  %v2835_v27 = vrot.slane %v6755_v62, 5  ;;  %v3034_v28 = vsel %vm760_vm1, %v6726_v25, 0 }
  0x31   : > { %v2112_v24 = vor.u32 %v2111_v12, %v2108_v14  ;;  %v324_v30 = vsel %vm6735_vm4, %v319_v18, %v323_v1  ;;  %v2122_v32 = vor.u32 %v2121_v21, %v2117_v19  ;;  %v326_v33 = vshrl.u32 %v229_v17, 16  ;;  %v5357_v14 = vld [vmem:[%s6688_s26 + $0x30] sm:$0xf] }
  0x32   : > { %v329_v34 = vshll.u32 %v229_v17, 16  ;;  %v5171_v36 = vcombine.low %v314_v13, %v324_v30  ;;  %v335_v38 = vshll.u32 %v230_v23, 16  ;;  %v339_v39 = vshrl.u32 %v230_v23, 16  ;;  %v261_v13 = vld [vmem:[%s6688_s26 + $0x2c] sm:$0x1] }
  0x33   : > { %v2113_v37 = vrot.slane %v2112_v24, 4  ;;  %v2123_v40 = vrot.slane %v2122_v32, 4  ;;  %v328_v41 = vrot.slane %v326_v33, 4  ;;  %v345_v43 = vshll.u32 %v260_v29, 16 }
  0x34   : > { %v331_v42 = vrot.slane %v329_v34, 5  ;;  %5866 = vmatmul.mubr.msk.bf16.vlgmr.msra.gmra.mrb[0].mxu1 %vm711_vm5, %v5171_v36  ;;  %v337_v45 = vrot.slane %v335_v38, 5  ;;  %v341_v46 = vrot.slane %v339_v39, 4  ;;  %v2130_v48 = vshrl.u32 %v5354_v35, 16 }
  0x35   : > { %v2118_v25 = vsel %vm6735_vm4, %v2113_v37, %v2117_v19  ;;  %5898 = vmatpush3.bf16.msra.mxu1 %v1054_v2  ;;  %v2128_v49 = vsel %vm6735_vm4, %v2123_v40, %v2127_v22  ;;  %v347_v51 = vrot.slane %v345_v43, 5  ;;  %v2133_v52 = vshll.u32 %v5354_v35, 16  ;;  %v232_v2 = vld [vmem:[%s6688_s26 + $0x28] sm:$0xf]  ;;  %v6810_v37 = vld [vmem:[%s6688_s26 + $0x38] sm:$0x1] }
  0x36   : > { %v332_v50 = vor.u32 %v331_v42, %v328_v41  ;;  %v5398_v54 = vcombine.low %v2118_v25, %v2128_v49  ;;  %v342_v55 = vor.u32 %v341_v46, %v337_v45  ;;  %v2132_v56 = vrot.slane %v2130_v48, 4  ;;  %v233_v43 = vld [vmem:[%s6688_s26 + $0x30] sm:$0xf]  ;;  %v234_v49 = vld [vmem:[%s6688_s26 + $0x34] sm:$0xf] }
  0x37   : > { %v2139_v57 = vshll.u32 %v6781_v44, 16  ;;  %v2135_v63 = vrot.slane %v2133_v52, 5  ;;  %v2143_v0 = vshrl.u32 %v6781_v44, 16  ;;  %v2149_v1 = vshll.u32 %v6787_v47, 16 }
  0x38   : > { %v333_v60 = vrot.slane %v332_v50, 4  ;;  %6002 = vmatmul.mubr.msk.bf16.vlgmr.msra.gmra.mrb[0].mxu0 %vm711_vm5, %v5398_v54  ;;  %v343_v3 = vrot.slane %v342_v55, 4  ;;  %v350_v6 = vshrl.u32 %v231_v53, 16  ;;  %v353_v7 = vshll.u32 %v231_v53, 16 }
  0x39   : > { %v2141_v5 = vrot.slane %v2139_v57, 5  ;;  %6034 = vmatpush3.bf16.msra.mxu0 %v3034_v28  ;;  %v2136_v9 = vor.u32 %v2135_v63, %v2132_v56  ;;  %v2145_v10 = vrot.slane %v2143_v0, 4  ;;  %v2151_v11 = vrot.slane %v2149_v1, 5  ;;  %v6804_v28 = vld [vmem:[%s6688_s26 + $0x34] sm:$0xf] }
  0x3a   : > { %v338_v8 = vsel %vm6735_vm4, %v333_v60, %v337_v45  ;;  %v348_v12 = vsel %vm6735_vm4, %v343_v3, %v347_v51  ;;  %v352_v17 = vrot.slane %v350_v6, 4  ;;  %v355_v18 = vrot.slane %v353_v7, 5  ;;  %v262_v57 = vld [vmem:[%s6688_s26 + $0x38] sm:$0x1]  ;;  %v5360_v3 = vld [vmem:[%s6688_s26 + $0x3c] sm:$0xf] }
  0x3b   : > { %v359_v19 = vshll.u32 %v232_v2, 16  ;;  %v5172_v21 = vcombine.low %v338_v8, %v348_v12  ;;  %v2137_v22 = vrot.slane %v2136_v9, 4  ;;  %v2146_v23 = vor.u32 %v2145_v10, %v2141_v5  ;;  %v6827_v9 = vld [vmem:[%s6688_s26 + $0x40] sm:$0xf] }
  0x3c   : > { %v363_v24 = vshrl.u32 %v232_v2, 16  ;;  %v356_v29 = vor.u32 %v355_v18, %v352_v17  ;;  %v369_v32 = vshll.u32 %v261_v13, 16  ;;  %v2154_v33 = vshrl.u32 %v5357_v14, 16 }
  0x3d   : > { %v361_v30 = vrot.slane %v359_v19, 5  ;;  %5869 = vmatprep.mubr.msk.bf16.mxu1 %vm711_vm5, %v5172_v21  ;;  %v2142_v34 = vsel %vm6735_vm4, %v2137_v22, %v2141_v5  ;;  %v2147_v35 = vrot.slane %v2146_v23, 4  ;;  %v2157_v38 = vshll.u32 %v5357_v14, 16  ;;  %v6832_v19 = vld [vmem:[%s6688_s26 + $0x44] sm:$0x1] }
  0x3e   : > { %v365_v36 = vrot.slane %v363_v24, 4  ;;  %v357_v39 = vrot.slane %v356_v29, 4  ;;  %v371_v40 = vrot.slane %v369_v32, 5  ;;  %v2156_v41 = vrot.slane %v2154_v33, 4  ;;  %v6840_v32 = vld [vmem:[%s8805_s1 + $0xc] sm:$0x3] }
  0x3f   : > { %v2163_v42 = vshll.u32 %v6804_v28, 16  ;;  %v2152_v25 = vsel %vm6735_vm4, %v2147_v35, %v2151_v11  ;;  %v2159_v46 = vrot.slane %v2157_v38, 5  ;;  %v2167_v48 = vshrl.u32 %v6804_v28, 16  ;;  %6434 = vmatprep.subr.msk.bf16.mxu0 %vm760_vm1, %v6840_v32 }
  0x40   : > { %v366_v45 = vor.u32 %v365_v36, %v361_v30  ;;  %v5399_v50 = vcombine.low %v2142_v34, %v2152_v25  ;;  %v362_v51 = vsel %vm6735_vm4, %v357_v39, %v361_v30  ;;  %v2173_v53 = vshll.u32 %v6810_v37, 16  ;;  %v235_v30 = vld [vmem:[%s6688_s26 + $0x3c] sm:$0xf] }
  0x41   : > { %v2165_v52 = vrot.slane %v2163_v42, 5  ;;  %v2160_v55 = vor.u32 %v2159_v46, %v2156_v41  ;;  %v2169_v56 = vrot.slane %v2167_v48, 4  ;;  %v374_v60 = vshrl.u32 %v233_v43, 16 }
  0x42   : > { %v367_v54 = vrot.slane %v366_v45, 4  ;;  %6005 = vmatprep.mubr.msk.bf16.mxu0 %vm711_vm5, %v5399_v50  ;;  %v2175_v63 = vrot.slane %v2173_v53, 5  ;;  %v377_v0 = vshll.u32 %v233_v43, 16  ;;  %v383_v1 = vshll.u32 %v234_v49, 16  ;;  %v236_v45 = vld [vmem:[%s6688_s26 + $0x40] sm:$0xf] }
  0x43   : > { %v387_v2 = vshrl.u32 %v234_v49, 16  ;;  %v2161_v6 = vrot.slane %v2160_v55, 4  ;;  %v2170_v7 = vor.u32 %v2169_v56, %v2165_v52  ;;  %v376_v8 = vrot.slane %v374_v60, 4  ;;  %v5363_v53 = vld [vmem:[%s6688_s26 + $0x48] sm:$0xf] }
  0x44   : > { %v372_v5 = vsel %vm6735_vm4, %v367_v54, %v371_v40  ;;  %v379_v11 = vrot.slane %v377_v0, 5  ;;  %v385_v13 = vrot.slane %v383_v1, 5  ;;  %v393_v18 = vshll.u32 %v262_v57, 16 }
  0x45   : > { %v5173_v10 = vcombine.low %v362_v51, %v372_v5  ;;  %v389_v14 = vrot.slane %v387_v2, 4  ;;  %v2166_v12 = vsel %vm6735_vm4, %v2161_v6, %v2165_v52  ;;  %v2171_v17 = vrot.slane %v2170_v7, 4  ;;  %v263_v51 = vld [vmem:[%s6688_s26 + $0x44] sm:$0x1]  ;;  %v6858_v5 = vld [vmem:[%s6688_s26 + $0x4c] sm:$0xf] }
  0x46   : > { %v2178_v21 = vshrl.u32 %v5360_v3, 16  ;;  %v380_v22 = vor.u32 %v379_v11, %v376_v8  ;;  %v2181_v24 = vshll.u32 %v5360_v3, 16  ;;  %v2187_v29 = vshll.u32 %v6827_v9, 16 }
  0x47   : > { %5870 = vmatmul.mubr.msk.bf16.gmra.mrb[4].mxu1 %vm711_vm5, %v5173_v10  ;;  %v390_v23 = vor.u32 %v389_v14, %v385_v13  ;;  %v2176_v33 = vsel %vm6735_vm4, %v2171_v17, %v2175_v63  ;;  %v395_v34 = vrot.slane %v393_v18, 5  ;;  %v2191_v36 = vshrl.u32 %v6827_v9, 16  ;;  %v6863_v14 = vld [vmem:[%s6688_s26 + $0x50] sm:$0x1] }
  0x48   : > { %v2180_v35 = vrot.slane %v2178_v21, 4  ;;  %v5400_v38 = vcombine.low %v2166_v12, %v2176_v33  ;;  %v381_v39 = vrot.slane %v380_v22, 4  ;;  %v2183_v41 = vrot.slane %v2181_v24, 5  ;;  %v6866_v12 = vld [vmem:[%s6688_s26 + $0x48] sm:$0xf] }
  0x49   : > { %v391_v40 = vrot.slane %v390_v23, 4  ;;  %v2189_v42 = vrot.slane %v2187_v29, 5  ;;  %v2193_v43 = vrot.slane %v2191_v36, 4  ;;  %v2197_v25 = vshll.u32 %v6832_v19, 16  ;;  %v6874_v36 = vld [vmem:[%s6688_s26 + $0x4c] sm:$0xf] }
  0x4a   : > { %v398_v46 = vshrl.u32 %v235_v30, 16  ;;  %6006 = vmatmul.mubr.msk.bf16.gmra.mrb[4].mxu0 %vm711_vm5, %v5400_v38  ;;  %v386_v48 = vsel %vm6735_vm4, %v381_v39, %v385_v13  ;;  %v2184_v50 = vor.u32 %v2183_v41, %v2180_v35  ;;  %v401_v52 = vshll.u32 %v235_v30, 16 }
  0x4b   : > { %v396_v49 = vsel %vm6735_vm4, %v391_v40, %v395_v34  ;;  %v2194_v55 = vor.u32 %v2193_v43, %v2189_v42  ;;  %v2199_v56 = vrot.slane %v2197_v25, 5  ;;  %v407_v0 = vshll.u32 %v236_v45, 16 }
  0x4c   : > { %v5174_v54 = vcombine.low %v386_v48, %v396_v49  ;;  %v400_v57 = vrot.slane %v398_v46, 4  ;;  %v2185_v60 = vrot.slane %v2184_v50, 4  ;;  %v403_v63 = vrot.slane %v401_v52, 5  ;;  %v5366_v49 = vld [vmem:[%s6688_s26 + $0x54] sm:$0xf] }
  0x4d   : > { %v411_v1 = vshrl.u32 %v236_v45, 16  ;;  %v2195_v2 = vrot.slane %v2194_v55, 4  ;;  %v417_v3 = vshll.u32 %v263_v51, 16  ;;  %v2202_v6 = vshrl.u32 %v5363_v53, 16 }
  0x4e   : > { %5873 = vmatprep.mubr.msk.bf16.mxu1 %vm711_vm5, %v5174_v54  ;;  %v2205_v7 = vshll.u32 %v5363_v53, 16  ;;  %v2190_v8 = vsel %vm6735_vm4, %v2185_v60, %v2189_v42  ;;  %v404_v10 = vor.u32 %v403_v63, %v400_v57  ;;  %v409_v11 = vrot.slane %v407_v0, 5  ;;  %v264_v42 = vld [vmem:[%s6688_s26 + $0x50] sm:$0x1]  ;;  %v6888_v54 = vld [vmem:[%s6688_s26 + $0x58] sm:$0xf] }
  0x4f   : > { %v413_v13 = vrot.slane %v411_v1, 4  ;;  %v2200_v17 = vsel %vm6735_vm4, %v2195_v2, %v2199_v56  ;;  %v419_v18 = vrot.slane %v417_v3, 5  ;;  %v2204_v21 = vrot.slane %v2202_v6, 4  ;;  %v6893_v2 = vld [vmem:[%s6688_s26 + $0x5c] sm:$0x1] }
  0x50   : > { %v2207_v22 = vrot.slane %v2205_v7, 5  ;;  %v5401_v23 = vcombine.low %v2190_v8, %v2200_v17  ;;  %v405_v24 = vrot.slane %v404_v10, 4  ;;  %v2211_v30 = vshll.u32 %v6858_v5, 16 }
  0x51   : > { %v414_v29 = vor.u32 %v413_v13, %v409_v11  ;;  %v2215_v34 = vshrl.u32 %v6858_v5, 16  ;;  %v2221_v35 = vshll.u32 %v6863_v14, 16  ;;  %v422_v38 = vshrl.u32 %v6866_v12, 16 }
  0x52   : > { %v2208_v33 = vor.u32 %v2207_v22, %v2204_v21  ;;  %6009 = vmatprep.mubr.msk.bf16.mxu0 %vm711_vm5, %v5401_v23  ;;  %v410_v39 = vsel %vm6735_vm4, %v405_v24, %v409_v11  ;;  %v2213_v41 = vrot.slane %v2211_v30, 5  ;;  %v425_v43 = vshll.u32 %v6866_v12, 16  ;;  %v6899_v21 = vld [vmem:[%s6688_s26 + $0x54] sm:$0xf]  ;;  %v6905_v30 = vld [vmem:[%s6688_s26 + $0x58] sm:$0xf] }
  0x53   : > { %v415_v40 = vrot.slane %v414_v29, 4  ;;  %v2217_v45 = vrot.slane %v2215_v34, 4  ;;  %v2223_v46 = vrot.slane %v2221_v35, 5  ;;  %v424_v48 = vrot.slane %v422_v38, 4 }
  0x54   : > { %v2209_v25 = vrot.slane %v2208_v33, 4  ;;  %v427_v51 = vrot.slane %v425_v43, 5  ;;  %v431_v52 = vshll.u32 %v6874_v36, 16  ;;  %v435_v53 = vshrl.u32 %v6874_v36, 16 }
  0x55   : > { %v420_v50 = vsel %vm6735_vm4, %v415_v40, %v419_v18  ;;  %v2218_v57 = vor.u32 %v2217_v45, %v2213_v41  ;;  %v441_v60 = vshll.u32 %v264_v42, 16  ;;  %v2226_v3 = vshrl.u32 %v5366_v49, 16 }
  0x56   : > { %v5175_v55 = vcombine.low %v410_v39, %v420_v50  ;;  %v2214_v56 = vsel %vm6735_vm4, %v2209_v25, %v2213_v41  ;;  %v428_v63 = vor.u32 %v427_v51, %v424_v48  ;;  %v433_v0 = vrot.slane %v431_v52, 5  ;;  %v265_v41 = vld [vmem:[%s6688_s26 + $0x5c] sm:$0x1]  ;;  %v6921_v50 = vld [vmem:[%s8805_s1 + $0x4] sm:$0x3] }
  0x57   : > { %v437_v1 = vrot.slane %v435_v53, 4  ;;  %v2219_v6 = vrot.slane %v2218_v57, 4  ;;  %v443_v7 = vrot.slane %v441_v60, 5  ;;  %v2229_v8 = vshll.u32 %v5366_v49, 16  ;;  %v5369_v49 = vld [vmem:[%s6688_s26 + $0x60] sm:$0xf]  ;;  %6429 = vmatprep.subr.msk.bf16.mxu1 %vm760_vm1, %v6921_v50 }
  0x58   : > { %5874 = vmatmul.mubr.msk.bf16.gmra.mrb[8].mxu1 %vm711_vm5, %v5175_v55  ;;  %v2235_v10 = vshll.u32 %v6888_v54, 16  ;;  %v429_v11 = vrot.slane %v428_v63, 4  ;;  %v2228_v17 = vrot.slane %v2226_v3, 4  ;;  %v2239_v18 = vshrl.u32 %v6888_v54, 16 }
  0x59   : > { %v438_v13 = vor.u32 %v437_v1, %v433_v0  ;;  %v2224_v22 = vsel %vm6735_vm4, %v2219_v6, %v2223_v46  ;;  %v2231_v23 = vrot.slane %v2229_v8, 5  ;;  %v2245_v29 = vshll.u32 %v6893_v2, 16  ;;  %v6932_v6 = vld [vmem:[%s6688_s26 + $0x68] sm:$0x1] }
  0x5a   : > { %v2237_v24 = vrot.slane %v2235_v10, 5  ;;  %v5402_v33 = vcombine.low %v2214_v56, %v2224_v22  ;;  %v434_v34 = vsel %vm6735_vm4, %v429_v11, %v433_v0  ;;  %v2241_v38 = vrot.slane %v2239_v18, 4  ;;  %v6924_v56 = vld [vmem:[%s6688_s26 + $0x64] sm:$0xf]  ;;  %v6938_v18 = vld [vmem:[%s6688_s26 + $0x60] sm:$0xf] }
  0x5b   : > { %v439_v35 = vrot.slane %v438_v13, 4  ;;  %v2232_v39 = vor.u32 %v2231_v23, %v2228_v17  ;;  %v2247_v40 = vrot.slane %v2245_v29, 5  ;;  %v446_v42 = vshrl.u32 %v6899_v21, 16 }
  0x5c   : > { %v449_v43 = vshll.u32 %v6899_v21, 16  ;;  %6010 = vmatmul.mubr.msk.bf16.gmra.mrb[8].mxu0 %vm711_vm5, %v5402_v33  ;;  %v2242_v45 = vor.u32 %v2241_v38, %v2237_v24  ;;  %v455_v46 = vshll.u32 %v6905_v30, 16  ;;  %v459_v48 = vshrl.u32 %v6905_v30, 16 }
  0x5d   : > { %v444_v25 = vsel %vm6735_vm4, %v439_v35, %v443_v7  ;;  %v2233_v52 = vrot.slane %v2232_v39, 4  ;;  %v448_v53 = vrot.slane %v446_v42, 4  ;;  %v465_v0 = vshll.u32 %v265_v41, 16  ;;  %v266_v42 = vld [vmem:[%s6688_s26 + $0x68] sm:$0x1] }
  0x5e   : > { %v5176_v51 = vcombine.low %v434_v34, %v444_v25  ;;  %v451_v55 = vrot.slane %v449_v43, 5  ;;  %v2243_v57 = vrot.slane %v2242_v45, 4  ;;  %v457_v60 = vrot.slane %v455_v46, 5 }
  0x5f   : > { %v461_v63 = vrot.slane %v459_v48, 4  ;;  %v2238_v1 = vsel %vm6735_vm4, %v2233_v52, %v2237_v24  ;;  %v2250_v7 = vshrl.u32 %v5369_v49, 16  ;;  %v2253_v8 = vshll.u32 %v5369_v49, 16  ;;  %v6941_v24 = vld [vmem:[%s6688_s26 + $0x64] sm:$0xf] }
  0x60   : > { %5877 = vmatprep.mubr.msk.bf16.mxu1 %vm711_vm5, %v5176_v51  ;;  %v452_v3 = vor.u32 %v451_v55, %v448_v53  ;;  %v2248_v10 = vsel %vm6735_vm4, %v2243_v57, %v2247_v40  ;;  %v467_v13 = vrot.slane %v465_v0, 5  ;;  %v2259_v17 = vshll.u32 %v6924_v56, 16  ;;  %v5429_v57 = vld [vmem:[%s6688_s26 + $0xc] sm:$0xe] }
  0x61   : > { %v462_v11 = vor.u32 %v461_v63, %v457_v60  ;;  %v5403_v22 = vcombine.low %v2238_v1, %v2248_v10  ;;  %v2252_v29 = vrot.slane %v2250_v7, 4  ;;  %v2255_v33 = vrot.slane %v2253_v8, 5  ;;  %v6963_v10 = vld [vmem:[%s6688_s26 + $0x70] sm:$0xf] }
  0x62   : > { %v453_v23 = vrot.slane %v452_v3, 4  ;;  %v2261_v35 = vrot.slane %v2259_v17, 5  ;;  %v2263_v38 = vshrl.u32 %v6924_v56, 16  ;;  %v2269_v39 = vshll.u32 %v6932_v6, 16  ;;  %v6957_v3 = vld [vmem:[%s6688_s26 + $0x6c] sm:$0xf] }
  0x63   : > { %v463_v34 = vrot.slane %v462_v11, 4  ;;  %6013 = vmatprep.mubr.msk.bf16.mxu0 %vm711_vm5, %v5403_v22  ;;  %v2256_v41 = vor.u32 %v2255_v33, %v2252_v29  ;;  %v470_v43 = vshrl.u32 %v6938_v18, 16  ;;  %v473_v25 = vshll.u32 %v6938_v18, 16 }
  0x64   : > { %v458_v40 = vsel %vm6735_vm4, %v453_v23, %v457_v60  ;;  %v2265_v46 = vrot.slane %v2263_v38, 4  ;;  %v2271_v48 = vrot.slane %v2269_v39, 5  ;;  %v479_v49 = vshll.u32 %v6941_v24, 16 }
  0x65   : > { %v468_v45 = vsel %vm6735_vm4, %v463_v34, %v467_v13  ;;  %v2257_v52 = vrot.slane %v2256_v41, 4  ;;  %v472_v53 = vrot.slane %v470_v43, 4  ;;  %v475_v55 = vrot.slane %v473_v25, 5  ;;  %v267_v41 = vld [vmem:[%s6688_s26 + $0x74] sm:$0x1] }
  0x66   : > { %v5177_v51 = vcombine.low %v458_v40, %v468_v45  ;;  %v2266_v60 = vor.u32 %v2265_v46, %v2261_v35  ;;  %v481_v63 = vrot.slane %v479_v49, 5  ;;  %v483_v0 = vshrl.u32 %v6941_v24, 16  ;;  %v5430_v43 = vld [vmem:[%s6688_s26 + $0x18] sm:$0xe] }
  0x67   : > { %v489_v1 = vshll.u32 %v266_v42, 16  ;;  %v2262_v7 = vsel %vm6735_vm4, %v2257_v52, %v2261_v35  ;;  %v476_v8 = vor.u32 %v475_v55, %v472_v53  ;;  %vm1265_vm6 = vcmask 1042432   ;;  %v6989_v49 = vld [vmem:[%s6688_s26 + $0x78] sm:$0xf]  ;;  %v6992_v53 = vld [vmem:[%s6688_s26 + $0x7c] sm:$0xf] }
  0x68   : > { %5878 = vmatmul.mubr.msk.bf16.gmra.mrb[12].mxu1 %vm711_vm5, %v5177_v51  ;;  %vm1266_vm7 = vcmask 1046532   ;;  %v2267_v11 = vrot.slane %v2266_v60, 4  ;;  %v485_v13 = vrot.slane %v483_v0, 4  ;;  %v5445_v23 = vrot.slane %v5429_v57, 9 }
  0x69   : > { %v491_v17 = vrot.slane %v489_v1, 5  ;;  %vm6965_vm8 = vmor %vm1265_vm6, %vm1266_vm7  ;;  %v477_v29 = vrot.slane %v476_v8, 4  ;;  %v2827_v33 = vrot.slane %v2825_v58, 4  ;;  %v494_v34 = vshrl.u32 %v6957_v3, 16 }
  0x6a   : > { %v497_v35 = vshll.u32 %v6957_v3, 16  ;;  %v2272_v38 = vsel %vm6735_vm4, %v2267_v11, %v2271_v48  ;;  %v486_v39 = vor.u32 %v485_v13, %v481_v63  ;;  %v2826_v40 = vsel %vm6965_vm8, %v5445_v23, %v2825_v58 }
  0x6b   : > { %v503_v42 = vshll.u32 %v6963_v10, 16  ;;  %v5404_v25 = vcombine.low %v2262_v7, %v2272_v38  ;;  %v482_v45 = vsel %vm6735_vm4, %v477_v29, %v481_v63  ;;  %v2829_v46 = vsel %vm6965_vm8, %v2827_v33, %v2828_v59  ;;  %v268_v59 = vld [vmem:[%s6688_s26 + $0x80] sm:$0x1]  ;;  %v7015_v33 = vld [vmem:[%s6688_s26 + $0x84] sm:$0xf] }
  0x6c   : > { %v496_v48 = vrot.slane %v494_v34, 4  ;;  %v487_v15 = vrot.slane %v486_v39, 4  ;;  %v5462_v51 = vcombine.low %v2826_v40, %v2829_v46  ;;  %v499_v58 = vrot.slane %v497_v35, 5  ;;  %v7021_v38 = vld [vmem:[%s6688_s26 + $0x88] sm:$0xf] }
  0x6d   : > { %v505_v52 = vrot.slane %v503_v42, 5  ;;  %6014 = vmatmul.mubr.msk.bf16.gmra.mrb[12].mxu0 %vm711_vm5, %v5404_v25  ;;  %v507_v55 = vshrl.u32 %v6963_v10, 16  ;;  %v513_v57 = vshll.u32 %v267_v41, 16  ;;  %v5446_v60 = vrot.slane %v5430_v43, 9  ;;  %v7029_v42 = vld [vmem:[%s8805_s1 + $0xe] sm:$0x3] }
  0x6e   : > { %v2836_v20 = vsel %vm6965_vm8, %v6771_v26, %v2835_v27  ;;  %v492_v63 = vsel %vm6735_vm4, %v487_v15, %v491_v17  ;;  %6035 = vmatprep.mubr.msk.bf16.mxu0 %vm711_vm5, %v5462_v51  ;;  %v500_v0 = vor.u32 %v499_v58, %v496_v48  ;;  %v3393_v1 = vsel %vm760_vm1, %v6840_v32, 0  ;;  %v5431_v27 = vld [vmem:[%s6688_s26 + $0x24] sm:$0xe]  ;;  %v269_v48 = vld [vmem:[%s6688_s26 + $0x8c] sm:$0x1] }
  0x6f   : > { %v518_v7 = vshrl.u32 %v6989_v49, 16  ;;  %v5178_v8 = vcombine.low %v482_v45, %v492_v63  ;;  %v509_v62 = vrot.slane %v507_v55, 4  ;;  %v515_v11 = vrot.slane %v513_v57, 5  ;;  %v5432_v55 = vld [vmem:[%s6688_s26 + $0x30] sm:$0xe] }
  0x70   : > { %v2833_v26 = vsel %vm6965_vm8, %v5446_v60, %v2832_v16  ;;  %v501_v13 = vrot.slane %v500_v0, 4  ;;  %v521_v29 = vshll.u32 %v6989_v49, 16  ;;  %v527_v34 = vshll.u32 %v6992_v53, 16 }
  0x71   : > { %v5463_v17 = vcombine.low %v2833_v26, %v2836_v20  ;;  %v520_v23 = vrot.slane %v518_v7, 4  ;;  %5881 = vmatprep.mubr.msk.bf16.mxu1 %vm711_vm5, %v5178_v8  ;;  %v510_v32 = vor.u32 %v509_v62, %v505_v52  ;;  %v531_v35 = vshrl.u32 %v6992_v53, 16  ;;  %v7045_v7 = vld [vmem:[%s6688_s26 + $0x90] sm:$0xf] }
  0x72   : > { %v537_v61 = vshll.u32 %v268_v59, 16  ;;  %v506_v16 = vsel %vm6735_vm4, %v501_v13, %v505_v52  ;;  %v523_v39 = vrot.slane %v521_v29, 5  ;;  %v5447_v40 = vrot.slane %v5431_v27, 9  ;;  %v7048_v27 = vld [vmem:[%s6688_s26 + $0x94] sm:$0xf] }
  0x73   : > { %v2839_v41 = vrot.slane %v6781_v44, 5  ;;  %v511_v43 = vrot.slane %v510_v32, 4  ;;  %v529_v25 = vrot.slane %v527_v34, 5  ;;  %v533_v45 = vrot.slane %v531_v35, 4 }
  0x74   : > { %v539_v46 = vrot.slane %v537_v61, 5  ;;  %v524_v15 = vor.u32 %v523_v39, %v520_v23  ;;  %v2842_v52 = vrot.slane %v6787_v47, 5  ;;  %v542_v60 = vshrl.u32 %v7015_v33, 16  ;;  %v270_v61 = vld [vmem:[%s6688_s26 + $0x98] sm:$0x1] }
  0x75   : > { %v2840_v51 = vsel %vm6965_vm8, %v5447_v40, %v2839_v41  ;;  %v2841_v58 = vrot.slane %v2839_v41, 4  ;;  %v516_v44 = vsel %vm6735_vm4, %v511_v43, %v515_v11  ;;  %6036 = vmatmul.mubr.msk.bf16.vlgmr.msra.gmra.mrb[0].mxu0 %vm711_vm5, %v5463_v17  ;;  %v534_v57 = vor.u32 %v533_v45, %v529_v25  ;;  %v5433_v43 = vld [vmem:[%s6688_s26 + $0x3c] sm:$0xe] }
  0x76   : > { %v545_v20 = vshll.u32 %v7015_v33, 16  ;;  %v5179_v59 = vcombine.low %v506_v16, %v516_v44  ;;  %6068 = vmatpush3.bf16.msra.mxu0 %v3393_v1  ;;  %v525_v63 = vrot.slane %v524_v15, 4  ;;  %v551_v47 = vshll.u32 %v7021_v38, 16  ;;  %v7067_v15 = vld [vmem:[%s6688_s26 + $0x9c] sm:$0xf] }
  0x77   : > { %v2843_v0 = vsel %vm6965_vm8, %v2841_v58, %v2842_v52  ;;  %v535_v8 = vrot.slane %v534_v57, 4  ;;  %v544_v11 = vrot.slane %v542_v60, 4  ;;  %6435 = vmatprep.subr.msk.bf16.mxu0 %vm760_vm1, %v7029_v42  ;;  %v555_v17 = vshrl.u32 %v7021_v38, 16  ;;  %v7078_v60 = vld [vmem:[%s6688_s26 + $0xa0] sm:$0xf] }
  0x78   : > { %v5464_v62 = vcombine.low %v2840_v51, %v2843_v0  ;;  %v547_v26 = vrot.slane %v545_v20, 5  ;;  %5882 = vmatmul.mubr.msk.bf16.gmra.mrb[16].mxu1 %vm711_vm5, %v5179_v59  ;;  %v530_v1 = vsel %vm6735_vm4, %v525_v63, %v529_v25  ;;  %v553_v13 = vrot.slane %v551_v47, 5 }
  0x79   : > { %v561_v23 = vshll.u32 %v269_v48, 16  ;;  %v540_v29 = vsel %vm6735_vm4, %v535_v8, %v539_v46  ;;  %v5448_v34 = vrot.slane %v5432_v55, 9  ;;  %v2846_v35 = vrot.slane %v6804_v28, 5 }
  0x7a   : > { %6039 = vmatprep.mubr.msk.bf16.mxu0 %vm711_vm5, %v5464_v62  ;;  %v548_v32 = vor.u32 %v547_v26, %v544_v11  ;;  %v5180_v16 = vcombine.low %v530_v1, %v540_v29  ;;  %v557_v39 = vrot.slane %v555_v17, 4  ;;  %v2849_v41 = vrot.slane %v6810_v37, 5  ;;  %v271_v26 = vld [vmem:[%s6688_s26 + $0xa4] sm:$0x1] }
  0x7b   : > { %v563_v40 = vrot.slane %v561_v23, 5  ;;  %v2847_v45 = vsel %vm6965_vm8, %v5448_v34, %v2846_v35  ;;  %v2848_v48 = vrot.slane %v2846_v35, 4  ;;  %v566_v46 = vshrl.u32 %v7045_v7, 16 }
  0x7c   : > { %v549_v25 = vrot.slane %v548_v32, 4  ;;  %5885 = vmatprep.mubr.msk.bf16.mxu1 %vm711_vm5, %v5180_v16  ;;  %v558_v28 = vor.u32 %v557_v39, %v553_v13  ;;  %v569_v51 = vshll.u32 %v7045_v7, 16  ;;  %v575_v58 = vshll.u32 %v7048_v27, 16 }
  0x7d   : > { %v579_v37 = vshrl.u32 %v7048_v27, 16  ;;  %v2850_v55 = vsel %vm6965_vm8, %v2848_v48, %v2849_v41  ;;  %v568_v44 = vrot.slane %v566_v46, 4  ;;  %v585_v57 = vshll.u32 %v270_v61, 16  ;;  %v7093_v41 = vld [vmem:[%s6688_s26 + $0xa8] sm:$0xf] }
  0x7e   : > { %v554_v52 = vsel %vm6735_vm4, %v549_v25, %v553_v13  ;;  %v559_v20 = vrot.slane %v558_v28, 4  ;;  %v5465_v59 = vcombine.low %v2847_v45, %v2850_v55  ;;  %v571_v63 = vrot.slane %v569_v51, 5  ;;  %v7100_v48 = vld [vmem:[%s6688_s26 + $0xac] sm:$0xf] }
  0x7f   : > { %v577_v0 = vrot.slane %v575_v58, 5  ;;  %v581_v47 = vrot.slane %v579_v37, 4  ;;  %v587_v8 = vrot.slane %v585_v57, 5  ;;  %v5449_v62 = vrot.slane %v5433_v43, 9  ;;  %v272_v57 = vld [vmem:[%s6688_s26 + $0xb0] sm:$0x1] }
  0x80   : > { %v2853_v11 = vrot.slane %v6827_v9, 5  ;;  %v564_v1 = vsel %vm6735_vm4, %v559_v20, %v563_v40  ;;  %6040 = vmatmul.mubr.msk.bf16.gmra.mrb[4].mxu0 %vm711_vm5, %v5465_v59  ;;  %v572_v13 = vor.u32 %v571_v63, %v568_v44  ;;  %v2856_v17 = vrot.slane %v6832_v19, 5  ;;  %v5434_v9 = vld [vmem:[%s6688_s26 + $0x48] sm:$0xe] }
  0x81   : > { %v590_v23 = vshrl.u32 %v7067_v15, 16  ;;  %v5181_v29 = vcombine.low %v554_v52, %v564_v1  ;;  %v582_v32 = vor.u32 %v581_v47, %v577_v0  ;;  %v593_v39 = vshll.u32 %v7067_v15, 16 }
  0x82   : > { %v2854_v34 = vsel %vm6965_vm8, %v5449_v62, %v2853_v11  ;;  %v2855_v35 = vrot.slane %v2853_v11, 4  ;;  %v573_v61 = vrot.slane %v572_v13, 4  ;;  %v599_v40 = vshll.u32 %v7078_v60, 16 }
  0x83   : > { %v592_v16 = vrot.slane %v590_v23, 4  ;;  %5886 = vmatmul.mubr.msk.bf16.gmra.mrb[20].mxu1 %vm711_vm5, %v5181_v29  ;;  %v583_v19 = vrot.slane %v582_v32, 4  ;;  %v603_v25 = vshrl.u32 %v7078_v60, 16  ;;  %v609_v45 = vshll.u32 %v271_v26, 16  ;;  %v5435_v26 = vld [vmem:[%s6688_s26 + $0x54] sm:$0xe] }
  0x84   : > { %v2857_v43 = vsel %vm6965_vm8, %v2855_v35, %v2856_v17  ;;  %v578_v46 = vsel %vm6735_vm4, %v573_v61, %v577_v0  ;;  %v595_v51 = vrot.slane %v593_v39, 5  ;;  %v601_v58 = vrot.slane %v599_v40, 5 }
  0x85   : > { %v5466_v28 = vcombine.low %v2854_v34, %v2857_v43  ;;  %v588_v37 = vsel %vm6735_vm4, %v583_v19, %v587_v8  ;;  %v605_v52 = vrot.slane %v603_v25, 4  ;;  %v611_v55 = vrot.slane %v609_v45, 5  ;;  %v7128_v25 = vld [vmem:[%s6688_s26 + $0xb8] sm:$0xf] }
  0x86   : > { %v5450_v44 = vrot.slane %v5434_v9, 9  ;;  %v5182_v20 = vcombine.low %v578_v46, %v588_v37  ;;  %v596_v59 = vor.u32 %v595_v51, %v592_v16  ;;  %v2860_v63 = vrot.slane %v6858_v5, 5  ;;  %v7123_v16 = vld [vmem:[%s6688_s26 + $0xb4] sm:$0xf] }
  0x87   : > { %6043 = vmatprep.mubr.msk.bf16.mxu0 %vm711_vm5, %v5466_v28  ;;  %v2863_v47 = vrot.slane %v6863_v14, 5  ;;  %v606_v0 = vor.u32 %v605_v52, %v601_v58  ;;  %v614_v62 = vshrl.u32 %v7093_v41, 16  ;;  %v617_v11 = vshll.u32 %v7093_v41, 16  ;;  %v7134_v52 = vld [vmem:[%s6688_s26 + $0xbc] sm:$0x1] }
  0x88   : > { %v623_v8 = vshll.u32 %v7100_v48, 16  ;;  %5889 = vmatprep.mubr.msk.bf16.mxu1 %vm711_vm5, %v5182_v20  ;;  %v597_v1 = vrot.slane %v596_v59, 4  ;;  %v2861_v13 = vsel %vm6965_vm8, %v5450_v44, %v2860_v63  ;;  %v2862_v17 = vrot.slane %v2860_v63, 4 }
  0x89   : > { %v627_v5 = vshrl.u32 %v7100_v48, 16  ;;  %v607_v14 = vrot.slane %v606_v0, 4  ;;  %v616_v23 = vrot.slane %v614_v62, 4  ;;  %v619_v29 = vrot.slane %v617_v11, 5  ;;  %v5436_v62 = vld [vmem:[%s6688_s26 + $0x60] sm:$0xe] }
  0x8a   : > { %v625_v32 = vrot.slane %v623_v8, 5  ;;  %v602_v34 = vsel %vm6735_vm4, %v597_v1, %v601_v58  ;;  %v2864_v35 = vsel %vm6965_vm8, %v2862_v17, %v2863_v47  ;;  %v633_v61 = vshll.u32 %v272_v57, 16  ;;  %v5437_v17 = vld [vmem:[%s6688_s26 + $0x6c] sm:$0xe] }
  0x8b   : > { %v629_v9 = vrot.slane %v627_v5, 4  ;;  %v612_v39 = vsel %vm6735_vm4, %v607_v14, %v611_v55  ;;  %v5467_v40 = vcombine.low %v2861_v13, %v2864_v35  ;;  %v620_v19 = vor.u32 %v619_v29, %v616_v23  ;;  %v5373_v13 = vld [vmem:[%s6688_s26 + $0x70] sm:$0xf] }
  0x8c   : > { %v5451_v43 = vrot.slane %v5435_v26, 9  ;;  %v5183_v45 = vcombine.low %v602_v34, %v612_v39  ;;  %v635_v28 = vrot.slane %v633_v61, 5  ;;  %v2867_v51 = vrot.slane %v6888_v54, 5 }
  0x8d   : > { %v630_v46 = vor.u32 %v629_v9, %v625_v32  ;;  %6044 = vmatmul.mubr.msk.bf16.gmra.mrb[8].mxu0 %vm711_vm5, %v5467_v40  ;;  %v621_v58 = vrot.slane %v620_v19, 4  ;;  %v2870_v37 = vrot.slane %v6893_v2, 5  ;;  %v638_v55 = vshrl.u32 %v7123_v16, 16 }
  0x8e   : > { %v641_v44 = vshll.u32 %v7123_v16, 16  ;;  %5890 = vmatmul.mubr.msk.bf16.gmra.mrb[24].mxu1 %vm711_vm5, %v5183_v45  ;;  %v2868_v54 = vsel %vm6965_vm8, %v5451_v43, %v2867_v51  ;;  %v2869_v20 = vrot.slane %v2867_v51, 4  ;;  %v647_v59 = vshll.u32 %v7128_v25, 16 }
  0x8f   : > { %v631_v57 = vrot.slane %v630_v46, 4  ;;  %v626_v2 = vsel %vm6735_vm4, %v621_v58, %v625_v32  ;;  %v640_v63 = vrot.slane %v638_v55, 4  ;;  %v651_v0 = vshrl.u32 %v7128_v25, 16  ;;  %v5374_v32 = vld [vmem:[%s6688_s26 + $0x74] sm:$0x1] }
  0x90   : > { %v643_v47 = vrot.slane %v641_v44, 5  ;;  %v2871_v8 = vsel %vm6965_vm8, %v2869_v20, %v2870_v37  ;;  %v649_v26 = vrot.slane %v647_v59, 5  ;;  %v657_v1 = vshll.u32 %v7134_v52, 16  ;;  %v7167_v55 = vld [vmem:[%s6688_s26 + $0x7c] sm:$0xf] }
  0x91   : > { %v636_v11 = vsel %vm6735_vm4, %v631_v57, %v635_v28  ;;  %v5468_v14 = vcombine.low %v2868_v54, %v2871_v8  ;;  %v653_v29 = vrot.slane %v651_v0, 4  ;;  %v5452_v35 = vrot.slane %v5436_v62, 9  ;;  %v7170_v44 = vld [vmem:[%s6688_s26 + $0x80] sm:$0x1]  ;;  %v5438_v57 = vld [vmem:[%s6688_s26 + $0x78] sm:$0xe] }
  0x92   : > { %v5184_v5 = vcombine.low %v626_v2, %v636_v11  ;;  %v644_v23 = vor.u32 %v643_v47, %v640_v63  ;;  %v659_v34 = vrot.slane %v657_v1, 5  ;;  %v2874_v9 = vrot.slane %v6924_v56, 5  ;;  %v6527_v59 = vld [vmem:[%s6688_s26] sm:$0xf]  ;;  %v7177_v2 = vld [vmem:[%s6688_s26 + $0x4] sm:$0xf] }
  0x93   : > { %v2877_v61 = vrot.slane %v6932_v6, 5  ;;  %6047 = vmatprep.mubr.msk.bf16.mxu0 %vm711_vm5, %v5468_v14  ;;  %v654_v40 = vor.u32 %v653_v29, %v649_v26  ;;  %v5453_v19 = vrot.slane %v5437_v17, 9  ;;  %v2881_v43 = vrot.slane %v5373_v13, 5  ;;  %v5379_v0 = vld [vmem:[%s6688_s26 + $0x88] sm:$0xf] }
  0x94   : > { %5893 = vmatprep.mubr.msk.bf16.mxu1 %vm711_vm5, %v5184_v5  ;;  %v645_v39 = vrot.slane %v644_v23, 4  ;;  %v2875_v45 = vsel %vm6965_vm8, %v5452_v35, %v2874_v9  ;;  %v2876_v46 = vrot.slane %v2874_v9, 4  ;;  %v2884_v56 = vrot.slane %v5374_v32, 5  ;;  %v5439_v62 = vld [vmem:[%s6688_s26 + $0x84] sm:$0xe] }
  0x95   : > { %v655_v28 = vrot.slane %v654_v40, 4  ;;  %v2882_v51 = vsel %vm6965_vm8, %v5453_v19, %v2881_v43  ;;  %v2883_v58 = vrot.slane %v2881_v43, 4  ;;  %v5202_v63 = vcombine.low %v6527_v59, %v7177_v2  ;;  %v5382_v23 = vld [vmem:[%s6688_s26 + $0x94] sm:$0xf]  ;;  %v5440_v29 = vld [vmem:[%s6688_s26 + $0x90] sm:$0xe] }
  0x96   : > { %v650_v6 = vsel %vm6735_vm4, %v645_v39, %v649_v26  ;;  %v2878_v37 = vsel %vm6965_vm8, %v2876_v46, %v2877_v61  ;;  %v5380_v26 = vld [vmem:[%s6688_s26 + $0x8c] sm:$0x1]  ;;  %v5454_v1 = vrot.slane %v5438_v57, 9  ;;  %v2888_v13 = vrot.slane %v7167_v55, 5  ;;  %v5383_v9 = vld [vmem:[%s6688_s26 + $0x98] sm:$0x1] }
  0x97   : > { %v660_v54 = vsel %vm6735_vm4, %v655_v28, %v659_v34  ;;  %v5469_v20 = vcombine.low %v2875_v45, %v2878_v37  ;;  %v2885_v47 = vsel %vm6965_vm8, %v2883_v58, %v2884_v56  ;;  %v2891_v17 = vrot.slane %v7170_v44, 5  ;;  %v5385_v61 = vld [vmem:[%s6688_s26 + $0xa0] sm:$0xf]  ;;  %v6529_v39 = vld [vmem:[%s6688_s26 + $0xc] sm:$0xf] }
  0x98   : > { %v5185_v11 = vcombine.low %v650_v6, %v660_v54  ;;  %v5470_v8 = vcombine.low %v2882_v51, %v2885_v47  ;;  %v5455_v5 = vrot.slane %v5439_v62, 9  ;;  %v2895_v14 = vrot.slane %v5379_v0, 5  ;;  %v7199_v40 = vld [vmem:[%s6688_s26 + $0x10] sm:$0xf]  ;;  %v5386_v46 = vld [vmem:[%s6688_s26 + $0xa4] sm:$0x1] }
  0x99   : > { %6048 = vmatmul.mubr.msk.bf16.gmra.mrb[12].mxu0 %vm711_vm5, %v5469_v20  ;;  %v2889_v32 = vsel %vm6965_vm8, %v5454_v1, %v2888_v13  ;;  %v2890_v34 = vrot.slane %v2888_v13, 4  ;;  %v2898_v35 = vrot.slane %v5380_v26, 5  ;;  %v5203_v19 = vcombine.low %v6529_v39, %v7199_v40  ;;  %v5441_v56 = vld [vmem:[%s6688_s26 + $0x9c] sm:$0xe]  ;;  %v6531_v28 = vld [vmem:[%s6688_s26 + $0x18] sm:$0xf] }
  0x9a   : > { %5894 = vmatmul.mubr.msk.bf16.gmra.mrb[28].mxu1 %vm711_vm5, %v5185_v11  ;;  %6051 = vmatprep.mubr.msk.bf16.mxu0 %vm711_vm5, %v5470_v8  ;;  %v2896_v43 = vsel %vm6965_vm8, %v5455_v5, %v2895_v14  ;;  %v2897_v45 = vrot.slane %v2895_v14, 4  ;;  %v7210_v51 = vld [vmem:[%s6688_s26 + $0x1c] sm:$0xf]  ;;  %v5456_v37 = vrot.slane %v5440_v29, 9  ;;  %v2902_v57 = vrot.slane %v5382_v23, 5 }
  0x9b   : > { %5899 = vmatprep.mubr.msk.bf16.mxu1 %vm711_vm5, %v5202_v63  ;;  %v2892_v6 = vsel %vm6965_vm8, %v2890_v34, %v2891_v17  ;;  %v5204_v58 = vcombine.low %v6531_v28, %v7210_v51  ;;  %v2905_v59 = vrot.slane %v5383_v9, 5  ;;  %v2909_v63 = vrot.slane %v5385_v61, 5  ;;  %v5388_v47 = vld [vmem:[%s6688_s26 + $0xac] sm:$0xf]  ;;  %v5391_v26 = vld [vmem:[%s6688_s26 + $0xb8] sm:$0xf] }
  0x9c   : > { %v5471_v54 = vcombine.low %v2889_v32, %v2892_v6  ;;  %v2899_v20 = vsel %vm6965_vm8, %v2897_v45, %v2898_v35  ;;  %v2904_v62 = vrot.slane %v2902_v57, 4  ;;  %v5457_v11 = vrot.slane %v5441_v56, 9  ;;  %v7223_v17 = vld [vmem:[%s8805_s1 + $0x6] sm:$0x3]  ;;  %v5389_v14 = vld [vmem:[%s6688_s26 + $0xb0] sm:$0x1] }
  0x9d   : > { %v5472_v0 = vcombine.low %v2896_v43, %v2899_v20  ;;  %v2912_v8 = vrot.slane %v5386_v46, 5  ;;  %v1479_v1 = vsel %vm760_vm1, %v6921_v50, 0  ;;  %v2911_v13 = vrot.slane %v2909_v63, 4  ;;  %v5442_v34 = vld [vmem:[%s6688_s26 + $0xa8] sm:$0xe] }
  0x9e   : > { %v2903_v5 = vsel %vm6965_vm8, %v5456_v37, %v2902_v57  ;;  %v2906_v50 = vsel %vm6965_vm8, %v2904_v62, %v2905_v59  ;;  %v2916_v23 = vrot.slane %v5388_v47, 5  ;;  %v2910_v29 = vsel %vm6965_vm8, %v5457_v11, %v2909_v63  ;;  %v5392_v9 = vld [vmem:[%s6688_s26 + $0xbc] sm:$0x1]  ;;  %v5443_v61 = vld [vmem:[%s6688_s26 + $0xb4] sm:$0xe] }
  0x9f   : > { %v2913_v32 = vsel %vm6965_vm8, %v2911_v13, %v2912_v8  ;;  %v2923_v35 = vrot.slane %v5391_v26, 5  ;;  %v6533_v39 = vld [vmem:[%s6688_s26 + $0x24] sm:$0xf]  ;;  %v5473_v45 = vcombine.low %v2903_v5, %v2906_v50  ;;  %v5458_v56 = vrot.slane %v5442_v34, 9  ;;  %v7249_v37 = vld [vmem:[%s6688_s26 + $0x34] sm:$0xf] }
  0xa0   : > { %v5474_v46 = vcombine.low %v2910_v29, %v2913_v32  ;;  %v2918_v6 = vrot.slane %v2916_v23, 4  ;;  %v2919_v28 = vrot.slane %v5389_v14, 5  ;;  %v2926_v59 = vrot.slane %v5392_v9, 5  ;;  %v5394_v63 = vld [vmem:[%s6688_s26 + $0xc4] sm:$0xf] }
  0xa1   : > { %6052 = vmatmul.mubr.msk.bf16.gmra.mrb[16].mxu0 %vm711_vm5, %v5471_v54  ;;  %v5459_v54 = vrot.slane %v5443_v61, 9  ;;  %v2925_v20 = vrot.slane %v2923_v35, 4  ;;  %v2917_v47 = vsel %vm6965_vm8, %v5458_v56, %v2916_v23  ;;  %v2930_v62 = vrot.slane %v5394_v63, 5  ;;  %v5395_v26 = vld [vmem:[%s6688_s26 + $0xc8] sm:$0x1] }
  0xa2   : > { %5900 = vmatmul.mubr.msk.bf16.vlgmr.msra.gmra.mrb[0].mxu1 %vm711_vm5, %v5203_v19  ;;  %6055 = vmatprep.mubr.msk.bf16.mxu0 %vm711_vm5, %v5472_v0  ;;  %v7244_v19 = vld [vmem:[%s6688_s26 + $0x28] sm:$0xf]  ;;  %v2920_v0 = vsel %vm6965_vm8, %v2918_v6, %v2919_v28  ;;  %v6537_v13 = vld [vmem:[%s6688_s26 + $0x3c] sm:$0xf]  ;;  %v7269_v5 = vld [vmem:[%s6688_s26 + $0x40] sm:$0xf]  ;;  %v5208_v9 = vcombine.low %v6866_v12, %v6874_v36  ;;  %v5210_v6 = vcombine.low %v6938_v18, %v6941_v24 }
  0xa3   : > { %5932 = vmatpush3.bf16.msra.mxu1 %v1479_v1  ;;  %5903 = vmatprep.mubr.msk.bf16.mxu1 %vm711_vm5, %v5204_v58  ;;  %v5205_v43 = vcombine.low %v6533_v39, %v7244_v19  ;;  %v6535_v58 = vld [vmem:[%s6688_s26 + $0x30] sm:$0xf]  ;;  %v2924_v11 = vsel %vm6965_vm8, %v5459_v54, %v2923_v35  ;;  %v2927_v8 = vsel %vm6965_vm8, %v2925_v20, %v2926_v59  ;;  %v5444_v1 = vld [vmem:[%s6688_s26 + $0xc0] sm:$0xe]  ;;  %v2932_v32 = vrot.slane %v2930_v62, 4 }
  0xa4   : > { %6430 = vmatprep.subr.msk.bf16.mxu1 %vm760_vm1, %v7223_v17  ;;  %v5206_v57 = vcombine.low %v6535_v58, %v7249_v37  ;;  %v5207_v50 = vcombine.low %v6537_v13, %v7269_v5  ;;  %v5475_v14 = vcombine.low %v2917_v47, %v2920_v0  ;;  %v5476_v23 = vcombine.low %v2924_v11, %v2927_v8  ;;  %v1217_v58 = vld [vmem:[%s6688_s26] sm:$0xe]  ;;  %v1218_v20 = vld [vmem:[%s6688_s26 + $0xc] sm:$0xe]  ;;  %v6539_v18 = vld [vmem:[%s6688_s26 + $0x8] sm:$0x1] }
  0xa5   : > { %v5460_v29 = vrot.slane %v5444_v1, 9  ;;  %v2933_v34 = vrot.slane %v5395_v26, 5  ;;  %v2307_v35 = vshll.u32 %v7167_v55, 16  ;;  %v2311_v61 = vshrl.u32 %v7167_v55, 16  ;;  %v6490_v47 = vld [vmem:[%s6688_s26 + $0x24] sm:$0xff]  }
  0xa6   : > { %v2317_v56 = vshll.u32 %v7170_v44, 16  ;;  %v1270_v54 = vrot.slane %v7177_v2, 5  ;;  %v1273_v24 = vrot.slane %v6539_v18, 5  ;;  %v6540_v44 = vld [vmem:[%s6688_s26 + $0x14] sm:$0x1]  ;;  %v5211_v63 = vcombine.low %v6957_v3, %v6963_v10 }
  0xa7   : > { %v2931_v39 = vsel %vm6965_vm8, %v5460_v29, %v2930_v62  ;;  %v7284_v12 = vrot.slane %v2307_v35, 5  ;;  %v2313_v36 = vrot.slane %v2311_v61, 4  ;;  %v1280_v59 = vrot.slane %v6540_v44, 5  ;;  %v1220_v62 = vld [vmem:[%s6688_s26 + $0x24] sm:$0xe] }
  0xa8   : > { %v5234_v0 = vrot.slane %v1217_v58, 9  ;;  %v4119_v11 = vsel %vm760_vm1, %v7029_v42, 0  ;;  %v1272_v8 = vrot.slane %v1270_v54, 4  ;;  %v1221_v13 = vld [vmem:[%s6688_s26 + $0x30] sm:$0xe]  ;;  %v1291_v3 = vrot.slane %v7244_v19, 5 }
  0xa9   : > { %6056 = vmatmul.mubr.msk.bf16.gmra.mrb[20].mxu0 %vm711_vm5, %v5473_v45  ;;  %8827 = vst [vmem:[#allocation5_spill] sm:$0xff] %v7284_v12  ;;  %v5209_v45 = vcombine.low %v6899_v21, %v6905_v30  ;;  %v2314_v28 = vor.u32 %v2313_v36, %v7284_v12  ;;  %v1219_v21 = vld [vmem:[%s6688_s26 + $0x18] sm:$0xe]  ;;  %v1284_v30 = vrot.slane %v7210_v51, 5  ;;  %v5235_v51 = vrot.slane %v1218_v20, 9  ;;  %v6494_v58 = vld [vmem:[%s6688_s26 + $0x3c] sm:$0xff]  }
  0xaa   : > { %5904 = vmatmul.mubr.msk.bf16.gmra.mrb[4].mxu1 %vm711_vm5, %v5205_v43  ;;  %6059 = vmatprep.mubr.msk.bf16.mxu0 %vm711_vm5, %v5474_v46  ;;  %v2934_v43 = vsel %vm6965_vm8, %v2932_v32, %v2933_v34  ;;  %v6488_v46 = vld [vmem:[%s6688_s26 + $0x18] sm:$0xff]   ;;  %v5236_v1 = vrot.slane %v1219_v21, 9  ;;  %v6492_v32 = vld [vmem:[%s6688_s26 + $0x30] sm:$0xff]   ;;  %v5213_v34 = vcombine.low %v7015_v33, %v7021_v38  ;;  %v5214_v42 = vcombine.low %v7045_v7, %v7048_v27  ;;  %v7450_v27 = vld [vmem:[%s6688_s26 + $0x64] sm:$0xf] }
  0xab   : > { %5907 = vmatprep.mubr.msk.bf16.mxu1 %vm711_vm5, %v5206_v57  ;;  %v5477_v55 = vcombine.low %v2931_v39, %v2934_v43  ;;  %v1277_v57 = vrot.slane %v7199_v40, 5  ;;  %v7304_v40 = vrot.slane %v2317_v56, 5  ;;  %v7307_v2 = vrot.slane %v2314_v28, 4  ;;  %v1222_v10 = vld [vmem:[%s6688_s26 + $0x3c] sm:$0xe]  ;;  %v6498_v33 = vld [vmem:[%s6688_s26 + $0x54] sm:$0xff]  }
  0xac   : > { %v1298_v35 = vrot.slane %v7249_v37, 5  ;;  %v7338_v19 = vsel %vm6965_vm8, %v5234_v0, %v1270_v54  ;;  %v1305_v39 = vrot.slane %v7269_v5, 5  ;;  %v7348_v37 = vsel %vm6965_vm8, %v1272_v8, %v1273_v24  ;;  %v6542_v56 = vld [vmem:[%s6688_s26 + $0x2c] sm:$0x1]  ;;  %v6543_v20 = vld [vmem:[%s6688_s26 + $0x38] sm:$0x1] }
  0xad   : > { %8828 = vst [vmem:[#allocation6_spill] sm:$0xff] %v7304_v40  ;;  %8829 = vst [vmem:[#allocation7_spill] sm:$0xff] %v7307_v2  ;;  %v1279_v26 = vrot.slane %v1277_v57, 4  ;;  %v7342_v61 = vsel %vm6965_vm8, %v5235_v51, %v1277_v57  ;;  %v7356_v36 = vsel %vm6965_vm8, %v5236_v1, %v1284_v30  ;;  %v5238_v28 = vrot.slane %v1221_v13, 9  ;;  %v5559_v18 = vld [vmem:[%s6688_s26 + $0x18] sm:$0xf] }
  0xae   : > { %v1300_v54 = vrot.slane %v1298_v35, 4  ;;  %v1301_v21 = vrot.slane %v6543_v20, 5  ;;  %v6496_v24 = vld [vmem:[%s6688_s26 + $0x48] sm:$0xff]   ;;  %v7377_v44 = vsel %vm760_vm1, %v7223_v17, 0  ;;  %v1224_v1 = vld [vmem:[%s6688_s26 + $0x54] sm:$0xe] }
  0xaf   : > { %v7352_v43 = vsel %vm6965_vm8, %v1279_v26, %v1280_v59  ;;  %v1307_v59 = vrot.slane %v1305_v39, 4  ;;  %v6545_v0 = vld [vmem:[%s6688_s26 + $0x4c] sm:$0xf]  ;;  %v5562_v13 = vld [vmem:[%s6688_s26 + $0x24] sm:$0xf]  ;;  %vm4788_vm9 = vcmask (!%p5705_p10), 64512  }
  0xb0   : > { %v1312_v51 = vrot.slane %v6545_v0, 5  ;;  %v3664_v20 = vshll.u32 %v5562_v13, 16  ;;  %v5564_v17 = vld [vmem:[%s6688_s26 + $0x2c] sm:$0x1]  ;;  %v6551_v8 = vld [vmem:[%s6688_s26 + $0x70] sm:$0xf] }
  0xb1   : > { %6060 = vmatmul.mubr.msk.bf16.gmra.mrb[24].mxu0 %vm711_vm5, %v5475_v14  ;;  %v1286_v14 = vrot.slane %v1284_v30, 4  ;;  %v5239_v30 = vrot.slane %v1222_v10, 9  ;;  %v6546_v10 = vld [vmem:[%s6688_s26 + $0x50] sm:$0x1]  ;;  %v6561_v2 = vld [vmem:[%s6688_s26 + $0xa4] sm:$0x1] }
  0xb2   : > { %5908 = vmatmul.mubr.msk.bf16.gmra.mrb[8].mxu1 %vm711_vm5, %v5207_v50  ;;  %6063 = vmatprep.mubr.msk.bf16.mxu0 %vm711_vm5, %v5476_v23  ;;  %v5212_v50 = vcombine.low %v6989_v49, %v6992_v53  ;;  %v6541_v23 = vld [vmem:[%s6688_s26 + $0x20] sm:$0x1]  ;;  %v7332_v49 = vld [vmem:[%s8805_s1 + $0x10] sm:$0x3]  ;;  %v5216_v53 = vcombine.low %v7093_v41, %v7100_v48  ;;  %vm4859_vm10 = vcmask (!%p5705_p10), 57344  }
  0xb3   : > { %5911 = vmatprep.mubr.msk.bf16.mxu1 %vm711_vm5, %v5208_v9  ;;  %v1287_v29 = vrot.slane %v6541_v23, 5  ;;  %v5215_v9 = vcombine.low %v7067_v15, %v7078_v60  ;;  %v7403_v23 = vsel %vm6965_vm8, %v5238_v28, %v1298_v35  ;;  %v1314_v35 = vrot.slane %v1312_v51, 4 }
  0xb5   : > { %v7364_v5 = vsel %vm6965_vm8, %v1286_v14, %v1287_v29 }
  0xb9   : > { %6064 = vmatmul.mubr.msk.bf16.gmra.mrb[28].mxu0 %vm711_vm5, %v5477_v55  ;;  %v5237_v55 = vrot.slane %v1220_v62, 9  ;;  %v5560_v62 = vld [vmem:[%s6688_s26 + $0x1c] sm:$0xf] }
  0xba   : > { %5912 = vmatmul.mubr.msk.bf16.gmra.mrb[12].mxu1 %vm711_vm5, %v5209_v45  ;;  %6069 = vmatprep.mubr.msk.bf16.mxu0 %vm711_vm5, %v6488_v46  ;;  %v7359_v45 = vld [vmem:[%s6688_s26 + $0x48] sm:$0xe]  ;;  %v1293_v46 = vrot.slane %v1291_v3, 4  ;;  %v3650_v28 = vshrl.u32 %v5560_v62, 16 }
  0xbb   : > { %5915 = vmatprep.mubr.msk.bf16.mxu1 %vm711_vm5, %v5210_v6  ;;  %v1294_v6 = vrot.slane %v6542_v56, 5  ;;  %v7392_v26 = vsel %vm6965_vm8, %v5237_v55, %v1291_v3  ;;  %v5240_v29 = vrot.slane %v7359_v45, 9  ;;  %v7409_v56 = vsel %vm6965_vm8, %v1300_v54, %v1301_v21 }
  0xbc   : > { %v7413_v3 = vsel %vm6965_vm8, %v5239_v30, %v1305_v39  ;;  %v3637_v55 = vshrl.u32 %v5559_v18, 16  ;;  %v3646_v45 = vshll.u32 %v5560_v62, 16  ;;  %v3661_v54 = vshrl.u32 %v5562_v13, 16  ;;  %v6500_v62 = vld [vmem:[%s6688_s26 + $0x60] sm:$0xff]  }
  0xbd   : > { %v7399_v14 = vsel %vm6965_vm8, %v1293_v46, %v1294_v6  ;;  %v3640_v46 = vshll.u32 %v5559_v18, 16  ;;  %v5241_v18 = vrot.slane %v1224_v1, 9  ;;  %v5561_v1 = vld [vmem:[%s6688_s26 + $0x20] sm:$0x1] }
  0xbe   : > { %v7454_v13 = vrot.slane %v3646_v45, 5 }
  0xbf   : > { %v3642_v0 = vrot.slane %v3640_v46, 5  ;;  %v5565_v46 = vld [vmem:[%s6688_s26 + $0x30] sm:$0xf] }
  0xc1   : > { %6070 = vmatmul.mubr.msk.bf16.vlgmr.msra.gmra.mrb[0].mxu0 %vm711_vm5, %v6490_v47 }
  0xc2   : > { %5916 = vmatmul.mubr.msk.bf16.gmra.mrb[16].mxu1 %vm711_vm5, %v5211_v63  ;;  %6102 = vmatpush3.bf16.msra.mxu0 %v4119_v11  ;;  %v6544_v63 = vld [vmem:[%s6688_s26 + $0x44] sm:$0x1]  ;;  %v3685_v11 = vshrl.u32 %v5565_v46, 16 }
  0xc3   : > { %5919 = vmatprep.mubr.msk.bf16.mxu1 %vm711_vm5, %v5212_v50  ;;  %6073 = vmatprep.mubr.msk.bf16.mxu0 %vm711_vm5, %v6492_v32  ;;  %v1308_v47 = vrot.slane %v6544_v63, 5  ;;  %v5563_v50 = vld [vmem:[%s6688_s26 + $0x28] sm:$0xf]  ;;  %v1315_v32 = vrot.slane %v6546_v10, 5 }
  0xc4   : > { %6436 = vmatprep.subr.msk.bf16.mxu0 %vm760_vm1, %v7332_v49  ;;  %v3670_v21 = vshll.u32 %v5563_v50, 16  ;;  %v3674_v39 = vshrl.u32 %v5563_v50, 16  ;;  %v3663_v50 = vrot.slane %v3661_v54, 4 }
  0xc5   : > { %v7417_v6 = vsel %vm6965_vm8, %v1307_v59, %v1308_v47  ;;  %v6547_v59 = vld [vmem:[%s6688_s26 + $0x58] sm:$0xf]  ;;  %v3639_v47 = vrot.slane %v3637_v55, 4  ;;  %v7447_v7 = vsel %vm6965_vm8, %v1314_v35, %v1315_v32  ;;  %v6549_v35 = vld [vmem:[%s6688_s26 + $0x5c] sm:$0x1] }
  0xc6   : > { %v1319_v63 = vrot.slane %v6547_v59, 5  ;;  %v7456_v10 = vrot.slane %v3670_v21, 5  ;;  %v3676_v55 = vrot.slane %v3674_v39, 4  ;;  %v1322_v59 = vrot.slane %v6549_v35, 5  ;;  %v5566_v21 = vld [vmem:[%s6688_s26 + $0x34] sm:$0xf] }
  0xc7   : > { %v3643_v54 = vor.u32 %v3642_v0, %v3639_v47  ;;  %v1226_v35 = vld [vmem:[%s6688_s26 + $0x6c] sm:$0xe]  ;;  %v3680_v47 = vshll.u32 %v5564_v17, 16  ;;  %v6552_v0 = vld [vmem:[%s6688_s26 + $0x7c] sm:$0xf] }
  0xc8   : > { %v1321_v32 = vrot.slane %v1319_v63, 4  ;;  %v6553_v17 = vld [vmem:[%s6688_s26 + $0x74] sm:$0x1] }
  0xc9   : > { %6074 = vmatmul.mubr.msk.bf16.gmra.mrb[4].mxu0 %vm711_vm5, %v6494_v58  ;;  %v6550_v58 = vld [vmem:[%s6688_s26 + $0x68] sm:$0x1]  ;;  %v3644_v15 = vrot.slane %v3643_v54, 4 }
  0xca   : > { %5920 = vmatmul.mubr.msk.bf16.gmra.mrb[20].mxu1 %vm711_vm5, %v5213_v34  ;;  %6077 = vmatprep.mubr.msk.bf16.mxu0 %vm711_vm5, %v6496_v24  ;;  %v7439_v34 = vsel %vm6965_vm8, %v5240_v29, %v1312_v51  ;;  %v7442_v24 = vld [vmem:[%s6688_s26 + $0x60] sm:$0xe]  ;;  %v3652_v51 = vrot.slane %v3650_v28, 4  ;;  %v3666_v29 = vrot.slane %v3664_v20, 5  ;;  %v1329_v30 = vrot.slane %v6550_v58, 5 }
  0xcb   : > { %5923 = vmatprep.mubr.msk.bf16.mxu1 %vm711_vm5, %v5214_v42  ;;  %v8809_v42 = vrot.slane %v7450_v27, 5  ;;  %v5242_v38 = vrot.slane %v7442_v24, 9  ;;  %v7467_v28 = vsel %vm6965_vm8, %v5241_v18, %v1319_v63  ;;  %v3656_v20 = vshll.u32 %v5561_v1, 16 }
  0xcc   : > { %v3653_v39 = vor.u32 %v3652_v51, %v7454_v13  ;;  %v1333_v24 = vrot.slane %v6551_v8, 5  ;;  %v3688_v58 = vshll.u32 %v5565_v46, 16  ;;  %v3667_v18 = vor.u32 %v3666_v29, %v3663_v50 }
  0xcd   : > { %v1328_v45 = vrot.slane %v8809_v42, 4  ;;  %v3677_v63 = vor.u32 %v3676_v55, %v7456_v10  ;;  %v7484_v8 = vsel %vm6965_vm8, %v1321_v32, %v1322_v59  ;;  %v1340_v1 = vrot.slane %v6552_v0, 5  ;;  %v6502_v59 = vld [vmem:[%s6688_s26 + $0x6c] sm:$0xff]   ;;  %v6503_v0 = vld [vmem:[%s6688_s26 + $0x78] sm:$0xff]  }
  0xce   : > { %v3694_v51 = vshll.u32 %v5566_v21, 16  ;;  %v3698_v50 = vshrl.u32 %v5566_v21, 16  ;;  %v3658_v60 = vrot.slane %v3656_v20, 5  ;;  %v3654_v29 = vrot.slane %v3653_v39, 4  ;;  %v7497_v20 = vld [vmem:[%s6688_s26 + $0x38] sm:$0x1] }
  0xcf   : > { %v1335_v55 = vrot.slane %v1333_v24, 4  ;;  %v3687_v46 = vrot.slane %v3685_v11, 4  ;;  %v3690_v32 = vrot.slane %v3688_v58, 5  ;;  %v3668_v21 = vrot.slane %v3667_v18, 4  ;;  %8830 = vst [vmem:[#allocation8_spill] sm:$0xff] %v7497_v20 }
  0xd0   : > { %v3678_v57 = vrot.slane %v3677_v63, 4  ;;  %v3682_v42 = vrot.slane %v3680_v47, 5  ;;  %v1342_v48 = vrot.slane %v1340_v1, 4  ;;  %v8831_v39 = vrot.slane %v7450_v27, 5  ;;  %v1228_v47 = vld [vmem:[%s6688_s26 + $0x84] sm:$0xe] }
  0xd1   : > { %6078 = vmatmul.mubr.msk.bf16.gmra.mrb[8].mxu0 %vm711_vm5, %v6498_v33  ;;  %v1227_v33 = vld [vmem:[%s6688_s26 + $0x78] sm:$0xe]  ;;  %v7511_v18 = vsel %vm6965_vm8, %v1328_v45, %v1329_v30  ;;  %v3659_v30 = vsel %vm6735_vm4, %v3654_v29, %v3658_v60  ;;  %v3673_v45 = vsel %vm6735_vm4, %v3668_v21, %v7456_v10  ;;  %v8833_v29 = vcombine.low %v7338_v19, %v7348_v37 }
  0xd2   : > { %5924 = vmatmul.mubr.msk.bf16.gmra.mrb[24].mxu1 %vm711_vm5, %v5215_v9  ;;  %6081 = vmatprep.mubr.msk.bf16.mxu0 %vm711_vm5, %v6500_v62  ;;  %v5243_v9 = vrot.slane %v1226_v35, 9  ;;  %v1336_v62 = vrot.slane %v6553_v17, 5  ;;  %v5244_v41 = vrot.slane %v1227_v33, 9  ;;  %v7499_v35 = vrot.slane %v3694_v51, 5 }
  0xd3   : > { %5927 = vmatprep.mubr.msk.bf16.mxu1 %vm711_vm5, %v5216_v53  ;;  %v6554_v53 = vld [vmem:[%s6688_s26 + $0x80] sm:$0x1]  ;;  %v3700_v17 = vrot.slane %v3698_v50, 4  ;;  %v7507_v58 = vsel %vm6965_vm8, %v5242_v38, %v8831_v39  ;;  %v3649_v33 = vsel %vm6735_vm4, %v3644_v15, %v7454_v13  ;;  %v3691_v51 = vor.u32 %v3690_v32, %v3687_v46  ;;  %v6555_v38 = vld [vmem:[%s6688_s26 + $0x88] sm:$0xf] }
  0xd4   : > { %v1343_v54 = vrot.slane %v6554_v53, 5  ;;  %v7515_v63 = vsel %vm6965_vm8, %v5243_v9, %v1333_v24  ;;  %v7523_v27 = vsel %vm6965_vm8, %v1335_v55, %v1336_v62  ;;  %v1347_v50 = vrot.slane %v6555_v38, 5  ;;  %v5568_v15 = vld [vmem:[%s6688_s26 + $0x3c] sm:$0xf]  ;;  %v6556_v55 = vld [vmem:[%s6688_s26 + $0x8c] sm:$0x1] }
  0xd5   : > { %v7534_v13 = vsel %vm6965_vm8, %v5244_v41, %v1340_v1  ;;  %v3704_v24 = vshll.u32 %v7497_v20, 16  ;;  %v8832_v9 = vcombine.low %v7123_v16, %v7128_v25  ;;  %v3683_v60 = vsel %vm6735_vm4, %v3678_v57, %v3682_v42  ;;  %v7564_v32 = vld [vmem:[%s6688_s26 + $0x40] sm:$0xf]  ;;  %v7568_v41 = vld [vmem:[%s6688_s26 + $0x4c] sm:$0xf] }
  0xd6   : > { %v7547_v10 = vsel %vm6965_vm8, %v1342_v48, %v1343_v54  ;;  %v3701_v1 = vor.u32 %v3700_v17, %v7499_v35  ;;  %v5245_v62 = vrot.slane %v1228_v47, 9  ;;  %v7560_v42 = vsel %vm760_vm1, %v7332_v49, 0  ;;  %8834 = vst [vmem:[#allocation9_spill] sm:$0xff] %v7564_v32  ;;  %v6504_v48 = vld [vmem:[%s6688_s26 + $0x84] sm:$0xff]   ;;  %v5574_v39 = vld [vmem:[%s6688_s26 + $0x54] sm:$0xf] }
  0xd7   : > { %v1350_v46 = vrot.slane %v6556_v55, 5  ;;  %v3692_v19 = vrot.slane %v3691_v51, 4  ;;  %v1349_v37 = vrot.slane %v1347_v50, 4  ;;  %v3712_v21 = vshll.u32 %v5568_v15, 16  ;;  %v6505_v47 = vld [vmem:[%s6688_s26 + $0x90] sm:$0xff]  }
  0xd8   : > { %v7571_v53 = vcombine.low %v3649_v33, %v3659_v30  ;;  %v7573_v54 = vcombine.low %v3673_v45, %v3683_v60  ;;  %v3706_v17 = vrot.slane %v3704_v24, 5  ;;  %v3702_v51 = vrot.slane %v3701_v1, 4  ;;  %v7586_v33 = vld [vmem:[%s6688_s26 + $0x58] sm:$0xf]  ;;  %v7589_v30 = vld [vmem:[%s6688_s26 + $0x44] sm:$0x1] }
  0xd9   : > { %6082 = vmatmul.mubr.msk.bf16.gmra.mrb[12].mxu0 %vm711_vm5, %v6502_v59  ;;  %v5571_v59 = vld [vmem:[%s6688_s26 + $0x48] sm:$0xf]  ;;  %v7581_v38 = vsel %vm6965_vm8, %v5245_v62, %v1347_v50  ;;  %8835 = vst [vmem:[#allocation10_spill] sm:$0xff] %v7589_v30  ;;  %v3742_v24 = vshll.u32 %v7568_v41, 16  ;;  %v3697_v1 = vsel %vm6735_vm4, %v3692_v19, %v7499_v35  ;;  %v7598_v50 = vsel %vm6965_vm8, %v1349_v37, %v1350_v46  ;;  %v7602_v49 = vld [vmem:[%s6688_s26 + $0x90] sm:$0xe] }
  0xda   : > { %5928 = vmatmul.mubr.msk.bf16.gmra.mrb[28].mxu1 %vm711_vm5, %v8832_v9  ;;  %6085 = vmatprep.mubr.msk.bf16.mxu0 %vm711_vm5, %v6503_v0  ;;  %v3709_v0 = vshrl.u32 %v5568_v15, 16  ;;  %v3718_v15 = vshll.u32 %v7564_v32, 16  ;;  %v3722_v9 = vshrl.u32 %v7564_v32, 16  ;;  %v3733_v45 = vshrl.u32 %v5571_v59, 16  ;;  %v6560_v20 = vld [vmem:[%s6688_s26 + $0xa0] sm:$0xf] }
  0xdb   : > { %5933 = vmatprep.mubr.msk.bf16.mxu1 %vm711_vm5, %v8833_v29  ;;  %v3736_v60 = vshll.u32 %v5571_v59, 16  ;;  %v3746_v29 = vshrl.u32 %v7568_v41, 16  ;;  %v3714_v55 = vrot.slane %v3712_v21, 5  ;;  %v3757_v59 = vshrl.u32 %v5574_v39, 16 }
  0xdc   : > { %v3711_v62 = vrot.slane %v3709_v0, 4  ;;  %v3760_v57 = vshll.u32 %v5574_v39, 16  ;;  %v3766_v16 = vshll.u32 %v7586_v33, 16  ;;  %v3770_v11 = vshrl.u32 %v7586_v33, 16 }
  0xdd   : > { %v8836_v35 = vcombine.low %v7342_v61, %v7352_v43  ;;  %v3707_v46 = vsel %vm6735_vm4, %v3702_v51, %v3706_v17  ;;  %v7613_v19 = vrot.slane %v3718_v15, 5  ;;  %v3724_v37 = vrot.slane %v3722_v9, 4  ;;  %v7622_v61 = vld [vmem:[%s6688_s26 + $0x50] sm:$0x1]  ;;  %v7632_v9 = vld [vmem:[%s6688_s26 + $0x5c] sm:$0x1] }
  0xde   : > { %v3728_v0 = vshll.u32 %v7589_v30, 16  ;;  %v8837_v21 = vcombine.low %v7356_v36, %v7364_v5  ;;  %v3735_v43 = vrot.slane %v3733_v45, 4  ;;  %v7624_v39 = vrot.slane %v3742_v24, 5  ;;  %v6557_v36 = vld [vmem:[%s6688_s26 + $0x94] sm:$0xf] }
  0xdf   : > { %v3748_v17 = vrot.slane %v3746_v29, 4  ;;  %v3715_v15 = vor.u32 %v3714_v55, %v3711_v62  ;;  %v1354_v5 = vrot.slane %v6557_v36, 5  ;;  %v6558_v45 = vld [vmem:[%s8805_s1 + $0x8] sm:$0x3]  ;;  %v3762_v24 = vrot.slane %v3760_v57, 5 }
  0xe0   : > { %v7638_v29 = vrot.slane %v3766_v16, 5  ;;  %v3772_v62 = vrot.slane %v3770_v11, 4  ;;  %v6507_v55 = vld [vmem:[%s6688_s26 + $0xa8] sm:$0xff]   ;;  %v7645_v36 = vrot.slane %v3728_v0, 5  ;;  %v3752_v51 = vshll.u32 %v7622_v61, 16 }
  0xe1   : > { %6086 = vmatmul.mubr.msk.bf16.gmra.mrb[16].mxu0 %vm711_vm5, %v6504_v48  ;;  %v3738_v48 = vrot.slane %v3736_v60, 5  ;;  %v3759_v60 = vrot.slane %v3757_v59, 4  ;;  %v7649_v30 = vld [vmem:[%s6688_s26 + $0x64] sm:$0xf]  ;;  %v3749_v57 = vor.u32 %v3748_v17, %v7624_v39  ;;  %v1230_v16 = vld [vmem:[%s6688_s26 + $0x9c] sm:$0xe] }
  0xe2   : > { %5934 = vmatmul.mubr.msk.bf16.vlgmr.msra.gmra.mrb[0].mxu1 %vm711_vm5, %v8836_v35  ;;  %6089 = vmatprep.mubr.msk.bf16.mxu0 %vm711_vm5, %v6505_v47  ;;  %v6506_v47 = vld [vmem:[%s6688_s26 + $0x9c] sm:$0xff]   ;;  %v7642_v35 = vcombine.low %v3697_v1, %v3707_v46  ;;  %8838 = vst [vmem:[#allocation11_spill] sm:$0xff] %v7649_v30  ;;  %v1361_v11 = vrot.slane %v6560_v20, 5  ;;  %v7655_v12 = vrot.slane %v3715_v15, 4  ;;  %v3776_v1 = vshll.u32 %v7632_v9, 16 }
  0xe3   : > { %5966 = vmatpush3.bf16.msra.mxu1 %v7377_v44  ;;  %5937 = vmatprep.mubr.msk.bf16.mxu1 %vm711_vm5, %v8837_v21  ;;  %v5246_v44 = vrot.slane %v7602_v49, 9  ;;  %v5577_v49 = vld [vmem:[%s6688_s26 + $0x60] sm:$0xf]  ;;  %v3725_v21 = vor.u32 %v3724_v37, %v7613_v19  ;;  %v3739_v59 = vor.u32 %v3738_v48, %v3735_v43  ;;  %v3763_v0 = vor.u32 %v3762_v24, %v3759_v60 }
  0xe4   : > { %6432 = vmatprep.subr.msk.bf16.mxu1 %vm760_vm1, %v6558_v45  ;;  %v6559_v45 = vld [vmem:[%s6688_s26 + $0x98] sm:$0x1]  ;;  %v3781_v46 = vshrl.u32 %v5577_v49, 16  ;;  %v3784_v37 = vshll.u32 %v5577_v49, 16  ;;  %v3773_v4 = vor.u32 %v3772_v62, %v7638_v29  ;;  %v3790_v43 = vshll.u32 %v7649_v30, 16 }
  0xe5   : > { %v1357_v32 = vrot.slane %v6559_v45, 5  ;;  %v3794_v48 = vshrl.u32 %v7649_v30, 16  ;;  %v8839_v20 = vcombine.low %v7392_v26, %v7399_v14  ;;  %v3726_v17 = vrot.slane %v3725_v21, 4 }
  0xe6   : > { %v1356_v15 = vrot.slane %v1354_v5, 4  ;;  %v5247_v60 = vrot.slane %v1230_v16, 9  ;;  %v8840_v24 = vcombine.low %v7403_v23, %v7409_v56  ;;  %v3740_v62 = vrot.slane %v3739_v59, 4 }
  0xe7   : > { %v3750_v49 = vrot.slane %v3749_v57, 4  ;;  %v1363_v45 = vrot.slane %v1361_v11, 4  ;;  %v1364_v26 = vrot.slane %v6561_v2, 5  ;;  %v3778_v14 = vrot.slane %v3776_v1, 5  ;;  %v6509_v57 = vld [vmem:[%s6688_s26 + $0xc0] sm:$0xff]  }
  0xe8   : > { %v3783_v40 = vrot.slane %v3781_v46, 4  ;;  %v3786_v30 = vrot.slane %v3784_v37, 5  ;;  %v3764_v16 = vrot.slane %v3763_v0, 4  ;;  %v3774_v23 = vrot.slane %v3773_v4, 4  ;;  %v7694_v37 = vld [vmem:[%s6688_s26 + $0x68] sm:$0x1] }
  0xe9   : > { %6090 = vmatmul.mubr.msk.bf16.gmra.mrb[20].mxu0 %vm711_vm5, %v6506_v47  ;;  %v3754_v47 = vrot.slane %v3752_v51, 5  ;;  %v6508_v51 = vld [vmem:[%s6688_s26 + $0xb4] sm:$0xff]   ;;  %v7675_v56 = vrot.slane %v3790_v43, 5  ;;  %v3796_v59 = vrot.slane %v3794_v48, 4  ;;  %v3721_v2 = vsel %vm6735_vm4, %v7655_v12, %v7613_v19  ;;  %8841 = vst [vmem:[#allocation12_spill] sm:$0xff] %v7694_v37 }
  0xea   : > { %5938 = vmatmul.mubr.msk.bf16.gmra.mrb[4].mxu1 %vm711_vm5, %v8839_v20  ;;  %6093 = vmatprep.mubr.msk.bf16.mxu0 %vm711_vm5, %v6507_v55  ;;  %v1231_v20 = vld [vmem:[%s6688_s26 + $0xa8] sm:$0xe]  ;;  %v6562_v55 = vld [vmem:[%s6688_s26 + $0xac] sm:$0xf]  ;;  %v3731_v1 = vsel %vm6735_vm4, %v3726_v17, %v7645_v36  ;;  %v7687_v46 = vsel %vm6965_vm8, %v5246_v44, %v1354_v5  ;;  %v7691_v4 = vsel %vm6965_vm8, %v1356_v15, %v1357_v32  ;;  %v1232_v5 = vld [vmem:[%s6688_s26 + $0xb4] sm:$0xe] }
  0xeb   : > { %5941 = vmatprep.mubr.msk.bf16.mxu1 %vm711_vm5, %v8840_v24  ;;  %v1368_v21 = vrot.slane %v6562_v55, 5  ;;  %v3745_v0 = vsel %vm6735_vm4, %v3740_v62, %v7624_v39  ;;  %v7701_v12 = vsel %vm6965_vm8, %v5247_v60, %v1361_v11  ;;  %v7705_v19 = vsel %vm6965_vm8, %v1363_v45, %v1364_v26  ;;  %v5580_v36 = vld [vmem:[%s6688_s26 + $0x6c] sm:$0xf]  ;;  %v6563_v48 = vld [vmem:[%s6688_s26 + $0xb0] sm:$0x1] }
  0xec   : > { %8842 = vst [vmem:[#allocation13_spill] sm:$0xff] %v7705_v19  ;;  %v5248_v44 = vrot.slane %v1231_v20, 9  ;;  %v3755_v32 = vsel %vm6735_vm4, %v3750_v49, %v3754_v47  ;;  %v1371_v17 = vrot.slane %v6563_v48, 5  ;;  %v3787_v39 = vor.u32 %v3786_v30, %v3783_v40  ;;  %v7729_v62 = vld [vmem:[%s6688_s26 + $0x70] sm:$0xf] }
  0xed   : > { %v1370_v43 = vrot.slane %v1368_v21, 4  ;;  %v3769_v11 = vsel %vm6735_vm4, %v3764_v16, %v7638_v29  ;;  %v3779_v15 = vsel %vm6735_vm4, %v3774_v23, %v3778_v14  ;;  %v3797_v60 = vor.u32 %v3796_v59, %v7675_v56  ;;  %8844 = vst [vmem:[#allocation14_spill] sm:$0xff] %v7729_v62  ;;  %v5583_v20 = vld [vmem:[%s6688_s26 + $0x78] sm:$0xf]  ;;  %v7748_v55 = vld [vmem:[%s6688_s26 + $0x7c] sm:$0xf] }
  0xee   : > { %v3800_v47 = vshll.u32 %v7694_v37, 16  ;;  %v8843_v24 = vcombine.low %v7413_v3, %v7417_v6  ;;  %v5249_v30 = vrot.slane %v1232_v5, 9  ;;  %v1375_v29 = vrot.slane %v7128_v25, 5  ;;  %v6510_v3 = vld [vmem:[%s6688_s26 + $0xcc] sm:$0xff]   ;;  %8846 = vst [vmem:[#allocation15_spill] sm:$0xff] %v7748_v55 }
  0xef   : > { %v3805_v49 = vshrl.u32 %v5580_v36, 16  ;;  %v8845_v45 = vcombine.low %v7439_v34, %v7447_v7  ;;  %v7736_v6 = vcombine.low %v3721_v2, %v3731_v1  ;;  %v7738_v26 = vcombine.low %v3745_v0, %v3755_v32  ;;  %v5586_v23 = vld [vmem:[%s6688_s26 + $0x84] sm:$0xf]  ;;  %v7761_v59 = vld [vmem:[%s6688_s26 + $0x88] sm:$0xf] }
  0xf0   : > { %v7744_v25 = vsel %vm6965_vm8, %v5248_v44, %v1368_v21  ;;  %v7750_v34 = vcombine.low %v3769_v11, %v3779_v15  ;;  %v7754_v7 = vsel %vm6965_vm8, %v1370_v43, %v1371_v17  ;;  %8847 = vst [vmem:[#allocation16_spill] sm:$0xff] %v7761_v59  ;;  %v7765_v21 = vrot.slane %v3800_v47, 5  ;;  %v5589_v0 = vld [vmem:[%s6688_s26 + $0x90] sm:$0xf]  ;;  %v7777_v48 = vld [vmem:[%s6688_s26 + $0x94] sm:$0xf] }
  0xf1   : > { %6094 = vmatmul.mubr.msk.bf16.gmra.mrb[24].mxu0 %vm711_vm5, %v6508_v51  ;;  %v7756_v51 = vrot.slane %v3787_v39, 4  ;;  %v3808_v2 = vshll.u32 %v5580_v36, 16  ;;  %v3814_v1 = vshll.u32 %v7729_v62, 16  ;;  %v7771_v44 = vsel %vm6965_vm8, %v5249_v30, %v1375_v29  ;;  %8848 = vst [vmem:[#allocation17_spill] sm:$0xff] %v7777_v48  ;;  %v7785_v30 = vld [vmem:[%s6688_s26 + $0x74] sm:$0x1] }
  0xf2   : > { %5942 = vmatmul.mubr.msk.bf16.gmra.mrb[8].mxu1 %vm711_vm5, %v8843_v24  ;;  %6097 = vmatprep.mubr.msk.bf16.mxu0 %vm711_vm5, %v6509_v57  ;;  %v7763_v57 = vrot.slane %v3797_v60, 4  ;;  %v7773_v5 = vrot.slane %v1375_v29, 4  ;;  %v3807_v32 = vrot.slane %v3805_v49, 4  ;;  %v3818_v43 = vshrl.u32 %v7729_v62, 16  ;;  %v7802_v16 = vld [vmem:[%s6688_s26 + $0x80] sm:$0x1] }
  0xf3   : > { %5945 = vmatprep.mubr.msk.bf16.mxu1 %vm711_vm5, %v8845_v45  ;;  %v3829_v17 = vshrl.u32 %v5583_v20, 16  ;;  %v3832_v39 = vshll.u32 %v5583_v20, 16  ;;  %v3838_v11 = vshll.u32 %v7748_v55, 16  ;;  %v3842_v36 = vshrl.u32 %v7748_v55, 16 }
  0xf4   : > { %v3853_v15 = vshrl.u32 %v5586_v23, 16  ;;  %v3856_v60 = vshll.u32 %v5586_v23, 16  ;;  %v3862_v47 = vshll.u32 %v7761_v59, 16  ;;  %v3866_v24 = vshrl.u32 %v7761_v59, 16  ;;  %v5592_v59 = vld [vmem:[%s6688_s26 + $0x9c] sm:$0xf] }
  0xf5   : > { %v3877_v29 = vshrl.u32 %v5589_v0, 16  ;;  %v3880_v49 = vshll.u32 %v5589_v0, 16  ;;  %v3886_v45 = vshll.u32 %v7777_v48, 16  ;;  %v3890_v20 = vshrl.u32 %v7777_v48, 16 }
  0xf6   : > { %v8849_v14 = vcombine.low %v7467_v28, %v7484_v8  ;;  %v3810_v23 = vrot.slane %v3808_v2, 5  ;;  %v7799_v0 = vrot.slane %v3814_v1, 5  ;;  %v3820_v40 = vrot.slane %v3818_v43, 4 }
  0xf7   : > { %v8850_v48 = vcombine.low %v7507_v58, %v7511_v18  ;;  %v3831_v28 = vrot.slane %v3829_v17, 4  ;;  %v3834_v8 = vrot.slane %v3832_v39, 5  ;;  %v3855_v2 = vrot.slane %v3853_v15, 4 }
  0xf8   : > { %v3858_v1 = vrot.slane %v3856_v60, 5  ;;  %v7814_v43 = vrot.slane %v3862_v47, 5  ;;  %v3868_v55 = vrot.slane %v3866_v24, 4  ;;  %v3879_v62 = vrot.slane %v3877_v29, 4 }
  0xf9   : > { %6098 = vmatmul.mubr.msk.bf16.gmra.mrb[28].mxu0 %vm711_vm5, %v6510_v3  ;;  %v7812_v3 = vld [vmem:[%s6688_s26 + $0x8c] sm:$0x1]  ;;  %v3882_v37 = vrot.slane %v3880_v49, 5  ;;  %v7816_v58 = vrot.slane %v3886_v45, 5  ;;  %v3892_v18 = vrot.slane %v3890_v20, 4  ;;  %v3811_v17 = vor.u32 %v3810_v23, %v3807_v32 }
  0xfa   : > { %5946 = vmatmul.mubr.msk.bf16.gmra.mrb[12].mxu1 %vm711_vm5, %v8849_v14  ;;  %6103 = vmatprep.mubr.msk.bf16.mxu0 %vm711_vm5, %v7571_v53  ;;  %v7808_v53 = vrot.slane %v3838_v11, 5  ;;  %v3844_v14 = vrot.slane %v3842_v36, 4  ;;  %v3824_v39 = vshll.u32 %v7785_v30, 16  ;;  %v7823_v11 = vld [vmem:[%s6688_s26 + $0x98] sm:$0x1]  ;;  %v3901_v36 = vshrl.u32 %v5592_v59, 16 }
  0xfb   : > { %5949 = vmatprep.mubr.msk.bf16.mxu1 %vm711_vm5, %v8850_v48  ;;  %v7819_v48 = vld [vmem:[%s6688_s26 + $0xa0] sm:$0xf]  ;;  %v3904_v19 = vshll.u32 %v5592_v59, 16  ;;  %v3821_v15 = vor.u32 %v3820_v40, %v7799_v0  ;;  %v3835_v60 = vor.u32 %v3834_v8, %v3831_v28  ;;  %v3848_v24 = vshll.u32 %v7802_v16, 16 }
  0xfc   : > { %v3845_v47 = vor.u32 %v3844_v14, %v7808_v53  ;;  %v3859_v29 = vor.u32 %v3858_v1, %v3855_v2  ;;  %v3872_v49 = vshll.u32 %v7812_v3, 16  ;;  %v3910_v45 = vshll.u32 %v7819_v48, 16 }
  0xfd   : > { %v3914_v32 = vshrl.u32 %v7819_v48, 16  ;;  %v3869_v20 = vor.u32 %v3868_v55, %v7814_v43  ;;  %v3883_v59 = vor.u32 %v3882_v37, %v3879_v62  ;;  %v3893_v40 = vor.u32 %v3892_v18, %v7816_v58  ;;  %v5595_v55 = vld [vmem:[%s6688_s26 + $0xa8] sm:$0xf] }
  0xfe   : > { %v3896_v23 = vshll.u32 %v7823_v11, 16  ;;  %v8851_v28 = vcombine.low %v7515_v63, %v7523_v27  ;;  %v3812_v8 = vrot.slane %v3811_v17, 4  ;;  %v3826_v14 = vrot.slane %v3824_v39, 5 }
  0xff   : > { %v3903_v2 = vrot.slane %v3901_v36, 4  ;;  %v3906_v1 = vrot.slane %v3904_v19, 5  ;;  %v3822_v37 = vrot.slane %v3821_v15, 4  ;;  %v3836_v63 = vrot.slane %v3835_v60, 4  ;;  %v7858_v60 = vld [vmem:[%s6688_s26 + $0xac] sm:$0xf] }
 0x100   : > { %v3846_v27 = vrot.slane %v3845_v47, 4  ;;  %v3850_v62 = vrot.slane %v3848_v24, 5  ;;  %v3874_v18 = vrot.slane %v3872_v49, 5  ;;  %v7848_v17 = vrot.slane %v3910_v45, 5 }
 0x101   : > { %6104 = vmatmul.mubr.msk.bf16.vlgmr.msra.gmra.mrb[0].mxu0 %vm711_vm5, %v7573_v54  ;;  %v8852_v54 = vcombine.low %v7534_v13, %v7547_v10  ;;  %v3916_v19 = vrot.slane %v3914_v32, 4  ;;  %v3870_v39 = vrot.slane %v3869_v20, 4  ;;  %v3884_v36 = vrot.slane %v3883_v59, 4 }
 0x102   : > { %5950 = vmatmul.mubr.msk.bf16.gmra.mrb[16].mxu1 %vm711_vm5, %v8851_v28  ;;  %6136 = vmatpush3.bf16.msra.mxu0 %v7560_v42  ;;  %v3860_v42 = vrot.slane %v3859_v29, 4  ;;  %v3894_v13 = vrot.slane %v3893_v40, 4  ;;  %v3898_v10 = vrot.slane %v3896_v23, 5  ;;  %v7851_v28 = vld [vmem:[%s6688_s26 + $0xa4] sm:$0x1]  ;;  %v3907_v15 = vor.u32 %v3906_v1, %v3903_v2 }
 0x103   : > { %5953 = vmatprep.mubr.msk.bf16.mxu1 %vm711_vm5, %v8852_v54  ;;  %6107 = vmatprep.mubr.msk.bf16.mxu0 %vm711_vm5, %v7642_v35  ;;  %v3803_v35 = vsel %vm6735_vm4, %v7763_v57, %v7765_v21  ;;  %v3925_v47 = vshrl.u32 %v5595_v55, 16  ;;  %v3928_v24 = vshll.u32 %v5595_v55, 16  ;;  %v8853_v29 = vrot.slane %v7134_v52, 5  ;;  %v7892_v40 = vld [vmem:[%s6688_s26 + $0xb0] sm:$0x1] }
 0x104   : > { %v3817_v45 = vsel %vm6735_vm4, %v3812_v8, %v7799_v0  ;;  %v3827_v57 = vsel %vm6735_vm4, %v3822_v37, %v3826_v14  ;;  %v3841_v21 = vsel %vm6735_vm4, %v3836_v63, %v7808_v53  ;;  %v3851_v32 = vsel %vm6735_vm4, %v3846_v27, %v3850_v62  ;;  %v7903_v2 = vld [vmem:[%s6688_s26 + $0xb4] sm:$0xf]  ;;  %v5644_v63 = vld [vmem:[%s6688_s26 + $0x48] sm:$0xe] }
 0x105   : > { %v7865_v49 = vsel %vm6965_vm8, %v7773_v5, %v8853_v29  ;;  %v3865_v52 = vsel %vm6735_vm4, %v3860_v42, %v7814_v43  ;;  %v3917_v5 = vor.u32 %v3916_v19, %v7848_v17  ;;  %v3920_v20 = vshll.u32 %v7851_v28, 16 }
 0x106   : > { %v3875_v0 = vsel %vm6735_vm4, %v3870_v39, %v3874_v18  ;;  %v3889_v53 = vsel %vm6735_vm4, %v3884_v36, %v7816_v58  ;;  %v3899_v59 = vsel %vm6735_vm4, %v3894_v13, %v3898_v10  ;;  %v3934_v43 = vshll.u32 %v7858_v60, 16 }
 0x107   : > { %v8854_v23 = vcombine.low %v7581_v38, %v7598_v50  ;;  %v3927_v8 = vrot.slane %v3925_v47, 4  ;;  %v3930_v58 = vrot.slane %v3928_v24, 5  ;;  %v3938_v14 = vshrl.u32 %v7858_v60, 16  ;;  %v5646_v47 = vld [vmem:[%s6688_s26 + $0x60] sm:$0xe] }
 0x108   : > { %v8855_v1 = vcombine.low %v7687_v46, %v7691_v4  ;;  %v5265_v38 = vcombine.low %v7744_v25, %v7754_v7  ;;  %v8856_v50 = vsel %vm6735_vm4, %v7756_v51, %v7675_v56  ;;  %v5266_v54 = vcombine.low %v7771_v44, %v7865_v49  ;;  %v5645_v25 = vld [vmem:[%s6688_s26 + $0x54] sm:$0xe]  ;;  %v7932_v51 = vld [vmem:[%s6688_s26 + $0xb8] sm:$0xf] }
 0x109   : > { %6108 = vmatmul.mubr.msk.bf16.gmra.mrb[4].mxu0 %vm711_vm5, %v7736_v6  ;;  %v3908_v6 = vrot.slane %v3907_v15, 4  ;;  %v7918_v37 = vcombine.low %v3817_v45, %v3827_v57  ;;  %v7921_v27 = vcombine.low %v3841_v21, %v3851_v32  ;;  %v3918_v46 = vrot.slane %v3917_v5, 4  ;;  %v5647_v32 = vld [vmem:[%s6688_s26 + $0x6c] sm:$0xe]  ;;  %v8863_v49 = vld [vmem:[#allocation6_spill] sm:$0xff] }
 0x10a   : > { %5954 = vmatmul.mubr.msk.bf16.gmra.mrb[20].mxu1 %vm711_vm5, %v8854_v23  ;;  %6111 = vmatprep.mubr.msk.bf16.mxu0 %vm711_vm5, %v7738_v26  ;;  %v5614_v26 = vcombine.low %v8856_v50, %v3803_v35  ;;  %v3922_v4 = vrot.slane %v3920_v20, 5  ;;  %v3944_v62 = vshll.u32 %v7892_v40, 16  ;;  %v7925_v7 = vcombine.low %v3865_v52, %v3875_v0  ;;  %v8857_v52 = vld [vmem:[#allocation13_spill] sm:$0xff] }
 0x10b   : > { %5957 = vmatprep.mubr.msk.bf16.mxu1 %vm711_vm5, %v8855_v1  ;;  %v7927_v55 = vcombine.low %v3889_v53, %v3899_v59  ;;  %v7929_v56 = vrot.slane %v3934_v43, 5  ;;  %v3949_v42 = vshrl.u32 %v7903_v2, 16  ;;  %v3913_v18 = vsel %vm6735_vm4, %v3908_v6, %v7848_v17  ;;  %v8859_v53 = vld [vmem:[#allocation11_spill] sm:$0xff]  ;;  %v8860_v43 = vld [vmem:[#allocation12_spill] sm:$0xff] }
 0x10c   : > { %v3931_v19 = vor.u32 %v3930_v58, %v3927_v8  ;;  %v3940_v39 = vrot.slane %v3938_v14, 4  ;;  %v3952_v36 = vshll.u32 %v7903_v2, 16  ;;  %v5660_v13 = vrot.slane %v5644_v63, 9  ;;  %v7978_v6 = vld [vmem:[%s6688_s26 + $0xbc] sm:$0x1]  ;;  %v8861_v2 = vld [vmem:[#allocation14_spill] sm:$0xff] }
 0x10d   : > { %v4408_v10 = vrot.slane %v7568_v41, 5  ;;  %v4411_v35 = vrot.slane %v7622_v61, 5  ;;  %v5661_v15 = vrot.slane %v5645_v25, 9  ;;  %v3923_v24 = vsel %vm6735_vm4, %v3918_v46, %v3922_v4  ;;  %v7999_v25 = vld [vmem:[%s6688_s26 + $0xc4] sm:$0xf] }
 0x10e   : > { %v7944_v29 = vrot.slane %v3944_v62, 5  ;;  %v3958_v45 = vshll.u32 %v7932_v51, 16  ;;  %v4415_v17 = vrot.slane %v7586_v33, 5  ;;  %v7950_v57 = vrot.slane %v3949_v42, 4 }
 0x10f   : > { %v7954_v41 = vsel %vm6965_vm8, %v5660_v13, %v4408_v10  ;;  %v4410_v61 = vrot.slane %v4408_v10, 4  ;;  %v4418_v21 = vrot.slane %v7632_v9, 5  ;;  %v8858_v5 = vcombine.low %v7701_v12, %v8857_v52  ;;  %v5649_v52 = vld [vmem:[%s6688_s26 + $0x84] sm:$0xe] }
 0x110   : > { %v7963_v33 = vrot.slane %v3931_v19, 4  ;;  %v4417_v20 = vrot.slane %v4415_v17, 4  ;;  %v5662_v0 = vrot.slane %v5646_v47, 9  ;;  %v3941_v9 = vor.u32 %v3940_v39, %v7929_v56  ;;  %v6511_v39 = vld [vmem:[%s6688_s26 + $0xc] sm:$0xff]  }
 0x111   : > { %6112 = vmatmul.mubr.msk.bf16.gmra.mrb[8].mxu0 %vm711_vm5, %v7750_v34  ;;  %v7967_v34 = vsel %vm6965_vm8, %v5661_v15, %v4415_v17  ;;  %v7973_v12 = vsel %vm6965_vm8, %v4410_v61, %v4411_v35  ;;  %v4422_v59 = vrot.slane %v8859_v53, 5  ;;  %v4425_v23 = vrot.slane %v8860_v43, 5  ;;  %v5648_v35 = vld [vmem:[%s6688_s26 + $0x78] sm:$0xe] }
 0x112   : > { %5958 = vmatmul.mubr.msk.bf16.gmra.mrb[24].mxu1 %vm711_vm5, %v8858_v5  ;;  %6115 = vmatprep.mubr.msk.bf16.mxu0 %vm711_vm5, %v5614_v26  ;;  %v5677_v8 = vcombine.low %v7954_v41, %v7973_v12  ;;  %v7984_v58 = vsel %vm6965_vm8, %v4417_v20, %v4418_v21  ;;  %v5663_v14 = vrot.slane %v5647_v32, 9  ;;  %v4429_v1 = vrot.slane %v8861_v2, 5 }
 0x113   : > { %5961 = vmatprep.mubr.msk.bf16.mxu1 %vm711_vm5, %v5265_v38  ;;  %v5601_v38 = vld [vmem:[%s6688_s26 + $0xc0] sm:$0xf]  ;;  %v5678_v50 = vcombine.low %v7967_v34, %v7984_v58  ;;  %v7992_v26 = vsel %vm6965_vm8, %v5662_v0, %v4422_v59  ;;  %v4424_v63 = vrot.slane %v4422_v59, 4  ;;  %v4432_v46 = vrot.slane %v7785_v30, 5  ;;  %v6574_v58 = vld [vmem:[%s6688_s26 + $0x8c] sm:$0x1] }
 0x114   : > { %v7995_v4 = vcombine.low %v3913_v18, %v3923_v24  ;;  %v3962_v62 = vshrl.u32 %v7932_v51, 16  ;;  %v8003_v42 = vsel %vm6965_vm8, %v5663_v14, %v4429_v1  ;;  %v4431_v19 = vrot.slane %v4429_v1, 4  ;;  %v5604_v1 = vld [vmem:[%s6688_s26 + $0xcc] sm:$0xf] }
 0x115   : > { %v8006_v13 = vrot.slane %v3952_v36, 5  ;;  %v8008_v10 = vrot.slane %v3958_v45, 5  ;;  %v3968_v30 = vshll.u32 %v7978_v6, 16  ;;  %v8013_v18 = vsel %vm6965_vm8, %v4424_v63, %v4425_v23  ;;  %v5375_v45 = vld [vmem:[%s6688_s26 + $0x78] sm:$0xf] }
 0x116   : > { %v3937_v15 = vsel %vm6735_vm4, %v7963_v33, %v7929_v56  ;;  %v3973_v47 = vshrl.u32 %v5601_v38, 16  ;;  %v5679_v24 = vcombine.low %v7992_v26, %v8013_v18  ;;  %v8024_v36 = vsel %vm6965_vm8, %v4431_v19, %v4432_v46  ;;  %v8865_v46 = vld [vmem:[#allocation16_spill] sm:$0xff]  ;;  %v6512_v19 = vld [vmem:[%s6688_s26 + $0x18] sm:$0xff]  }
 0x117   : > { %v3942_v17 = vrot.slane %v3941_v9, 4  ;;  %v3976_v61 = vshll.u32 %v5601_v38, 16  ;;  %v3982_v21 = vshll.u32 %v7999_v25, 16  ;;  %v5680_v32 = vcombine.low %v8003_v42, %v8024_v36  ;;  %v6577_v36 = vld [vmem:[%s6688_s26 + $0xac] sm:$0xf] }
 0x118   : > { %v3964_v5 = vrot.slane %v3962_v62, 4  ;;  %v5664_v20 = vrot.slane %v5648_v35, 9  ;;  %v4439_v9 = vrot.slane %v7802_v16, 5  ;;  %v3986_v53 = vshrl.u32 %v7999_v25, 16 }
 0x119   : > { %6116 = vmatmul.mubr.msk.bf16.gmra.mrb[12].mxu0 %vm711_vm5, %v7918_v37  ;;  %v8862_v37 = vld [vmem:[#allocation15_spill] sm:$0xff]  ;;  %v2298_v59 = vshrl.u32 %v5375_v45, 16  ;;  %v2301_v44 = vshll.u32 %v5375_v45, 16  ;;  %v5665_v16 = vrot.slane %v5649_v52, 9  ;;  %v3978_v2 = vrot.slane %v3976_v61, 5  ;;  %v6513_v52 = vld [vmem:[%s6688_s26 + $0x24] sm:$0xff]  }
 0x11a   : > { %5962 = vmatmul.mubr.msk.bf16.gmra.mrb[28].mxu1 %vm711_vm5, %v5266_v54  ;;  %6119 = vmatprep.mubr.msk.bf16.mxu0 %vm711_vm5, %v7921_v27  ;;  %v4436_v0 = vrot.slane %v8862_v37, 5  ;;  %v8864_v54 = vld [vmem:[#allocation7_spill] sm:$0xff]  ;;  %v3975_v27 = vrot.slane %v3973_v47, 4  ;;  %v4443_v62 = vrot.slane %v8865_v46, 5  ;;  %v8056_v35 = vrot.slane %v3982_v21, 5 }
 0x11b   : > { %5967 = vmatprep.mubr.msk.bf16.mxu1 %vm711_vm5, %v6511_v39  ;;  %v2320_v43 = vsel %vm6735_vm4, %v8864_v54, %v8863_v49  ;;  %v2300_v38 = vrot.slane %v2298_v59, 4  ;;  %v2303_v63 = vrot.slane %v2301_v44, 5  ;;  %v3955_v39 = vor.u32 %v8006_v13, %v7950_v57  ;;  %v8059_v47 = vld [vmem:[%s6688_s26 + $0xd0] sm:$0xf]  ;;  %v8075_v59 = vld [vmem:[%s6688_s26 + $0xc8] sm:$0x1] }
 0x11c   : > { %v8049_v23 = vsel %vm6965_vm8, %v5664_v20, %v4436_v0  ;;  %v4438_v14 = vrot.slane %v4436_v0, 4  ;;  %v4446_v61 = vrot.slane %v7812_v3, 5  ;;  %v3947_v20 = vsel %vm6735_vm4, %v3942_v17, %v7944_v29  ;;  %v5650_v13 = vld [vmem:[%s6688_s26 + $0x90] sm:$0xe] }
 0x11d   : > { %v3988_v37 = vrot.slane %v3986_v53, 4  ;;  %v2304_v57 = vor.u32 %v2303_v63, %v2300_v38  ;;  %v3965_v21 = vor.u32 %v3964_v5, %v8008_v10  ;;  %v3997_v44 = vshrl.u32 %v5604_v1, 16  ;;  %v8868_v38 = vld [vmem:[#allocation5_spill] sm:$0xff] }
 0x11e   : > { %v8063_v45 = vsel %vm6965_vm8, %v4438_v14, %v4439_v9  ;;  %v8079_v9 = vsel %vm6965_vm8, %v5665_v16, %v4443_v62  ;;  %v4445_v3 = vrot.slane %v4443_v62, 4  ;;  %v3979_v29 = vor.u32 %v3978_v2, %v3975_v27  ;;  %v8867_v16 = vld [vmem:[#allocation4_spill] sm:$0xff] }
 0x11f   : > { %v5681_v0 = vcombine.low %v8049_v23, %v8063_v45  ;;  %v4000_v17 = vshll.u32 %v5604_v1, 16  ;;  %v4006_v53 = vshll.u32 %v8059_v47, 16  ;;  %v2305_v49 = vrot.slane %v2304_v57, 4  ;;  %v8113_v57 = vld [vmem:[%s6688_s26 + $0xd4] sm:$0x1] }
 0x120   : > { %v4010_v5 = vshrl.u32 %v8059_v47, 16  ;;  %v8090_v54 = vsel %vm6965_vm8, %v4445_v3, %v4446_v61  ;;  %v5666_v14 = vrot.slane %v5650_v13, 9  ;;  %v3989_v2 = vor.u32 %v3988_v37, %v8056_v35  ;;  %v6578_v45 = vld [vmem:[%s6688_s26 + $0xb8] sm:$0xf] }
 0x121   : > { %6120 = vmatmul.mubr.msk.bf16.gmra.mrb[16].mxu0 %vm711_vm5, %v7925_v7  ;;  %v8866_v7 = vld [vmem:[#allocation17_spill] sm:$0xff]  ;;  %v3992_v1 = vshll.u32 %v8075_v59, 16  ;;  %v5682_v63 = vcombine.low %v8079_v9, %v8090_v54  ;;  %v5620_v46 = vcombine.low %v3937_v15, %v3947_v20  ;;  %v3956_v62 = vrot.slane %v3955_v39, 4  ;;  %v5651_v20 = vld [vmem:[%s6688_s26 + $0x9c] sm:$0xe] }
 0x122   : > { %5968 = vmatmul.mubr.msk.bf16.vlgmr.msra.gmra.mrb[0].mxu1 %vm711_vm5, %v6512_v19  ;;  %6123 = vmatprep.mubr.msk.bf16.mxu0 %vm711_vm5, %v7927_v55  ;;  %v4450_v27 = vrot.slane %v8866_v7, 5  ;;  %v2310_v55 = vsel %vm6735_vm4, %v2305_v49, %v8868_v38  ;;  %v3970_v19 = vrot.slane %v3968_v30, 5  ;;  %v3966_v37 = vrot.slane %v3965_v21, 4  ;;  %v6515_v30 = vld [vmem:[%s6688_s26 + $0x3c] sm:$0xff]  }
 0x123   : > { %6170 = vmatpush3.bf16.msra.mxu1 %v8867_v16  ;;  %5971 = vmatprep.mubr.msk.bf16.mxu1 %vm711_vm5, %v6513_v52  ;;  %v8109_v61 = vcombine.low %v2310_v55, %v2320_v43  ;;  %v6514_v52 = vld [vmem:[%s6688_s26 + $0x30] sm:$0xff]   ;;  %v4453_v49 = vrot.slane %v7823_v11, 5  ;;  %v3999_v56 = vrot.slane %v3997_v44, 4  ;;  %v4002_v33 = vrot.slane %v4000_v17, 5  ;;  %v6564_v38 = vld [vmem:[%s6688_s26 + $0x1c] sm:$0xf] }
 0x124   : > { %v8117_v13 = vsel %vm6965_vm8, %v5666_v14, %v4450_v27  ;;  %v4452_v3 = vrot.slane %v4450_v27, 4  ;;  %v8120_v15 = vrot.slane %v4006_v53, 5  ;;  %v4012_v39 = vrot.slane %v4010_v5, 4 }
 0x125   : > { %v3980_v43 = vrot.slane %v3979_v29, 4  ;;  %v3990_v7 = vrot.slane %v3989_v2, 4  ;;  %v3994_v21 = vrot.slane %v3992_v1, 5  ;;  %v3961_v11 = vsel %vm6735_vm4, %v3956_v62, %v8008_v10  ;;  %v5652_v62 = vld [vmem:[%s6688_s26 + $0xa8] sm:$0xe] }
 0x126   : > { %v8126_v16 = vsel %vm6965_vm8, %v4452_v3, %v4453_v49  ;;  %v3971_v44 = vsel %vm6735_vm4, %v3966_v37, %v3970_v19  ;;  %v4016_v29 = vshll.u32 %v8113_v57, 16  ;;  %v5667_v17 = vrot.slane %v5651_v20, 9  ;;  %v6516_v37 = vld [vmem:[%s6688_s26 + $0x48] sm:$0xff]   ;;  %v6565_v20 = vld [vmem:[%s6688_s26 + $0x20] sm:$0x1] }
 0x127   : > { %v5683_v14 = vcombine.low %v8117_v13, %v8126_v16  ;;  %v4003_v53 = vor.u32 %v4002_v33, %v3999_v56  ;;  %v4013_v5 = vor.u32 %v4012_v39, %v8120_v15  ;;  %v4457_v27 = vrot.slane %v7819_v48, 5  ;;  %v6517_v33 = vld [vmem:[%s6688_s26 + $0x54] sm:$0xff]  }
 0x128   : > { %v4460_v10 = vrot.slane %v7851_v28, 5  ;;  %v3985_v2 = vsel %vm6735_vm4, %v3980_v43, %v8056_v35  ;;  %v3995_v1 = vsel %vm6735_vm4, %v3990_v7, %v3994_v21  ;;  %v4380_v55 = vrot.slane %v6564_v38, 5  ;;  %v5642_v38 = vld [vmem:[%s6688_s26 + $0x30] sm:$0xe] }
 0x129   : > { %6124 = vmatmul.mubr.msk.bf16.gmra.mrb[20].mxu0 %vm711_vm5, %v7995_v4  ;;  %v5640_v4 = vld [vmem:[%s6688_s26 + $0x18] sm:$0xe]  ;;  %v4459_v48 = vrot.slane %v4457_v27, 4  ;;  %v5621_v28 = vcombine.low %v3961_v11, %v3971_v44  ;;  %v4018_v19 = vrot.slane %v4016_v29, 5  ;;  %v5622_v3 = vcombine.low %v3985_v2, %v3995_v1  ;;  %v5641_v11 = vld [vmem:[%s6688_s26 + $0x24] sm:$0xe] }
 0x12a   : > { %5972 = vmatmul.mubr.msk.bf16.gmra.mrb[4].mxu1 %vm711_vm5, %v6514_v52  ;;  %6127 = vmatprep.mubr.msk.bf16.mxu0 %vm711_vm5, %v5620_v46  ;;  %v8153_v46 = vsel %vm6965_vm8, %v5667_v17, %v4457_v27  ;;  %v5656_v52 = vrot.slane %v5640_v4, 9  ;;  %v4004_v35 = vrot.slane %v4003_v53, 4  ;;  %v4014_v49 = vrot.slane %v4013_v5, 4  ;;  %v6566_v44 = vld [vmem:[%s6688_s26 + $0x28] sm:$0xf] }
 0x12b   : > { %5975 = vmatprep.mubr.msk.bf16.mxu1 %vm711_vm5, %v6515_v30  ;;  %v8159_v56 = vsel %vm6965_vm8, %v4459_v48, %v4460_v10  ;;  %v4382_v39 = vrot.slane %v4380_v55, 4  ;;  %v4383_v30 = vrot.slane %v6565_v20, 5  ;;  %v5668_v7 = vrot.slane %v5652_v62, 9  ;;  %v6567_v10 = vld [vmem:[%s6688_s26 + $0x34] sm:$0xf] }
 0x12c   : > { %v5684_v43 = vcombine.low %v8153_v46, %v8159_v56  ;;  %v4464_v21 = vrot.slane %v7858_v60, 5  ;;  %v4387_v29 = vrot.slane %v6566_v44, 5  ;;  %v4467_v17 = vrot.slane %v7892_v40, 5  ;;  %v5653_v2 = vld [vmem:[%s6688_s26 + $0xb4] sm:$0xe] }
 0x12d   : > { %v4009_v53 = vsel %vm6735_vm4, %v4004_v35, %v8120_v15  ;;  %v4019_v60 = vsel %vm6735_vm4, %v4014_v49, %v4018_v19  ;;  %v4381_v40 = vsel %vm6965_vm8, %v5656_v52, %v4380_v55  ;;  %v4384_v27 = vsel %vm6965_vm8, %v4382_v39, %v4383_v30  ;;  %v6568_v19 = vld [vmem:[%s6688_s26 + $0x2c] sm:$0x1]  ;;  %v6518_v52 = vld [vmem:[%s6688_s26 + $0x60] sm:$0xff]   ;;  %v6582_v46 = vld [vmem:[%s6688_s26 + $0xc8] sm:$0x1] }
 0x12e   : > { %v8179_v5 = vsel %vm6965_vm8, %v5668_v7, %v4464_v21  ;;  %v4466_v4 = vrot.slane %v4464_v21, 4  ;;  %v4394_v15 = vrot.slane %v6567_v10, 5  ;;  %v5657_v1 = vrot.slane %v5641_v11, 9  ;;  %v6519_v39 = vld [vmem:[%s6688_s26 + $0x6c] sm:$0xff]   ;;  %v8869_v7 = vld [vmem:[#allocation8_spill] sm:$0xff] }
 0x12f   : > { %v5623_v62 = vcombine.low %v4009_v53, %v4019_v60  ;;  %v5669_v35 = vrot.slane %v5653_v2, 9  ;;  %v4471_v49 = vrot.slane %v7932_v51, 5  ;;  %v5658_v20 = vrot.slane %v5642_v38, 9  ;;  %v8870_v11 = vld [vmem:[#allocation9_spill] sm:$0xff]  ;;  %v5654_v60 = vld [vmem:[%s6688_s26 + $0xc0] sm:$0xe] }
 0x130   : > { %v8191_v48 = vsel %vm6965_vm8, %v4466_v4, %v4467_v17  ;;  %v4396_v30 = vrot.slane %v4394_v15, 4  ;;  %v4397_v21 = vrot.slane %v8869_v7, 5  ;;  %v4401_v44 = vrot.slane %v8870_v11, 5  ;;  %v5643_v4 = vld [vmem:[%s6688_s26 + $0x3c] sm:$0xe] }
 0x131   : > { %6128 = vmatmul.mubr.msk.bf16.gmra.mrb[24].mxu0 %vm711_vm5, %v5621_v28  ;;  %v4389_v28 = vrot.slane %v4387_v29, 4  ;;  %v5685_v55 = vcombine.low %v8179_v5, %v8191_v48  ;;  %v8204_v17 = vsel %vm6965_vm8, %v5669_v35, %v4471_v49  ;;  %v4473_v53 = vrot.slane %v4471_v49, 4  ;;  %v5372_v35 = vld [vmem:[%s6688_s26 + $0x6c] sm:$0xf]  ;;  %v6569_v11 = vld [vmem:[%s6688_s26 + $0x70] sm:$0xf] }
 0x132   : > { %5976 = vmatmul.mubr.msk.bf16.gmra.mrb[8].mxu1 %vm711_vm5, %v6516_v37  ;;  %6131 = vmatprep.mubr.msk.bf16.mxu0 %vm711_vm5, %v5622_v3  ;;  %v4390_v37 = vrot.slane %v6568_v19, 5  ;;  %v5673_v3 = vcombine.low %v4381_v40, %v4384_v27  ;;  %v4388_v51 = vsel %vm6965_vm8, %v5657_v1, %v4387_v29  ;;  %v4395_v27 = vsel %vm6965_vm8, %v5658_v20, %v4394_v15  ;;  %v5655_v20 = vld [vmem:[%s6688_s26 + $0xcc] sm:$0xe] }
 0x133   : > { %5979 = vmatprep.mubr.msk.bf16.mxu1 %vm711_vm5, %v6517_v33  ;;  %v4474_v33 = vrot.slane %v7978_v6, 5  ;;  %v4398_v10 = vsel %vm6965_vm8, %v4396_v30, %v4397_v21  ;;  %v5670_v2 = vrot.slane %v5654_v60, 9  ;;  %v5659_v1 = vrot.slane %v5643_v4, 9 }
 0x134   : > { %v4391_v6 = vsel %vm6965_vm8, %v4389_v28, %v4390_v37  ;;  %v4403_v38 = vrot.slane %v4401_v44, 4  ;;  %v4478_v19 = vrot.slane %v7999_v25, 5  ;;  %v5675_v15 = vcombine.low %v4395_v27, %v4398_v10 }
 0x135   : > { %v8217_v40 = vsel %vm6965_vm8, %v4473_v53, %v4474_v33  ;;  %v5674_v37 = vcombine.low %v4388_v51, %v4391_v6  ;;  %v4402_v30 = vsel %vm6965_vm8, %v5659_v1, %v4401_v44  ;;  %v2277_v21 = vshll.u32 %v5372_v35, 16 }
 0x136   : > { %v5686_v29 = vcombine.low %v8204_v17, %v8217_v40  ;;  %v8233_v49 = vsel %vm6965_vm8, %v5670_v2, %v4478_v19  ;;  %v4480_v33 = vrot.slane %v4478_v19, 4  ;;  %v2283_v53 = vshll.u32 %v6569_v11, 16 }
 0x137   : > { %v2287_v44 = vshrl.u32 %v6569_v11, 16  ;;  %v5671_v4 = vrot.slane %v5655_v20, 9  ;;  %v4485_v51 = vrot.slane %v8059_v47, 5  ;;  %v4488_v6 = vrot.slane %v8113_v57, 5  ;;  %v5378_v57 = vld [vmem:[%s6688_s26 + $0x84] sm:$0xf] }
 0x138   : > { %v6571_v20 = vld [vmem:[%s6688_s26 + $0x88] sm:$0xf]  ;;  %v2461_v56 = vshll.u32 %v6582_v46, 16 }
 0x139   : > { %6132 = vmatmul.mubr.msk.bf16.gmra.mrb[28].mxu0 %vm711_vm5, %v5623_v62  ;;  %v8871_v62 = vld [vmem:[#allocation10_spill] sm:$0xff]  ;;  %v8256_v27 = vsel %vm6965_vm8, %v5671_v4, %v4485_v51  ;;  %v4487_v10 = vrot.slane %v4485_v51, 4  ;;  %v2289_v19 = vrot.slane %v2287_v44, 4  ;;  %v5384_v44 = vld [vmem:[%s6688_s26 + $0x9c] sm:$0xf] }
 0x13a   : > { %5980 = vmatmul.mubr.msk.bf16.gmra.mrb[12].mxu1 %vm711_vm5, %v6518_v52  ;;  %6137 = vmatprep.mubr.msk.bf16.mxu0 %vm711_vm5, %v5673_v3  ;;  %v4404_v28 = vrot.slane %v8871_v62, 5  ;;  %v4481_v52 = vrot.slane %v8075_v59, 5  ;;  %v6520_v3 = vld [vmem:[%s6688_s26 + $0x78] sm:$0xff]   ;;  %v2274_v59 = vshrl.u32 %v5372_v35, 16  ;;  %v2279_v62 = vrot.slane %v2277_v21, 5  ;;  %v6524_v21 = vld [vmem:[%s6688_s26 + $0xa8] sm:$0xff]  }
 0x13b   : > { %5983 = vmatprep.mubr.msk.bf16.mxu1 %vm711_vm5, %v6519_v39  ;;  %v6521_v39 = vld [vmem:[%s6688_s26 + $0x84] sm:$0xff]   ;;  %v8261_v47 = vsel %vm6965_vm8, %v4487_v10, %v4488_v6  ;;  %v6525_v4 = vld [vmem:[%s6688_s26 + $0xb4] sm:$0xff]  }
 0x13c   : > { %v4405_v25 = vsel %vm6965_vm8, %v4403_v38, %v4404_v28  ;;  %v8243_v7 = vsel %vm6965_vm8, %v4480_v33, %v4481_v52  ;;  %v2276_v1 = vrot.slane %v2274_v59, 4  ;;  %v6522_v38 = vld [vmem:[%s6688_s26 + $0x90] sm:$0xff]   ;;  %v2285_v28 = vrot.slane %v2283_v53, 5 }
 0x13d   : > { %v5687_v60 = vcombine.low %v8233_v49, %v8243_v7  ;;  %v5676_v2 = vcombine.low %v4402_v30, %v4405_v25  ;;  %v5688_v52 = vcombine.low %v8256_v27, %v8261_v47  ;;  %v2322_v33 = vshrl.u32 %v5378_v57, 16  ;;  %v5381_v59 = vld [vmem:[%s6688_s26 + $0x90] sm:$0xf] }
 0x13e   : > { %v2280_v22 = vor.u32 %v2279_v62, %v2276_v1  ;;  %v2290_v35 = vor.u32 %v2289_v19, %v2285_v28  ;;  %v2331_v30 = vshll.u32 %v6571_v20, 16  ;;  %v2335_v25 = vshrl.u32 %v6571_v20, 16  ;;  %v6572_v1 = vld [vmem:[%s6688_s26 + $0x94] sm:$0xf] }
 0x13f   : > { %v2324_v12 = vrot.slane %v2322_v33, 4  ;;  %v2346_v10 = vshrl.u32 %v5381_v59, 16  ;;  %v2359_v62 = vshrl.u32 %v6572_v1, 16  ;;  %v2370_v19 = vshrl.u32 %v5384_v44, 16 }
 0x140   : > { %v2281_v53 = vrot.slane %v2280_v22, 4  ;;  %v2291_v41 = vrot.slane %v2290_v35, 4  ;;  %v8280_v51 = vrot.slane %v2331_v30, 5  ;;  %v2337_v6 = vrot.slane %v2335_v25, 4 }
 0x141   : > { %6138 = vmatmul.mubr.msk.bf16.vlgmr.msra.gmra.mrb[0].mxu0 %vm711_vm5, %v5674_v37  ;;  %v6523_v37 = vld [vmem:[%s6688_s26 + $0x9c] sm:$0xff]   ;;  %v2372_v20 = vrot.slane %v2370_v19, 4 }
 0x142   : > { %5984 = vmatmul.mubr.msk.bf16.gmra.mrb[16].mxu1 %vm711_vm5, %v6520_v3  ;;  %6141 = vmatprep.mubr.msk.bf16.mxu0 %vm711_vm5, %v5675_v15  ;;  %v6570_v3 = vld [vmem:[%s6688_s26 + $0x74] sm:$0x1]  ;;  %v2286_v22 = vsel %vm6735_vm4, %v2281_v53, %v2285_v28  ;;  %v2338_v33 = vor.u32 %v2337_v6, %v8280_v51 }
 0x143   : > { %5987 = vmatprep.mubr.msk.bf16.mxu1 %vm711_vm5, %v6521_v39  ;;  %v2293_v15 = vshll.u32 %v6570_v3, 16  ;;  %v2325_v39 = vshll.u32 %v5378_v57, 16  ;;  %v6573_v57 = vld [vmem:[%s6688_s26 + $0xa0] sm:$0xf] }
 0x144   : > { %v2379_v3 = vshll.u32 %v6573_v57, 16 }
 0x145   : > { %v2295_v11 = vrot.slane %v2293_v15, 5  ;;  %v2383_v15 = vshrl.u32 %v6573_v57, 16 }
 0x146   : > { %v8302_v28 = vrot.slane %v2379_v3, 5 }
 0x147   : > { %v2296_v34 = vsel %vm6735_vm4, %v2291_v41, %v2295_v11  ;;  %v2385_v25 = vrot.slane %v2383_v15, 4  ;;  %v2339_v41 = vrot.slane %v2338_v33, 4 }
 0x149   : > { %6142 = vmatmul.mubr.msk.bf16.gmra.mrb[4].mxu0 %vm711_vm5, %v5676_v2  ;;  %v2349_v2 = vshll.u32 %v5381_v59, 16  ;;  %v6526_v59 = vld [vmem:[%s6688_s26 + $0xc0] sm:$0xff]  }
 0x14a   : > { %5988 = vmatmul.mubr.msk.bf16.gmra.mrb[20].mxu1 %vm711_vm5, %v6522_v38  ;;  %6145 = vmatprep.mubr.msk.bf16.mxu0 %vm711_vm5, %v5677_v8  ;;  %v2327_v8 = vrot.slane %v2325_v39, 5  ;;  %v2355_v38 = vshll.u32 %v6572_v1, 16  ;;  %v2348_v39 = vrot.slane %v2346_v10, 4  ;;  %v6576_v1 = vld [vmem:[%s6688_s26 + $0xa4] sm:$0x1] }
 0x14b   : > { %5991 = vmatprep.mubr.msk.bf16.mxu1 %vm711_vm5, %v6523_v37  ;;  %v2373_v37 = vshll.u32 %v5384_v44, 16  ;;  %v2351_v26 = vrot.slane %v2349_v2, 5  ;;  %v2386_v2 = vor.u32 %v2385_v25, %v8302_v28 }
 0x14c   : > { %v2328_v35 = vor.u32 %v2327_v8, %v2324_v12  ;;  %v8300_v18 = vrot.slane %v2355_v38, 5  ;;  %v6575_v8 = vld [vmem:[%s6688_s26 + $0x98] sm:$0x1]  ;;  %v2389_v38 = vshll.u32 %v6576_v1, 16 }
 0x14d   : > { %v2375_v30 = vrot.slane %v2373_v37, 5  ;;  %v2352_v12 = vor.u32 %v2351_v26, %v2348_v39  ;;  %v2365_v44 = vshll.u32 %v6575_v8, 16  ;;  %v2407_v37 = vshrl.u32 %v6577_v36, 16 }
 0x14e   : > { %v2329_v53 = vrot.slane %v2328_v35, 4  ;;  %v2387_v33 = vrot.slane %v2386_v2, 4  ;;  %v2391_v39 = vrot.slane %v2389_v38, 5  ;;  %v6581_v38 = vld [vmem:[%s6688_s26 + $0xbc] sm:$0x1] }
 0x14f   : > { %v2376_v10 = vor.u32 %v2375_v30, %v2372_v20  ;;  %v2353_v15 = vrot.slane %v2352_v12, 4  ;;  %v2409_v30 = vrot.slane %v2407_v37, 4  ;;  %v2437_v13 = vshll.u32 %v6581_v38, 16 }
 0x150   : > { %v2334_v57 = vsel %vm6735_vm4, %v2329_v53, %v8280_v51  ;;  %v5393_v53 = vld [vmem:[%s6688_s26 + $0xc0] sm:$0xf]  ;;  %v2392_v9 = vsel %vm6735_vm4, %v2387_v33, %v2391_v39 }
 0x151   : > { %6146 = vmatmul.mubr.msk.bf16.gmra.mrb[8].mxu0 %vm711_vm5, %v5678_v50  ;;  %v2341_v50 = vshll.u32 %v6574_v58, 16  ;;  %v2431_v58 = vshrl.u32 %v6578_v45, 16  ;;  %v2377_v35 = vrot.slane %v2376_v10, 4 }
 0x152   : > { %5992 = vmatmul.mubr.msk.bf16.gmra.mrb[24].mxu1 %vm711_vm5, %v6524_v21  ;;  %6149 = vmatprep.mubr.msk.bf16.mxu0 %vm711_vm5, %v5679_v24  ;;  %v2361_v24 = vrot.slane %v2359_v62, 4  ;;  %v5405_v21 = vcombine.low %v2286_v22, %v2296_v34  ;;  %v5390_v62 = vld [vmem:[%s6688_s26 + $0xb4] sm:$0xf]  ;;  %v2367_v22 = vrot.slane %v2365_v44, 5 }
 0x153   : > { %5995 = vmatprep.mubr.msk.bf16.mxu1 %vm711_vm5, %v6525_v4  ;;  %v2343_v11 = vrot.slane %v2341_v50, 5  ;;  %v5387_v4 = vld [vmem:[%s6688_s26 + $0xa8] sm:$0xf]  ;;  %v2418_v34 = vshrl.u32 %v5390_v62, 16  ;;  %v2421_v23 = vshll.u32 %v5390_v62, 16  ;;  %v2382_v8 = vsel %vm6735_vm4, %v2377_v35, %v8302_v28 }
 0x154   : > { %v2362_v6 = vor.u32 %v2361_v24, %v8300_v18  ;;  %v2394_v19 = vshrl.u32 %v5387_v4, 16  ;;  %v2397_v42 = vshll.u32 %v5387_v4, 16  ;;  %v2442_v4 = vshrl.u32 %v5393_v53, 16 }
 0x155   : > { %v2344_v3 = vsel %vm6735_vm4, %v2339_v41, %v2343_v11  ;;  %v2420_v25 = vrot.slane %v2418_v34, 4  ;;  %v2433_v11 = vrot.slane %v2431_v58, 4  ;;  %v2358_v41 = vsel %vm6735_vm4, %v2353_v15, %v8300_v18  ;;  %v6579_v18 = vld [vmem:[%s6688_s26 + $0xb0] sm:$0x1] }
 0x156   : > { %v2363_v50 = vrot.slane %v2362_v6, 4  ;;  %v2396_v26 = vrot.slane %v2394_v19, 4  ;;  %v2399_v24 = vrot.slane %v2397_v42, 5  ;;  %v5407_v51 = vcombine.low %v2334_v57, %v2344_v3  ;;  %v6580_v6 = vld [vmem:[%s6688_s26 + $0xc4] sm:$0xf] }
 0x157   : > { %v2413_v44 = vshll.u32 %v6579_v18, 16  ;;  %v2445_v28 = vshll.u32 %v5393_v53, 16  ;;  %v2451_v10 = vshll.u32 %v6580_v6, 16  ;;  %v2455_v2 = vshrl.u32 %v6580_v6, 16 }
 0x158   : > { %v2368_v12 = vsel %vm6735_vm4, %v2363_v50, %v2367_v22  ;;  %v2400_v54 = vor.u32 %v2399_v24, %v2396_v26  ;;  %v2439_v22 = vrot.slane %v2437_v13, 5  ;;  %v2463_v35 = vrot.slane %v2461_v56, 5 }
 0x159   : > { %6150 = vmatmul.mubr.msk.bf16.gmra.mrb[12].mxu0 %vm711_vm5, %v5680_v32  ;;  %v2403_v32 = vshll.u32 %v6577_v36, 16  ;;  %v5408_v16 = vcombine.low %v2358_v41, %v2368_v12  ;;  %v2415_v42 = vrot.slane %v2413_v44, 5  ;;  %v2444_v36 = vrot.slane %v2442_v4, 4 }
 0x15a   : > { %5996 = vmatmul.mubr.msk.bf16.gmra.mrb[28].mxu1 %vm711_vm5, %v6526_v59  ;;  %6153 = vmatprep.mubr.msk.bf16.mxu0 %vm711_vm5, %v5681_v0  ;;  %v2427_v0 = vshll.u32 %v6578_v45, 16  ;;  %v2423_v59 = vrot.slane %v2421_v23, 5  ;;  %v2401_v62 = vrot.slane %v2400_v54, 4  ;;  %v2453_v37 = vrot.slane %v2451_v10, 5 }
 0x15b   : > { %6017 = vmatprep.mubr.msk.bf16.mxu1 %vm711_vm5, %v5405_v21  ;;  %v2405_v20 = vrot.slane %v2403_v32, 5  ;;  %v2447_v32 = vrot.slane %v2445_v28, 5  ;;  %v2457_v57 = vrot.slane %v2455_v2, 4 }
 0x15c   : > { %v2429_v21 = vrot.slane %v2427_v0, 5 }
 0x15d   : > { %v2406_v34 = vsel %vm6735_vm4, %v2401_v62, %v2405_v20  ;;  %v2448_v45 = vor.u32 %v2447_v32, %v2444_v36  ;;  %v2458_v0 = vor.u32 %v2457_v57, %v2453_v37 }
 0x15e   : > { %v2434_v1 = vor.u32 %v2433_v11, %v2429_v21 }
 0x15f   : > { %v2449_v58 = vrot.slane %v2448_v45, 4  ;;  %v2459_v50 = vrot.slane %v2458_v0, 4 }
 0x160   : > { %v2435_v15 = vrot.slane %v2434_v1, 4 }
 0x161   : > { %6154 = vmatmul.mubr.msk.bf16.gmra.mrb[16].mxu0 %vm711_vm5, %v5682_v63  ;;  %v2410_v63 = vor.u32 %v2409_v30, %v2405_v20  ;;  %v2454_v33 = vsel %vm6735_vm4, %v2449_v58, %v2453_v37  ;;  %v2464_v39 = vsel %vm6735_vm4, %v2459_v50, %v2463_v35 }
 0x162   : > { %6018 = vmatmul.mubr.msk.bf16.vlgmr.msra.gmra.mrb[16].mxu1 %vm711_vm5, %v8109_v61  ;;  %6157 = vmatprep.mubr.msk.bf16.mxu0 %vm711_vm5, %v5683_v14  ;;  %v2424_v61 = vor.u32 %v2423_v59, %v2420_v25  ;;  %v5409_v14 = vcombine.low %v2382_v8, %v2392_v9  ;;  %v2440_v5 = vsel %vm6735_vm4, %v2435_v15, %v2439_v22 }
 0x163   : > { %6021 = vmatprep.mubr.msk.bf16.mxu1 %vm711_vm5, %v5407_v51  ;;  %v2411_v19 = vrot.slane %v2410_v63, 4  ;;  %v5412_v26 = vcombine.low %v2454_v33, %v2464_v39 }
 0x164   : > { %v2425_v3 = vrot.slane %v2424_v61, 4 }
 0x165   : > { %v2416_v23 = vsel %vm6735_vm4, %v2411_v19, %v2415_v42 }
 0x166   : > { %v5410_v48 = vcombine.low %v2406_v34, %v2416_v23 }
 0x169   : > { %6158 = vmatmul.mubr.msk.bf16.gmra.mrb[20].mxu0 %vm711_vm5, %v5684_v43  ;;  %v2430_v43 = vsel %vm6735_vm4, %v2425_v3, %v2429_v21 }
 0x16a   : > { %6022 = vmatmul.mubr.msk.bf16.gmra.mrb[20].mxu1 %vm711_vm5, %v5408_v16  ;;  %6161 = vmatprep.mubr.msk.bf16.mxu0 %vm711_vm5, %v5685_v55  ;;  %v5411_v55 = vcombine.low %v2430_v43, %v2440_v5 }
 0x16b   : > { %6025 = vmatprep.mubr.msk.bf16.mxu1 %vm711_vm5, %v5409_v14 }
 0x171   : > { %6162 = vmatmul.mubr.msk.bf16.gmra.mrb[24].mxu0 %vm711_vm5, %v5686_v29 }
 0x172   : > { %6026 = vmatmul.mubr.msk.bf16.gmra.mrb[24].mxu1 %vm711_vm5, %v5410_v48  ;;  %6165 = vmatprep.mubr.msk.bf16.mxu0 %vm711_vm5, %v5687_v60 }
 0x173   : > { %6029 = vmatprep.mubr.msk.bf16.mxu1 %vm711_vm5, %v5411_v55 }
 0x179   : > { %6166 = vmatmul.mubr.msk.bf16.gmra.mrb[28].mxu0 %vm711_vm5, %v5688_v52 }
 0x17a   : > { %6030 = vmatmul.mubr.msk.bf16.gmra.mrb[28].mxu1 %vm711_vm5, %v5412_v26 }
 0x1f5   : > { %v5969_v17 = vpop.f32.mrb[0].mxu1 }
 0x1f6   : > { %v1874_v40 = vpop.f32.mrb[1].mxu1 }
 0x1f7   : > { %v5970_v29 = vpop.f32.mrb[2].mxu1 }
 0x1f8   : > { %v1877_v49 = vpop.f32.mrb[3].mxu1 }
 0x1fd   : > { %v5973_v7 = vpop.f32.mrb[4].mxu1 }
 0x1fe   : > { %v1890_v60 = vpop.f32.mrb[5].mxu1 }
 0x1ff   : > { %v5974_v24 = vpop.f32.mrb[6].mxu1 }
 0x200   : > { %v1893_v20 = vpop.f32.mrb[7].mxu1 }
 0x205   : > { %v5977_v30 = vpop.f32.mrb[8].mxu1 }
 0x206   : > { %v1906_v51 = vpop.f32.mrb[9].mxu1 }
 0x207   : > { %v5978_v31 = vpop.f32.mrb[10].mxu1 }
 0x208   : > { %v1909_v25 = vpop.f32.mrb[11].mxu1 }
 0x20d   : > { %v5981_v59 = vpop.f32.mrb[12].mxu1 }
 0x20e   : > { %v1922_v21 = vpop.f32.mrb[13].mxu1 }
 0x20f   : > { %v5982_v11 = vpop.f32.mrb[14].mxu1 }
 0x210   : > { %v1925_v27 = vpop.f32.mrb[15].mxu1 }
 0x214   : > { %v6139_v47 = vpop.f32.mrb[0].mxu0 }
 0x215   : > { %v8391_v52 = vadd.f32 %v6139_v47, %v5969_v17  ;;  %v4625_v53 = vpop.f32.mrb[1].mxu0 }
 0x216   : > { %v8393_v41 = vadd.f32 %v4625_v53, %v1874_v40  ;;  %v6140_v12 = vpop.f32.mrb[2].mxu0 }
 0x217   : > { %v8395_v8 = vadd.f32 %v6140_v12, %v5970_v29  ;;  %v4628_v9 = vpop.f32.mrb[3].mxu0 }
 0x218   : > { %v8397_v54 = vadd.f32 %v4628_v9, %v1877_v49 }
 0x21c   : > { %v6143_v63 = vpop.f32.mrb[4].mxu0 }
 0x21d   : > { %v8399_v18 = vadd.f32 %v6143_v63, %v5973_v7  ;;  %v4641_v44 = vpop.f32.mrb[5].mxu0 }
 0x21e   : > { %v8401_v4 = vadd.f32 %v4641_v44, %v1890_v60  ;;  %v6144_v28 = vpop.f32.mrb[6].mxu0 }
 0x21f   : > { %v8403_v6 = vadd.f32 %v6144_v28, %v5974_v24  ;;  %v4644_v10 = vpop.f32.mrb[7].mxu0 }
 0x220   : > { %v8405_v2 = vadd.f32 %v4644_v10, %v1893_v20 }
 0x224   : > { %v6147_v61 = vpop.f32.mrb[8].mxu0 }
 0x225   : > { %v8407_v1 = vadd.f32 %v6147_v61, %v5977_v30  ;;  %v4657_v38 = vpop.f32.mrb[9].mxu0 }
 0x226   : > { %v8409_v13 = vadd.f32 %v4657_v38, %v1906_v51  ;;  %v6148_v16 = vpop.f32.mrb[10].mxu0 }
 0x227   : > { %v8411_v14 = vadd.f32 %v6148_v16, %v5978_v31  ;;  %v4660_v62 = vpop.f32.mrb[11].mxu0 }
 0x228   : > { %v8413_v19 = vadd.f32 %v4660_v62, %v1909_v25 }
 0x22c   : > { %v6151_v42 = vpop.f32.mrb[12].mxu0 }
 0x22d   : > { %v8415_v36 = vadd.f32 %v6151_v42, %v5981_v59  ;;  %v4673_v32 = vpop.f32.mrb[13].mxu0 }
 0x22e   : > { %v8417_v37 = vadd.f32 %v4673_v32, %v1922_v21  ;;  %v6152_v57 = vpop.f32.mrb[14].mxu0 }
 0x22f   : > { %v8419_v3 = vadd.f32 %v6152_v57, %v5982_v11  ;;  %v4676_v15 = vpop.f32.mrb[15].mxu0 }
 0x230   : > { %v8421_v22 = vadd.f32 %v4676_v15, %v1925_v27 }
 0x234   : > { %v6155_v34 = vpop.f32.mrb[16].mxu0 }
 0x235   : > { %v6019_v23 = vpop.f32.mrb[16].mxu1  ;;  %v4689_v45 = vpop.f32.mrb[17].mxu0 }
 0x236   : > { %v8423_v0 = vadd.f32 %v6155_v34, %v6019_v23  ;;  %v2664_v46 = vpop.f32.mrb[17].mxu1  ;;  %v6156_v56 = vpop.f32.mrb[18].mxu0  ;;  %v4789_v34 = vsel (!%p5705_p10), %vm4788_vm9, %v8393_v41, 0.0  ;;  %v4790_v23 = vsel (!%p5705_p10), %vm4788_vm9, %v8397_v54, 0.0 }
 0x237   : > { %v8425_v43 = vadd.f32 %v4689_v45, %v2664_v46  ;;  %v6020_v5 = vpop.f32.mrb[18].mxu1  ;;  %v4692_v48 = vpop.f32.mrb[19].mxu0  ;;  %v4792_v45 = vsel (!%p5705_p10), %vm4788_vm9, %v8391_v52, 0.0  ;;  %v4791_v46 = vadd.f32 (!%p5705_p10), %v4790_v23, %v4789_v34  ;;  %v4867_v34 = vmul.f32 (!%p5705_p10), %v8405_v2, %v8405_v2 }
 0x238   : > { %v8427_v55 = vadd.f32 %v6156_v56, %v6020_v5  ;;  %v2667_v58 = vpop.f32.mrb[19].mxu1  ;;  %v4794_v56 = vsel (!%p5705_p10), %vm4788_vm9, %v8395_v8, 0.0 }
 0x239   : > { %v8429_v50 = vadd.f32 %v4692_v48, %v2667_v58  ;;  %v4793_v5 = vadd.f32 (!%p5705_p10), %v4792_v45, %v4791_v46  ;;  %v4796_v48 = vsel (!%p5705_p10), %vm4788_vm9, %v8401_v4, 0.0 }
 0x23b   : > { %v4795_v58 = vadd.f32 (!%p5705_p10), %v4794_v56, %v4793_v5  ;;  %v4814_v56 = vsel (!%p5705_p10), %vm4788_vm9, %v8421_v22, 0.0  ;;  %v4868_v5 = vmul.f32 (!%p5705_p10), %v8399_v18, %v8399_v18 }
 0x23c   : > { %v6159_v35 = vpop.f32.mrb[20].mxu0 }
 0x23d   : > { %v6023_v33 = vpop.f32.mrb[20].mxu1  ;;  %v4705_v39 = vpop.f32.mrb[21].mxu0 }
 0x23e   : > { %v8431_v26 = vadd.f32 %v6159_v35, %v6023_v33  ;;  %v2680_v17 = vpop.f32.mrb[21].mxu1  ;;  %v6160_v40 = vpop.f32.mrb[22].mxu0  ;;  %v4798_v35 = vsel (!%p5705_p10), %vm4788_vm9, %v8405_v2, 0.0  ;;  %v4797_v33 = vadd.f32 (!%p5705_p10), %v4796_v48, %v4795_v58 }
 0x23f   : > { %v8433_v29 = vadd.f32 %v4705_v39, %v2680_v17  ;;  %v6024_v49 = vpop.f32.mrb[22].mxu1  ;;  %v4708_v7 = vpop.f32.mrb[23].mxu0  ;;  %v4800_v39 = vsel (!%p5705_p10), %vm4788_vm9, %v8399_v18, 0.0 }
 0x240   : > { %v8435_v60 = vadd.f32 %v6160_v40, %v6024_v49  ;;  %v2683_v24 = vpop.f32.mrb[23].mxu1  ;;  %v4799_v17 = vadd.f32 (!%p5705_p10), %v4798_v35, %v4797_v33  ;;  %v4802_v40 = vsel (!%p5705_p10), %vm4788_vm9, %v8403_v6, 0.0  ;;  %v4816_v33 = vsel (!%p5705_p10), %vm4788_vm9, %v8415_v36, 0.0 }
 0x241   : > { %v8437_v20 = vadd.f32 %v4708_v7, %v2683_v24  ;;  %v4804_v7 = vsel (!%p5705_p10), %vm4788_vm9, %v8409_v13, 0.0 }
 0x242   : > { %v4801_v49 = vadd.f32 (!%p5705_p10), %v4800_v39, %v4799_v17  ;;  %v4869_v39 = vmul.f32 (!%p5705_p10), %v8403_v6, %v8403_v6  ;;  %v4903_v17 = vsel (!%p5705_p10), %vm4788_vm9, %v4867_v34, 0.0 }
 0x244   : > { %v6163_v30 = vpop.f32.mrb[24].mxu0  ;;  %v4803_v24 = vadd.f32 (!%p5705_p10), %v4802_v40, %v4801_v49 }
 0x245   : > { %v6027_v51 = vpop.f32.mrb[24].mxu1  ;;  %v4721_v31 = vpop.f32.mrb[25].mxu0 }
 0x246   : > { %v8439_v25 = vadd.f32 %v6163_v30, %v6027_v51  ;;  %v2696_v59 = vpop.f32.mrb[25].mxu1  ;;  %v6164_v21 = vpop.f32.mrb[26].mxu0  ;;  %v4862_v30 = vmul.f32 (!%p5705_p10), %v8393_v41, %v8393_v41  ;;  %v4806_v51 = vsel (!%p5705_p10), %vm4788_vm9, %v8413_v19, 0.0 }
 0x247   : > { %v8441_v11 = vadd.f32 %v4721_v31, %v2696_v59  ;;  %v6028_v27 = vpop.f32.mrb[26].mxu1  ;;  %v4724_v47 = vpop.f32.mrb[27].mxu0  ;;  %v4863_v31 = vmul.f32 (!%p5705_p10), %v8397_v54, %v8397_v54  ;;  %v4864_v59 = vmul.f32 (!%p5705_p10), %v8391_v52, %v8391_v52 }
 0x248   : > { %v8443_v53 = vadd.f32 %v6164_v21, %v6028_v27  ;;  %v2699_v12 = vpop.f32.mrb[27].mxu1  ;;  %v4805_v21 = vadd.f32 (!%p5705_p10), %v4804_v7, %v4803_v24  ;;  %v4808_v27 = vsel (!%p5705_p10), %vm4788_vm9, %v8407_v1, 0.0  ;;  %v4818_v7 = vsel (!%p5705_p10), %vm4788_vm9, %v8419_v3, 0.0 }
 0x249   : > { %v8445_v9 = vadd.f32 %v4724_v47, %v2699_v12  ;;  %v4865_v47 = vmul.f32 (!%p5705_p10), %v8395_v8, %v8395_v8  ;;  %v4870_v24 = vmul.f32 (!%p5705_p10), %v8409_v13, %v8409_v13 }
 0x24a   : > { %v4807_v12 = vadd.f32 (!%p5705_p10), %v4806_v51, %v4805_v21  ;;  %v4871_v21 = vmul.f32 (!%p5705_p10), %v8413_v19, %v8413_v19 }
 0x24b   : > { %4786 = sbr.rel (%p5705_p10) target bundleno = 670 (0x29e), region = 44  ;;  %v4899_v23 = vsel (!%p5705_p10), %vm4788_vm9, %v4865_v47, 0.0 }
 0x24c   : > { %v6167_v63 = vpop.f32.mrb[28].mxu0 }
 0x24d   : > { %v6031_v44 = vpop.f32.mrb[28].mxu1  ;;  %v4737_v28 = vpop.f32.mrb[29].mxu0 }
 0x24e   : > { %v8447_v10 = vadd.f32 %v6167_v63, %v6031_v44  ;;  %v2712_v61 = vpop.f32.mrb[29].mxu1  ;;  %v6168_v38 = vpop.f32.mrb[30].mxu0  ;;  %v4894_v63 = vsel (!%p5705_p10), %vm4788_vm9, %v4862_v30, 0.0  ;;  %v4810_v44 = vsel (!%p5705_p10), %vm4788_vm9, %v8411_v14, 0.0  ;;  %v4905_v30 = vsel (!%p5705_p10), %vm4788_vm9, %v4868_v5, 0.0 }
 0x24f   : > { %v8449_v16 = vadd.f32 %v4737_v28, %v2712_v61  ;;  %v6032_v62 = vpop.f32.mrb[30].mxu1  ;;  %v4740_v42 = vpop.f32.mrb[31].mxu0  ;;  %v4866_v28 = vmul.f32 (!%p5705_p10), %v8401_v4, %v8401_v4  ;;  %v4895_v61 = vsel (!%p5705_p10), %vm4788_vm9, %v4863_v31, 0.0 }
 0x250   : > { %v8451_v32 = vadd.f32 %v6168_v38, %v6032_v62  ;;  %v2715_v57 = vpop.f32.mrb[31].mxu1  ;;  %v4897_v38 = vsel (!%p5705_p10), %vm4788_vm9, %v4864_v59, 0.0  ;;  %v4809_v62 = vadd.f32 (!%p5705_p10), %v4808_v27, %v4807_v12  ;;  %v4820_v59 = vsel (!%p5705_p10), %vm4788_vm9, %v8425_v43, 0.0 }
 0x251   : > { %v8453_v15 = vadd.f32 %v4740_v42, %v2715_v57  ;;  %v4896_v42 = vadd.f32 (!%p5705_p10), %v4895_v61, %v4894_v63  ;;  %v4812_v57 = vsel (!%p5705_p10), %vm4788_vm9, %v8417_v37, 0.0  ;;  %v4901_v48 = vsel (!%p5705_p10), %vm4788_vm9, %v4866_v28, 0.0 }
 0x252   : > { %v4811_v45 = vadd.f32 %v4810_v44, %v4809_v62  ;;  %v4907_v27 = vsel %vm4788_vm9, %v4869_v39, 0.0  ;;  %v4822_v63 = vsel %vm4788_vm9, %v8429_v50, 0.0  ;;  %v4872_v44 = vmul.f32 %v8407_v1, %v8407_v1 }
 0x253   : > { %v4898_v46 = vadd.f32 %v4897_v38, %v4896_v42  ;;  %v4909_v28 = vsel %vm4788_vm9, %v4870_v24, 0.0  ;;  %v4824_v62 = vsel %vm4788_vm9, %v8423_v0, 0.0  ;;  %v4873_v42 = vmul.f32 %v8411_v14, %v8411_v14 }
 0x254   : > { %v4813_v58 = vadd.f32 %v4812_v57, %v4811_v45  ;;  %v4911_v57 = vsel %vm4788_vm9, %v4871_v21, 0.0  ;;  %v4826_v45 = vsel %vm4788_vm9, %v8427_v55, 0.0 }
 0x255   : > { %v4900_v35 = vadd.f32 %v4899_v23, %v4898_v46  ;;  %v4874_v46 = vmul.f32 %v8417_v37, %v8417_v37 }
 0x256   : > { %v4815_v40 = vadd.f32 %v4814_v56, %v4813_v58  ;;  %v4913_v56 = vsel %vm4788_vm9, %v4872_v44, 0.0  ;;  %v4828_v58 = vsel %vm4788_vm9, %v8433_v29, 0.0 }
 0x257   : > { %v4902_v49 = vadd.f32 %v4901_v48, %v4900_v35  ;;  %v4875_v35 = vmul.f32 %v8421_v22, %v8421_v22 }
 0x258   : > { %v4817_v51 = vadd.f32 %v4816_v33, %v4815_v40  ;;  %v4915_v33 = vsel %vm4788_vm9, %v4873_v42, 0.0  ;;  %v4830_v40 = vsel %vm4788_vm9, %v8437_v20, 0.0 }
 0x259   : > { %v4904_v31 = vadd.f32 %v4903_v17, %v4902_v49  ;;  %v4876_v49 = vmul.f32 %v8415_v36, %v8415_v36 }
 0x25a   : > { %v4819_v47 = vadd.f32 %v4818_v7, %v4817_v51  ;;  %v4917_v7 = vsel %vm4788_vm9, %v4874_v46, 0.0  ;;  %v4832_v51 = vsel %vm4788_vm9, %v8431_v26, 0.0 }
 0x25b   : > { %v4906_v12 = vadd.f32 %v4905_v30, %v4904_v31  ;;  %v4877_v31 = vmul.f32 %v8419_v3, %v8419_v3 }
 0x25c   : > { %v4821_v61 = vadd.f32 %v4820_v59, %v4819_v47  ;;  %v4919_v59 = vsel %vm4788_vm9, %v4875_v35, 0.0  ;;  %v4834_v47 = vsel %vm4788_vm9, %v8435_v60, 0.0 }
 0x25d   : > { %v4908_v38 = vadd.f32 %v4907_v27, %v4906_v12  ;;  %v4878_v12 = vmul.f32 %v8425_v43, %v8425_v43 }
 0x25e   : > { %v4823_v34 = vadd.f32 %v4822_v63, %v4821_v61  ;;  %v4921_v63 = vsel %vm4788_vm9, %v4876_v49, 0.0  ;;  %v4836_v61 = vsel %vm4788_vm9, %v8441_v11, 0.0 }
 0x25f   : > { %v4910_v23 = vadd.f32 %v4909_v28, %v4908_v38  ;;  %v4879_v38 = vmul.f32 %v8429_v50, %v8429_v50 }
 0x260   : > { %v4825_v5 = vadd.f32 %v4824_v62, %v4823_v34  ;;  %v4923_v62 = vsel %vm4788_vm9, %v4877_v31, 0.0  ;;  %v4838_v34 = vsel %vm4788_vm9, %v8445_v9, 0.0 }
 0x261   : > { %v4912_v48 = vadd.f32 %v4911_v57, %v4910_v23  ;;  %v4880_v23 = vmul.f32 %v8423_v0, %v8423_v0 }
 0x262   : > { %v4827_v39 = vadd.f32 %v4826_v45, %v4825_v5  ;;  %v4925_v45 = vsel %vm4788_vm9, %v4878_v12, 0.0  ;;  %v4840_v5 = vsel %vm4788_vm9, %v8439_v25, 0.0 }
 0x263   : > { %v4914_v17 = vadd.f32 %v4913_v56, %v4912_v48  ;;  %v4881_v48 = vmul.f32 %v8427_v55, %v8427_v55 }
 0x264   : > { %v4829_v24 = vadd.f32 %v4828_v58, %v4827_v39  ;;  %v4927_v58 = vsel %vm4788_vm9, %v4879_v38, 0.0  ;;  %v4842_v39 = vsel %vm4788_vm9, %v8443_v53, 0.0 }
 0x265   : > { %v4916_v30 = vadd.f32 %v4915_v33, %v4914_v17  ;;  %v4882_v17 = vmul.f32 %v8433_v29, %v8433_v29 }
 0x266   : > { %v4831_v21 = vadd.f32 %v4830_v40, %v4829_v24  ;;  %v4929_v40 = vsel %vm4788_vm9, %v4880_v23, 0.0  ;;  %v4844_v24 = vsel %vm4788_vm9, %v8449_v16, 0.0 }
 0x267   : > { %v4918_v27 = vadd.f32 %v4917_v7, %v4916_v30  ;;  %v4883_v30 = vmul.f32 %v8437_v20, %v8437_v20 }
 0x268   : > { %v4833_v44 = vadd.f32 %v4832_v51, %v4831_v21  ;;  %v4931_v51 = vsel %vm4788_vm9, %v4881_v48, 0.0  ;;  %v4846_v21 = vsel %vm4788_vm9, %v8453_v15, 0.0 }
 0x269   : > { %v4920_v28 = vadd.f32 %v4919_v59, %v4918_v27  ;;  %v4884_v27 = vmul.f32 %v8431_v26, %v8431_v26 }
 0x26a   : > { %v4835_v42 = vadd.f32 %v4834_v47, %v4833_v44  ;;  %v4933_v47 = vsel %vm4788_vm9, %v4882_v17, 0.0  ;;  %v4848_v44 = vsel %vm4788_vm9, %v8447_v10, 0.0  ;;  %v4889_v17 = vmul.f32 %v8443_v53, %v8443_v53 }
 0x26b   : > { %v4922_v57 = vadd.f32 %v4921_v63, %v4920_v28  ;;  %v4885_v28 = vmul.f32 %v8435_v60, %v8435_v60 }
 0x26c   : > { %v4837_v46 = vadd.f32 %v4836_v61, %v4835_v42  ;;  %v4935_v61 = vsel %vm4788_vm9, %v4883_v30, 0.0  ;;  %v4850_v42 = vsel %vm4788_vm9, %v8451_v32, 0.0 }
 0x26d   : > { %v4924_v56 = vadd.f32 %v4923_v62, %v4922_v57  ;;  %v4886_v57 = vmul.f32 %v8441_v11, %v8441_v11 }
 0x26e   : > { %v4839_v35 = vadd.f32 %v4838_v34, %v4837_v46  ;;  %v4937_v34 = vsel %vm4788_vm9, %v4884_v27, 0.0  ;;  %v4887_v46 = vmul.f32 %v8445_v9, %v8445_v9 }
 0x26f   : > { %v4926_v33 = vadd.f32 %v4925_v45, %v4924_v56  ;;  %v4939_v56 = vsel %vm4788_vm9, %v4885_v28, 0.0 }
 0x270   : > { %v4841_v49 = vadd.f32 %v4840_v5, %v4839_v35  ;;  %v4941_v35 = vsel %vm4788_vm9, %v4886_v57, 0.0 }
 0x271   : > { %v4928_v7 = vadd.f32 %v4927_v58, %v4926_v33  ;;  %v4888_v58 = vmul.f32 %v8439_v25, %v8439_v25 }
 0x272   : > { %v4843_v31 = vadd.f32 %v4842_v39, %v4841_v49 }
 0x273   : > { %v4930_v59 = vadd.f32 %v4929_v40, %v4928_v7  ;;  %v4943_v40 = vsel %vm4788_vm9, %v4887_v46, 0.0  ;;  %v4945_v30 = vsel %vm4788_vm9, %v4888_v58, 0.0 }
 0x274   : > { %v4845_v12 = vadd.f32 %v4844_v24, %v4843_v31  ;;  %v4890_v24 = vmul.f32 %v8449_v16, %v8449_v16 }
 0x275   : > { %v4932_v63 = vadd.f32 %v4931_v51, %v4930_v59  ;;  %v4891_v59 = vmul.f32 %v8453_v15, %v8453_v15 }
 0x276   : > { %v4847_v38 = vadd.f32 %v4846_v21, %v4845_v12  ;;  %v4947_v21 = vsel %vm4788_vm9, %v4889_v17, 0.0  ;;  %v4892_v12 = vmul.f32 %v8447_v10, %v8447_v10  ;;  %v4861_v17 = vld [vmem:[#allocation3] sm:$0x1] }
 0x277   : > { %v4934_v62 = vadd.f32 %v4933_v47, %v4932_v63  ;;  %v4949_v63 = vsel %vm4788_vm9, %v4890_v24, 0.0 }
 0x278   : > { %v4849_v23 = vadd.f32 %v4848_v44, %v4847_v38  ;;  %v4893_v38 = vmul.f32 %v8451_v32, %v8451_v32 }
 0x279   : > { %v4936_v45 = vadd.f32 %v4935_v61, %v4934_v62  ;;  %v4787_v61 = vld [vmem:[#allocation2] sm:$0x1]  ;;  %v4951_v62 = vsel %vm4788_vm9, %v4891_v59, 0.0 }
 0x27a   : > { %v4851_v5 = vadd.f32 %v4850_v42, %v4849_v23  ;;  %v4955_v46 = vsel %vm4788_vm9, %v4893_v38, 0.0 }
 0x27b   : > { %v4938_v48 = vadd.f32 %v4937_v34, %v4936_v45  ;;  %v4953_v34 = vsel %vm4788_vm9, %v4892_v12, 0.0 }
 0x27c   : > { %v4852_v33 = vrot.slane %v4851_v5, 4 }
 0x27d   : > { %v4940_v39 = vadd.f32 %v4939_v56, %v4938_v48 }
 0x27e   : > { %v4853_v49 = vadd.f32 %v4852_v33, %v4851_v5 }
 0x27f   : > { %v4942_v7 = vadd.f32 %v4941_v35, %v4940_v39 }
 0x280   : > { %v4854_v51 = vrot.slane %v4853_v49, 2 }
 0x281   : > { %v4944_v31 = vadd.f32 %v4943_v40, %v4942_v7 }
 0x282   : > { %v4855_v27 = vadd.f32 %v4854_v51, %v4853_v49 }
 0x283   : > { %v4946_v47 = vadd.f32 %v4945_v30, %v4944_v31 }
 0x284   : > { %v4856_v44 = vrot.slane %v4855_v27, 1 }
 0x285   : > { %v4948_v28 = vadd.f32 %v4947_v21, %v4946_v47 }
 0x286   : > { %v4857_v42 = vadd.f32 %v4856_v44, %v4855_v27 }
 0x287   : > { %v4950_v57 = vadd.f32 %v4949_v63, %v4948_v28 }
 0x288   : > { %v4858_v23 = vadd.f32 %v4857_v42, %v4787_v61 }
 0x289   : > { %v4952_v45 = vadd.f32 %v4951_v62, %v4950_v57 }
 0x28a   : > { %4860 = vst.msk [vmem:[#allocation2] sm:$0x1] %vm4859_vm10, %v4858_v23 }
 0x28b   : > { %v4954_v56 = vadd.f32 %v4953_v34, %v4952_v45 }
 0x28d   : > { %v4956_v5 = vadd.f32 %v4955_v46, %v4954_v56 }
 0x28f   : > { %v4957_v48 = vrot.slane %v4956_v5, 4 }
 0x291   : > { %v4958_v58 = vadd.f32 %v4957_v48, %v4956_v5 }
 0x293   : > { %v4959_v35 = vrot.slane %v4958_v58, 2 }
 0x295   : > { %v4960_v33 = vadd.f32 %v4959_v35, %v4958_v58 }
 0x297   : > { %v4961_v39 = vrot.slane %v4960_v33, 1 }
 0x299   : > { %v4962_v40 = vadd.f32 %v4961_v39, %v4960_v33 }
 0x29b   : > { %v4963_v49 = vadd.f32 %v4962_v40, %v4861_v17 }
 0x29d   : > { %4964 = vst.msk [vmem:[#allocation3] sm:$0x1] %vm4859_vm10, %v4963_v49 }
 0x29e PF: > { %p5706_p11 = scmp.ne.s32.totalorder %s6611_s16, 1 }
 0x29f   : > { %v4969_v7 = vld [vmem:[#allocation2] sm:$0x1] (!%p5706_p11)  ;;  %v4983_v27 = vlaneseq (!%p5706_p11)  ;;  %vm5058_vm11 = vcmask (!%p5706_p11), 64512  }
 0x2a0   : > { %4968 = sbr.rel (%p5706_p11) target bundleno = 721 (0x2d1), region = 48  ;;  %v4970_v30 = vmul.f32 (!%p5706_p11), 0.001953125, %v4969_v7  ;;  %v4977_v12 = vld [vmem:[%s8806_s2] sm:$0x1] (!%p5706_p11) }
 0x2a1   : > { %v4984_v47 = vshrl.u32 (!%p5706_p11), %v4983_v27, 7  ;;  %v4979_v61 = vld [vmem:[%s8807_s3] sm:$0x1] (!%p5706_p11) }
 0x2a2   : > { %v4973_v31 = vmul.f32 (!%p5706_p11), %v4970_v30, %v4970_v30 }
 0x2a3   : > { %v4985_v63 = vsub.s32 (!%p5706_p11), 0, %v4984_v47 }
 0x2a4   : > { %v4971_v24 = vld [vmem:[#allocation3] sm:$0x1] (!%p5706_p11) }
 0x2a5   : > { %v4972_v51 = vmul.f32 (!%p5706_p11), 0.001953125, %v4971_v24 }
 0x2a7   : > { %v4974_v59 = vsub.f32 %v4972_v51, %v4973_v31 }
 0x2a9   : > { %v4975_v21 = vadd.f32 1e-05, %v4974_v59 }
 0x2ab   : > { %6583 = vrsqrt.f32 %v4975_v21 }
 0x2b5   : > { %v6584_v44 = vpop.eup %6583 }
 0x2b6   : > { %v4978_v28 = vmul.f32 %v6584_v44, %v4977_v12 }
 0x2b8   : > { %v4980_v38 = vmul.f32 %v4978_v28, %v4970_v30  ;;  %v8625_v62 = vrot.slane %v4978_v28, %v4985_v63 }
 0x2ba   : > { %v4981_v42 = vsub.f32 %v4979_v61, %v4980_v38  ;;  %v4988_v57 = vmul.f32 %v8393_v41, %v8625_v62  ;;  %v4989_v34 = vmul.f32 %v8397_v54, %v8625_v62  ;;  %v4990_v23 = vmul.f32 %v8391_v52, %v8625_v62 }
 0x2bb   : > { %v4991_v45 = vmul.f32 %v8395_v8, %v8625_v62  ;;  %v4992_v46 = vmul.f32 %v8401_v4, %v8625_v62  ;;  %v4993_v56 = vmul.f32 %v8405_v2, %v8625_v62  ;;  %v4994_v5 = vmul.f32 %v8399_v18, %v8625_v62 }
 0x2bc   : > { %v8641_v48 = vrot.slane %v4981_v42, %v4985_v63  ;;  %v4995_v41 = vmul.f32 %v8403_v6, %v8625_v62  ;;  %v4996_v52 = vmul.f32 %v8409_v13, %v8625_v62  ;;  %v4997_v8 = vmul.f32 %v8413_v19, %v8625_v62 }
 0x2bd   : > { %v4998_v54 = vmul.f32 %v8407_v1, %v8625_v62  ;;  %v4999_v18 = vmul.f32 %v8411_v14, %v8625_v62  ;;  %v5000_v4 = vmul.f32 %v8417_v37, %v8625_v62  ;;  %v5001_v6 = vmul.f32 %v8421_v22, %v8625_v62 }
 0x2be   : > { %v5026_v2 = vadd.f32 %v8641_v48, %v4988_v57  ;;  %v5027_v13 = vadd.f32 %v8641_v48, %v4989_v34  ;;  %v5028_v19 = vadd.f32 %v8641_v48, %v4990_v23  ;;  %v5029_v1 = vadd.f32 %v8641_v48, %v4991_v45 }
 0x2bf   : > { %v5030_v14 = vadd.f32 %v8641_v48, %v4992_v46  ;;  %v5031_v58 = vadd.f32 %v8641_v48, %v4993_v56  ;;  %v5032_v37 = vadd.f32 %v8641_v48, %v4994_v5  ;;  %v5033_v22 = vadd.f32 %v8641_v48, %v4995_v41 }
 0x2c0   : > { %5059 = vst.msk [vmem:[%s6693_s30] sm:$0xff] %vm5058_vm11, %v5026_v2  ;;  %5060 = vst.msk [vmem:[%s6693_s30 + $0x8] sm:$0xff] %vm5058_vm11, %v5027_v13  ;;  %v5034_v35 = vadd.f32 %v8641_v48, %v4996_v52  ;;  %v5035_v33 = vadd.f32 %v8641_v48, %v4997_v8  ;;  %v5036_v39 = vadd.f32 %v8641_v48, %v4998_v54 }
 0x2c1   : > { %5061 = vst.msk [vmem:[%s6693_s30 + $0x10] sm:$0xff] %vm5058_vm11, %v5028_v19  ;;  %5062 = vst.msk [vmem:[%s6693_s30 + $0x18] sm:$0xff] %vm5058_vm11, %v5029_v1  ;;  %v5037_v17 = vadd.f32 %v8641_v48, %v4999_v18  ;;  %v5038_v40 = vadd.f32 %v8641_v48, %v5000_v4  ;;  %v5039_v49 = vadd.f32 %v8641_v48, %v5001_v6 }
 0x2c2   : > { %5063 = vst.msk [vmem:[%s6693_s30 + $0x20] sm:$0xff] %vm5058_vm11, %v5030_v14  ;;  %5064 = vst.msk [vmem:[%s6693_s30 + $0x28] sm:$0xff] %vm5058_vm11, %v5031_v58  ;;  %v5002_v7 = vmul.f32 %v8415_v36, %v8625_v62  ;;  %v5003_v24 = vmul.f32 %v8419_v3, %v8625_v62  ;;  %v5004_v30 = vmul.f32 %v8425_v43, %v8625_v62 }
 0x2c3   : > { %5065 = vst.msk [vmem:[%s6693_s30 + $0x30] sm:$0xff] %vm5058_vm11, %v5032_v37  ;;  %5066 = vst.msk [vmem:[%s6693_s30 + $0x38] sm:$0xff] %vm5058_vm11, %v5033_v22  ;;  %v5005_v51 = vmul.f32 %v8429_v50, %v8625_v62  ;;  %v5006_v36 = vmul.f32 %v8423_v0, %v8625_v62  ;;  %v5007_v3 = vmul.f32 %v8427_v55, %v8625_v62 }
 0x2c4   : > { %5067 = vst.msk [vmem:[%s6693_s30 + $0x40] sm:$0xff] %vm5058_vm11, %v5034_v35  ;;  %5068 = vst.msk [vmem:[%s6693_s30 + $0x48] sm:$0xff] %vm5058_vm11, %v5035_v33  ;;  %v5040_v31 = vadd.f32 %v8641_v48, %v5002_v7  ;;  %v5041_v43 = vadd.f32 %v8641_v48, %v5003_v24  ;;  %v5008_v50 = vmul.f32 %v8433_v29, %v8625_v62 }
 0x2c5   : > { %5069 = vst.msk [vmem:[%s6693_s30 + $0x50] sm:$0xff] %vm5058_vm11, %v5036_v39  ;;  %5070 = vst.msk [vmem:[%s6693_s30 + $0x58] sm:$0xff] %vm5058_vm11, %v5037_v17  ;;  %v5009_v0 = vmul.f32 %v8437_v20, %v8625_v62  ;;  %v5042_v55 = vadd.f32 %v8641_v48, %v5004_v30  ;;  %v5043_v59 = vadd.f32 %v8641_v48, %v5005_v51 }
 0x2c6   : > { %5071 = vst.msk [vmem:[%s6693_s30 + $0x60] sm:$0xff] %vm5058_vm11, %v5038_v40  ;;  %5072 = vst.msk [vmem:[%s6693_s30 + $0x68] sm:$0xff] %vm5058_vm11, %v5039_v49  ;;  %v5044_v21 = vadd.f32 %v8641_v48, %v5006_v36  ;;  %v5045_v27 = vadd.f32 %v8641_v48, %v5007_v3  ;;  %v5046_v47 = vadd.f32 %v8641_v48, %v5008_v50 }
 0x2c7   : > { %5073 = vst.msk [vmem:[%s6693_s30 + $0x70] sm:$0xff] %vm5058_vm11, %v5040_v31  ;;  %5074 = vst.msk [vmem:[%s6693_s30 + $0x78] sm:$0xff] %vm5058_vm11, %v5041_v43  ;;  %v5047_v29 = vadd.f32 %v8641_v48, %v5009_v0  ;;  %v5010_v20 = vmul.f32 %v8431_v26, %v8625_v62  ;;  %v5011_v12 = vmul.f32 %v8435_v60, %v8625_v62 }
 0x2c8   : > { %5075 = vst.msk [vmem:[%s6693_s30 + $0x80] sm:$0xff] %vm5058_vm11, %v5042_v55  ;;  %5076 = vst.msk [vmem:[%s6693_s30 + $0x88] sm:$0xff] %vm5058_vm11, %v5043_v59  ;;  %v5012_v63 = vmul.f32 %v8441_v11, %v8625_v62  ;;  %v5013_v44 = vmul.f32 %v8445_v9, %v8625_v62  ;;  %v5014_v26 = vmul.f32 %v8439_v25, %v8625_v62 }
 0x2c9   : > { %5077 = vst.msk [vmem:[%s6693_s30 + $0x90] sm:$0xff] %vm5058_vm11, %v5044_v21  ;;  %5078 = vst.msk [vmem:[%s6693_s30 + $0x98] sm:$0xff] %vm5058_vm11, %v5045_v27  ;;  %v5015_v60 = vmul.f32 %v8443_v53, %v8625_v62  ;;  %v5048_v28 = vadd.f32 %v8641_v48, %v5010_v20  ;;  %v5049_v11 = vadd.f32 %v8641_v48, %v5011_v12 }
 0x2ca   : > { %5079 = vst.msk [vmem:[%s6693_s30 + $0xa0] sm:$0xff] %vm5058_vm11, %v5046_v47  ;;  %5080 = vst.msk [vmem:[%s6693_s30 + $0xa8] sm:$0xff] %vm5058_vm11, %v5047_v29  ;;  %v5016_v9 = vmul.f32 %v8449_v16, %v8625_v62  ;;  %v5017_v25 = vmul.f32 %v8453_v15, %v8625_v62  ;;  %v5050_v53 = vadd.f32 %v8641_v48, %v5012_v63 }
 0x2cb   : > { %v5051_v61 = vadd.f32 %v8641_v48, %v5013_v44  ;;  %v5052_v38 = vadd.f32 %v8641_v48, %v5014_v26  ;;  %v5053_v42 = vadd.f32 %v8641_v48, %v5015_v60  ;;  %5081 = vst.msk [vmem:[%s6693_s30 + $0xb0] sm:$0xff] %vm5058_vm11, %v5048_v28  ;;  %5082 = vst.msk [vmem:[%s6693_s30 + $0xb8] sm:$0xff] %vm5058_vm11, %v5049_v11 }
 0x2cc   : > { %v5054_v16 = vadd.f32 %v8641_v48, %v5016_v9  ;;  %v5055_v57 = vadd.f32 %v8641_v48, %v5017_v25  ;;  %v5018_v15 = vmul.f32 %v8447_v10, %v8625_v62  ;;  %v5019_v34 = vmul.f32 %v8451_v32, %v8625_v62  ;;  %5083 = vst.msk [vmem:[%s6693_s30 + $0xc0] sm:$0xff] %vm5058_vm11, %v5050_v53 }
 0x2cd   : > { %5084 = vst.msk [vmem:[%s6693_s30 + $0xc8] sm:$0xff] %vm5058_vm11, %v5051_v61  ;;  %5085 = vst.msk [vmem:[%s6693_s30 + $0xd0] sm:$0xff] %vm5058_vm11, %v5052_v38 }
 0x2ce   : > { %5086 = vst.msk [vmem:[%s6693_s30 + $0xd8] sm:$0xff] %vm5058_vm11, %v5053_v42  ;;  %5087 = vst.msk [vmem:[%s6693_s30 + $0xe0] sm:$0xff] %vm5058_vm11, %v5054_v16  ;;  %v5056_v23 = vadd.f32 %v8641_v48, %v5018_v15  ;;  %v5057_v45 = vadd.f32 %v8641_v48, %v5019_v34 }
 0x2cf   : > { %5088 = vst.msk [vmem:[%s6693_s30 + $0xe8] sm:$0xff] %vm5058_vm11, %v5055_v57 }
 0x2d0   : > { %5089 = vst.msk [vmem:[%s6693_s30 + $0xf0] sm:$0xff] %vm5058_vm11, %v5056_v23  ;;  %5090 = vst.msk [vmem:[%s6693_s30 + $0xf8] sm:$0xff] %vm5058_vm11, %v5057_v45 }
 0x2d1 PF: > { %s14_s19 = sadd.s32 1, %s6623_s19   ;;  %s8872_s15 = smov %s6615_s17 }
 0x2d2   : > { %p11_p12 = scmp.ge.s32.totalorder %s14_s19, 6   ;;  %s8873_s16 = smov %s6619_s18 }
 0x2d3   : > { %s8874_s17 = smov %s8877_s20  ;;  %s8875_s18 = smov %s8881_s21 }
 0x2d4   :  { %13 = sbr.rel (!%p11_p12) target bundleno = 3 (0x3), region = 88 }

</bundles_post_ra>
